<compile_context>
chip_gen: v7x
topology: tpu7x:2x2x1
jax: 0.10.0
libtpu: 0.0.40
codegen_flags: <defaults>
</compile_context>

<pallas_src>
import math
import functools

import jax
import jax.numpy as jnp
from jax.experimental import pallas as pl
from jax.experimental.pallas import tpu as pltpu


def _round_up(x, m):
    return ((x + m - 1) // m) * m


# ---------------------------------------------------------------------------
# Pallas kernel: one batch element per grid step, everything fused.
# ---------------------------------------------------------------------------
def _encoder_layer_kernel(phone_ref,
                          g1_ref, b1_ref,
                          wqkv_ref, bqkv_ref, projt_ref, fbias_ref, wo_ref, bo_ref,
                          g2_ref, b2_ref,
                          w1_ref, b1c_ref, wdw_ref, bdw_ref, w2_ref, b2c_ref,
                          out_ref,
                          pad_ref,
                          *, heads, dim_head, nb_features, feat_pad, kernel_size):
    x = phone_ref[0]                       # (N, D)
    N, D = x.shape
    inner = heads * dim_head
    mp = feat_pad
    ln_eps = 1e-5

    # ---------------- attention branch: pre-LayerNorm ----------------
    mu = jnp.mean(x, axis=-1, keepdims=True)
    xc = x - mu
    var = jnp.mean(xc * xc, axis=-1, keepdims=True)
    xn = xc * jax.lax.rsqrt(var + ln_eps) * g1_ref[0] + b1_ref[0]

    # fused QKV projection: one wide MXU matmul instead of three narrow ones
    qkv = jnp.dot(xn, wqkv_ref[...], preferred_element_type=jnp.float32) + bqkv_ref[0]
    q = qkv[:, :inner]
    k = qkv[:, inner:2 * inner]
    v = qkv[:, 2 * inner:]

    # Performer feature projection for ALL heads at once.
    # projt_ref is block-diagonal (inner, heads*mp) with data_normalizer folded in;
    # fbias is 0.0 on real feature columns and -1e30 on padded columns so that the
    # padded features vanish exactly after the exp / downstream matmuls.
    qd = jnp.dot(q, projt_ref[...], preferred_element_type=jnp.float32) + fbias_ref[0]
    kd = jnp.dot(k, projt_ref[...], preferred_element_type=jnp.float32) + fbias_ref[0]

    ratio = float(nb_features) ** (-0.5)
    dn2 = float(dim_head) ** (-0.5)        # data_normalizer ** 2
    feps = 1e-4
    q2 = q * q
    k2 = k * k
    ones_n = jnp.ones((N, 1), jnp.float32)
    wo = wo_ref[...]                       # (inner, D)

    attn = jnp.zeros((N, D), jnp.float32) + bo_ref[0]
    for h in range(heads):                 # small static loop: only per-head reductions
        cs = h * dim_head
        fs = h * mp
        q_diag = jnp.sum(q2[:, cs:cs + dim_head], axis=-1, keepdims=True) * (0.5 * dn2)
        k_diag = jnp.sum(k2[:, cs:cs + dim_head], axis=-1, keepdims=True) * (0.5 * dn2)
        qd_h = qd[:, fs:fs + mp]
        kd_h = kd[:, fs:fs + mp]

        q_max = jnp.max(qd_h, axis=-1, keepdims=True)
        q_prime = ratio * (jnp.exp(qd_h - q_diag - q_max) + feps)
        # matches the reference softmax_kernel(is_query=False): eps inside the exp, no max
        k_prime = ratio * jnp.exp(kd_h - k_diag + feps)

        vh = v[:, cs:cs + dim_head]
        # non-causal FAVOR+ linear attention, reductions on the MXU
        k_sum = jax.lax.dot_general(k_prime, ones_n,
                                    dimension_numbers=(((0,), (0,)), ((), ())),
                                    preferred_element_type=jnp.float32)      # (mp, 1)
        denom = jnp.dot(q_prime, k_sum, preferred_element_type=jnp.float32)  # (N, 1)
        d_inv = 1.0 / (denom + 1e-8)
        context = jax.lax.dot_general(k_prime, vh,
                                      dimension_numbers=(((0,), (0,)), ((), ())),
                                      preferred_element_type=jnp.float32)    # (mp, dh)
        out_h = jnp.dot(q_prime, context, preferred_element_type=jnp.float32) * d_inv
        # accumulate through to_out instead of lane-concatenating heads
        attn = attn + jnp.dot(out_h, wo[cs:cs + dim_head, :],
                              preferred_element_type=jnp.float32)

    x1 = x + attn                          # residual 1 (dropout = identity in eval)

    # ---------------- conformer conv module ----------------
    mu2 = jnp.mean(x1, axis=-1, keepdims=True)
    xc2 = x1 - mu2
    var2 = jnp.mean(xc2 * xc2, axis=-1, keepdims=True)
    x1n = xc2 * jax.lax.rsqrt(var2 + ln_eps) * g2_ref[0] + b2_ref[0]

    conv_inner = 2 * D
    h1 = jnp.dot(x1n, w1_ref[...], preferred_element_type=jnp.float32) + b1c_ref[0]  # (N, 4D)
    g = h1[:, :conv_inner] * jax.nn.sigmoid(h1[:, conv_inner:])                      # GLU

    # depthwise conv1d, kernel_size taps (odd), 'same' zero padding.
    pad_l = kernel_size // 2
    p0 = ((pad_l + 7) // 8) * 8            # sublane-aligned left pad offset
    off = p0 - pad_l
    # only the small pad regions are re-zeroed each step; g is stored aligned
    pad_ref[:p0, :] = jnp.zeros((p0, conv_inner), jnp.float32)
    pad_ref[p0 + N:, :] = jnp.zeros((p0, conv_inner), jnp.float32)
    pad_ref[p0:p0 + N, :] = g

    wdw = wdw_ref[...]                     # (K, 2D)
    acc = jnp.zeros((N, conv_inner), jnp.float32) + bdw_ref[0]
    for t in range(kernel_size):           # static unroll; zero-only windows skipped
        if abs(t - pad_l) >= N:
            continue
        acc = acc + pad_ref[t + off:t + off + N, :] * wdw[t:t + 1, :]

    s_act = acc * jax.nn.sigmoid(acc)      # Swish
    z = jnp.dot(s_act, w2_ref[...], preferred_element_type=jnp.float32) + b2c_ref[0]

    out_ref[0] = x1 + z                    # residual 2


# ---------------------------------------------------------------------------
# Wrapper: packs the raw module params into kernel-friendly layouts, then calls
# pallas_call with a batch grid.
# ---------------------------------------------------------------------------
def encoder_layer(phone, params, *, heads, dim_head, nb_features, kernel_size=31):
    B, N, D = phone.shape
    inner = heads * dim_head
    conv_inner = 2 * D
    mp = _round_up(nb_features, 128)       # lane-dense Performer feature width
    pad_l = kernel_size // 2
    p0 = _round_up(pad_l, 8)
    pad_rows = 2 * p0 + N

    (g1, b1, wq, bq, wk, bk, wv, bv, projt, wo, bo,
     g2, b2, w1, b1c, wdw, bdw, w2, b2c) = params

    dnorm = float(dim_head) ** (-0.25)

    # fused QKV weights
    wqkv = jnp.concatenate([wq, wk, wv], axis=1)          # (D, 3*inner)
    bqkv = jnp.concatenate([bq, bk, bv], axis=1)          # (1, 3*inner)

    # block-diagonal, feature-padded, dnorm-folded projection + feature bias
    proj_scaled = dnorm * projt                           # (dh, m)
    projt_bd = jnp.zeros((inner, heads * mp), jnp.float32)
    fbias = jnp.full((1, heads * mp), -1e30, jnp.float32)
    for h in range(heads):
        projt_bd = projt_bd.at[h * dim_head:(h + 1) * dim_head,
                               h * mp:h * mp + nb_features].set(proj_scaled)
        fbias = fbias.at[:, h * mp:h * mp + nb_features].set(0.0)

    packed = (g1, b1, wqkv, bqkv, projt_bd, fbias, wo, bo,
              g2, b2, w1, b1c, wdw, bdw, w2, b2c)

    kernel = functools.partial(_encoder_layer_kernel,
                               heads=heads, dim_head=dim_head,
                               nb_features=nb_features, feat_pad=mp,
                               kernel_size=kernel_size)

    def full(shape):
        return pl.BlockSpec(shape, lambda b: (0,) * len(shape))

    in_specs = ([pl.BlockSpec((1, N, D), lambda b: (b, 0, 0))]
                + [full(p.shape) for p in packed])
    out_spec = pl.BlockSpec((1, N, D), lambda b: (b, 0, 0))

    return pl.pallas_call(
        kernel,
        out_shape=jax.ShapeDtypeStruct((B, N, D), jnp.float32),
        grid_spec=pltpu.PrefetchScalarGridSpec(
            num_scalar_prefetch=0,
            grid=(B,),
            in_specs=in_specs,
            out_specs=out_spec,
            scratch_shapes=[pltpu.VMEM((pad_rows, conv_inner), jnp.float32)],
        ),
        compiler_params=pltpu.CompilerParams(
            dimension_semantics=("parallel",),          # batch steps are independent
            vmem_limit_bytes=32 * 1024 * 1024,
        ),
    )(phone, *packed)


# ---------------------------------------------------------------------------
# Deterministic parameter construction (synthetic; mirrors torch module shapes)
# ---------------------------------------------------------------------------
def gaussian_orthogonal_random_matrix(key, nb_rows, nb_cols):
    n_full = nb_rows // nb_cols
    keys = jax.random.split(key, n_full + 2)
    blocks = []
    for i in range(n_full):
        unstructured = jax.random.normal(keys[i], (nb_cols, nb_cols), jnp.float32)
        qmat, _ = jnp.linalg.qr(unstructured)
        blocks.append(qmat.T)
    rem = nb_rows - n_full * nb_cols
    if rem > 0:
        unstructured = jax.random.normal(keys[n_full], (nb_cols, nb_cols), jnp.float32)
        qmat, _ = jnp.linalg.qr(unstructured)
        blocks.append(qmat.T[:rem])
    final = jnp.concatenate(blocks, axis=0)                       # (nb_rows, nb_cols)
    multiplier = jnp.linalg.norm(
        jax.random.normal(keys[n_full + 1], (nb_rows, nb_cols), jnp.float32), axis=1)
    return multiplier[:, None] * final


def init_params(key, dim, heads, dim_head, nb_features, kernel_size):
    inner = heads * dim_head
    conv_inner = 2 * dim
    keys = jax.random.split(key, 8)

    def linear(k, fan_in, fan_out):
        bound = 1.0 / math.sqrt(fan_in)
        kw, kb = jax.random.split(k)
        w = jax.random.uniform(kw, (fan_in, fan_out), jnp.float32, -bound, bound)
        b = jax.random.uniform(kb, (1, fan_out), jnp.float32, -bound, bound)
        return w, b

    # attention pre-norm
    g1 = jnp.ones((1, dim), jnp.float32)
    b1 = jnp.zeros((1, dim), jnp.float32)
    wq, bq = linear(keys[0], dim, inner)
    wk, bk = linear(keys[1], dim, inner)
    wv, bv = linear(keys[2], dim, inner)
    wo, bo = linear(keys[3], inner, dim)
    projt = gaussian_orthogonal_random_matrix(keys[4], nb_features, dim_head).T  # (dh, m)

    # conformer conv module
    g2 = jnp.ones((1, dim), jnp.float32)
    b2 = jnp.zeros((1, dim), jnp.float32)
    w1, b1c = linear(keys[5], dim, 2 * conv_inner)            # 1x1 conv: dim -> 4*dim
    bound = 1.0 / math.sqrt(kernel_size)                      # depthwise: in/groups=1, k taps
    kdw_w, kdw_b = jax.random.split(keys[6])
    wdw = jax.random.uniform(kdw_w, (kernel_size, conv_inner), jnp.float32, -bound, bound)
    bdw = jax.random.uniform(kdw_b, (1, conv_inner), jnp.float32, -bound, bound)
    w2, b2c = linear(keys[7], conv_inner, dim)                # 1x1 conv: 2*dim -> dim

    return (g1, b1, wq, bq, wk, bk, wv, bv, projt, wo, bo,
            g2, b2, w1, b1c, wdw, bdw, w2, b2c)


# ---------------------------------------------------------------------------
if __name__ == "__main__":
    key = jax.random.PRNGKey(0)
    B, N = 2, 8
    dim_model, heads = 32, 2
    dim_head = 64                                        # SelfAttention default dim_head=64
    nb_features = int(dim_head * math.log(dim_head))     # FastAttention default (=266)
    kernel_size = 31                                     # ConformerConvModule default

    k_in, k_par = jax.random.split(key)
    phone = jax.random.normal(k_in, (B, N, dim_model), jnp.float32)
    params = init_params(k_par, dim_model, heads, dim_head, nb_features, kernel_size)

    out = encoder_layer(phone, params, heads=heads, dim_head=dim_head,
                        nb_features=nb_features, kernel_size=kernel_size)
    jax.block_until_ready(out)
    assert out.shape == (B, N, dim_model)
    print("KERNEL_OK")
</pallas_src>

<mosaic_0001>
module attributes {stable_mosaic.version = 11 : i64} {
  func.func @_encoder_layer_kernel(%arg0: i32, %arg1: memref<1x8x32xf32, #tpu.memory_space<vmem>>, %arg2: memref<1x32xf32, #tpu.memory_space<vmem>>, %arg3: memref<1x32xf32, #tpu.memory_space<vmem>>, %arg4: memref<32x384xf32, #tpu.memory_space<vmem>>, %arg5: memref<1x384xf32, #tpu.memory_space<vmem>>, %arg6: memref<128x768xf32, #tpu.memory_space<vmem>>, %arg7: memref<1x768xf32, #tpu.memory_space<vmem>>, %arg8: memref<128x32xf32, #tpu.memory_space<vmem>>, %arg9: memref<1x32xf32, #tpu.memory_space<vmem>>, %arg10: memref<1x32xf32, #tpu.memory_space<vmem>>, %arg11: memref<1x32xf32, #tpu.memory_space<vmem>>, %arg12: memref<32x128xf32, #tpu.memory_space<vmem>>, %arg13: memref<1x128xf32, #tpu.memory_space<vmem>>, %arg14: memref<31x64xf32, #tpu.memory_space<vmem>>, %arg15: memref<1x64xf32, #tpu.memory_space<vmem>>, %arg16: memref<64x32xf32, #tpu.memory_space<vmem>>, %arg17: memref<1x32xf32, #tpu.memory_space<vmem>>, %arg18: memref<1x8x32xf32, #tpu.memory_space<vmem>>, %arg19: memref<40x64xf32, #tpu.memory_space<vmem>>) attributes {dimension_semantics = [#tpu.dimension_semantics<parallel>], iteration_bounds = array<i64: 2>, scalar_prefetch = 0 : i64, scratch_operands = 1 : i64, tpu.core_type = #tpu.core_type<tc>, window_params = [{transform_indices = @transform_0, window_bounds = array<i64: 1, 8, 32>}, {pipeline_mode = #tpu.pipeline_mode<synchronous>, transform_indices = @transform_1, window_bounds = array<i64: 1, 32>}, {pipeline_mode = #tpu.pipeline_mode<synchronous>, transform_indices = @transform_2, window_bounds = array<i64: 1, 32>}, {pipeline_mode = #tpu.pipeline_mode<synchronous>, transform_indices = @transform_3, window_bounds = array<i64: 32, 384>}, {pipeline_mode = #tpu.pipeline_mode<synchronous>, transform_indices = @transform_4, window_bounds = array<i64: 1, 384>}, {pipeline_mode = #tpu.pipeline_mode<synchronous>, transform_indices = @transform_5, window_bounds = array<i64: 128, 768>}, {pipeline_mode = #tpu.pipeline_mode<synchronous>, transform_indices = @transform_6, window_bounds = array<i64: 1, 768>}, {pipeline_mode = #tpu.pipeline_mode<synchronous>, transform_indices = @transform_7, window_bounds = array<i64: 128, 32>}, {pipeline_mode = #tpu.pipeline_mode<synchronous>, transform_indices = @transform_8, window_bounds = array<i64: 1, 32>}, {pipeline_mode = #tpu.pipeline_mode<synchronous>, transform_indices = @transform_9, window_bounds = array<i64: 1, 32>}, {pipeline_mode = #tpu.pipeline_mode<synchronous>, transform_indices = @transform_10, window_bounds = array<i64: 1, 32>}, {pipeline_mode = #tpu.pipeline_mode<synchronous>, transform_indices = @transform_11, window_bounds = array<i64: 32, 128>}, {pipeline_mode = #tpu.pipeline_mode<synchronous>, transform_indices = @transform_12, window_bounds = array<i64: 1, 128>}, {pipeline_mode = #tpu.pipeline_mode<synchronous>, transform_indices = @transform_13, window_bounds = array<i64: 31, 64>}, {pipeline_mode = #tpu.pipeline_mode<synchronous>, transform_indices = @transform_14, window_bounds = array<i64: 1, 64>}, {pipeline_mode = #tpu.pipeline_mode<synchronous>, transform_indices = @transform_15, window_bounds = array<i64: 64, 32>}, {pipeline_mode = #tpu.pipeline_mode<synchronous>, transform_indices = @transform_16, window_bounds = array<i64: 1, 32>}, {transform_indices = @transform_17, window_bounds = array<i64: 1, 8, 32>}]} {
    %c0 = arith.constant 0 : index
    %c0_0 = arith.constant 0 : index
    %c0_1 = arith.constant 0 : index
    %0 = vector.load %arg1[%c0, %c0_0, %c0_1] : memref<1x8x32xf32, #tpu.memory_space<vmem>>, vector<1x8x32xf32>
    %1 = vector.shape_cast %0 : vector<1x8x32xf32> to vector<8x32xf32>
    %cst = arith.constant dense<0.000000e+00> : vector<8xf32>
    %2 = vector.multi_reduction <add>, %1, %cst [1] : vector<8x32xf32> to vector<8xf32>
    %3 = vector.shape_cast %2 : vector<8xf32> to vector<8x1xf32>
    %cst_2 = arith.constant 3.200000e+01 : f32
    %4 = vector.broadcast %cst_2 : f32 to vector<8x1xf32>
    %5 = arith.divf %3, %4 : vector<8x1xf32>
    %6 = vector.broadcast %5 : vector<8x1xf32> to vector<8x32xf32>
    %7 = arith.subf %1, %6 : vector<8x32xf32>
    %8 = arith.mulf %7, %7 : vector<8x32xf32>
    %cst_3 = arith.constant dense<0.000000e+00> : vector<8xf32>
    %9 = vector.multi_reduction <add>, %8, %cst_3 [1] : vector<8x32xf32> to vector<8xf32>
    %10 = vector.shape_cast %9 : vector<8xf32> to vector<8x1xf32>
    %cst_4 = arith.constant 3.200000e+01 : f32
    %11 = vector.broadcast %cst_4 : f32 to vector<8x1xf32>
    %12 = arith.divf %10, %11 : vector<8x1xf32>
    %cst_5 = arith.constant 9.99999974E-6 : f32
    %13 = vector.broadcast %cst_5 : f32 to vector<8x1xf32>
    %14 = arith.addf %12, %13 : vector<8x1xf32>
    %15 = math.rsqrt %14 : vector<8x1xf32>
    %16 = vector.broadcast %15 : vector<8x1xf32> to vector<8x32xf32>
    %17 = arith.mulf %7, %16 : vector<8x32xf32>
    %c0_6 = arith.constant 0 : index
    %c0_7 = arith.constant 0 : index
    %18 = vector.load %arg2[%c0_6, %c0_7] : memref<1x32xf32, #tpu.memory_space<vmem>>, vector<1x32xf32>
    %19 = vector.shape_cast %18 : vector<1x32xf32> to vector<32xf32>
    %20 = vector.shape_cast %19 : vector<32xf32> to vector<1x32xf32>
    %21 = vector.broadcast %20 : vector<1x32xf32> to vector<8x32xf32>
    %22 = arith.mulf %17, %21 : vector<8x32xf32>
    %c0_8 = arith.constant 0 : index
    %c0_9 = arith.constant 0 : index
    %23 = vector.load %arg3[%c0_8, %c0_9] : memref<1x32xf32, #tpu.memory_space<vmem>>, vector<1x32xf32>
    %24 = vector.shape_cast %23 : vector<1x32xf32> to vector<32xf32>
    %25 = vector.shape_cast %24 : vector<32xf32> to vector<1x32xf32>
    %26 = vector.broadcast %25 : vector<1x32xf32> to vector<8x32xf32>
    %27 = arith.addf %22, %26 : vector<8x32xf32>
    %c0_10 = arith.constant 0 : index
    %c0_11 = arith.constant 0 : index
    %28 = vector.load %arg4[%c0_10, %c0_11] : memref<32x384xf32, #tpu.memory_space<vmem>>, vector<32x384xf32>
    %cst_12 = arith.constant dense<0.000000e+00> : vector<8x384xf32>
    %29 = tpu.matmul %27, %28, %cst_12 {dimension_numbers = #tpu.dot_dimension_numbers<[1], [0], [0], [1], [0, 0, 1, 1], [], []>} : vector<8x32xf32>, vector<32x384xf32>, vector<8x384xf32> -> vector<8x384xf32>
    %c0_13 = arith.constant 0 : index
    %c0_14 = arith.constant 0 : index
    %30 = vector.load %arg5[%c0_13, %c0_14] : memref<1x384xf32, #tpu.memory_space<vmem>>, vector<1x384xf32>
    %31 = vector.shape_cast %30 : vector<1x384xf32> to vector<384xf32>
    %32 = vector.shape_cast %31 : vector<384xf32> to vector<1x384xf32>
    %33 = vector.broadcast %32 : vector<1x384xf32> to vector<8x384xf32>
    %34 = arith.addf %29, %33 : vector<8x384xf32>
    %35 = vector.extract_strided_slice %34 {offsets = [0, 0], sizes = [8, 128], strides = [1, 1]} : vector<8x384xf32> to vector<8x128xf32>
    %36 = vector.extract_strided_slice %34 {offsets = [0, 128], sizes = [8, 128], strides = [1, 1]} : vector<8x384xf32> to vector<8x128xf32>
    %37 = vector.extract_strided_slice %34 {offsets = [0, 256], sizes = [8, 128], strides = [1, 1]} : vector<8x384xf32> to vector<8x128xf32>
    %c0_15 = arith.constant 0 : index
    %c0_16 = arith.constant 0 : index
    %38 = vector.load %arg6[%c0_15, %c0_16] : memref<128x768xf32, #tpu.memory_space<vmem>>, vector<128x768xf32>
    %cst_17 = arith.constant dense<0.000000e+00> : vector<8x768xf32>
    %39 = tpu.matmul %35, %38, %cst_17 {dimension_numbers = #tpu.dot_dimension_numbers<[1], [0], [0], [1], [0, 0, 1, 1], [], []>} : vector<8x128xf32>, vector<128x768xf32>, vector<8x768xf32> -> vector<8x768xf32>
    %c0_18 = arith.constant 0 : index
    %c0_19 = arith.constant 0 : index
    %40 = vector.load %arg7[%c0_18, %c0_19] : memref<1x768xf32, #tpu.memory_space<vmem>>, vector<1x768xf32>
    %41 = vector.shape_cast %40 : vector<1x768xf32> to vector<768xf32>
    %42 = vector.shape_cast %41 : vector<768xf32> to vector<1x768xf32>
    %43 = vector.broadcast %42 : vector<1x768xf32> to vector<8x768xf32>
    %44 = arith.addf %39, %43 : vector<8x768xf32>
    %c0_20 = arith.constant 0 : index
    %c0_21 = arith.constant 0 : index
    %45 = vector.load %arg6[%c0_20, %c0_21] : memref<128x768xf32, #tpu.memory_space<vmem>>, vector<128x768xf32>
    %cst_22 = arith.constant dense<0.000000e+00> : vector<8x768xf32>
    %46 = tpu.matmul %36, %45, %cst_22 {dimension_numbers = #tpu.dot_dimension_numbers<[1], [0], [0], [1], [0, 0, 1, 1], [], []>} : vector<8x128xf32>, vector<128x768xf32>, vector<8x768xf32> -> vector<8x768xf32>
    %c0_23 = arith.constant 0 : index
    %c0_24 = arith.constant 0 : index
    %47 = vector.load %arg7[%c0_23, %c0_24] : memref<1x768xf32, #tpu.memory_space<vmem>>, vector<1x768xf32>
    %48 = vector.shape_cast %47 : vector<1x768xf32> to vector<768xf32>
    %49 = vector.shape_cast %48 : vector<768xf32> to vector<1x768xf32>
    %50 = vector.broadcast %49 : vector<1x768xf32> to vector<8x768xf32>
    %51 = arith.addf %46, %50 : vector<8x768xf32>
    %52 = arith.mulf %35, %35 : vector<8x128xf32>
    %53 = arith.mulf %36, %36 : vector<8x128xf32>
    %cst_25 = arith.constant 1.000000e+00 : f32
    %54 = vector.broadcast %cst_25 : f32 to vector<8x1xf32>
    %c0_26 = arith.constant 0 : index
    %c0_27 = arith.constant 0 : index
    %55 = vector.load %arg8[%c0_26, %c0_27] : memref<128x32xf32, #tpu.memory_space<vmem>>, vector<128x32xf32>
    %cst_28 = arith.constant 0.000000e+00 : f32
    %56 = vector.broadcast %cst_28 : f32 to vector<8x32xf32>
    %c0_29 = arith.constant 0 : index
    %c0_30 = arith.constant 0 : index
    %57 = vector.load %arg9[%c0_29, %c0_30] : memref<1x32xf32, #tpu.memory_space<vmem>>, vector<1x32xf32>
    %58 = vector.shape_cast %57 : vector<1x32xf32> to vector<32xf32>
    %59 = vector.shape_cast %58 : vector<32xf32> to vector<1x32xf32>
    %60 = vector.broadcast %59 : vector<1x32xf32> to vector<8x32xf32>
    %61 = arith.addf %56, %60 : vector<8x32xf32>
    %62 = vector.extract_strided_slice %52 {offsets = [0, 0], sizes = [8, 64], strides = [1, 1]} : vector<8x128xf32> to vector<8x64xf32>
    %cst_31 = arith.constant dense<0.000000e+00> : vector<8xf32>
    %63 = vector.multi_reduction <add>, %62, %cst_31 [1] : vector<8x64xf32> to vector<8xf32>
    %64 = vector.shape_cast %63 : vector<8xf32> to vector<8x1xf32>
    %cst_32 = arith.constant 6.250000e-02 : f32
    %65 = vector.broadcast %cst_32 : f32 to vector<8x1xf32>
    %66 = arith.mulf %64, %65 : vector<8x1xf32>
    %67 = vector.extract_strided_slice %53 {offsets = [0, 0], sizes = [8, 64], strides = [1, 1]} : vector<8x128xf32> to vector<8x64xf32>
    %cst_33 = arith.constant dense<0.000000e+00> : vector<8xf32>
    %68 = vector.multi_reduction <add>, %67, %cst_33 [1] : vector<8x64xf32> to vector<8xf32>
    %69 = vector.shape_cast %68 : vector<8xf32> to vector<8x1xf32>
    %cst_34 = arith.constant 6.250000e-02 : f32
    %70 = vector.broadcast %cst_34 : f32 to vector<8x1xf32>
    %71 = arith.mulf %69, %70 : vector<8x1xf32>
    %72 = vector.extract_strided_slice %44 {offsets = [0, 0], sizes = [8, 384], strides = [1, 1]} : vector<8x768xf32> to vector<8x384xf32>
    %73 = vector.extract_strided_slice %51 {offsets = [0, 0], sizes = [8, 384], strides = [1, 1]} : vector<8x768xf32> to vector<8x384xf32>
    %cst_35 = arith.constant dense<0xFF800000> : vector<8xf32>
    %74 = vector.multi_reduction <maximumf>, %72, %cst_35 [1] : vector<8x384xf32> to vector<8xf32>
    %75 = vector.shape_cast %74 : vector<8xf32> to vector<8x1xf32>
    %76 = vector.broadcast %66 : vector<8x1xf32> to vector<8x384xf32>
    %77 = arith.subf %72, %76 : vector<8x384xf32>
    %78 = vector.broadcast %75 : vector<8x1xf32> to vector<8x384xf32>
    %79 = arith.subf %77, %78 : vector<8x384xf32>
    %80 = math.exp %79 : vector<8x384xf32>
    %cst_36 = arith.constant 9.99999974E-5 : f32
    %81 = vector.broadcast %cst_36 : f32 to vector<8x384xf32>
    %82 = arith.addf %80, %81 : vector<8x384xf32>
    %cst_37 = arith.constant 0.0613139346 : f32
    %83 = vector.broadcast %cst_37 : f32 to vector<8x384xf32>
    %84 = arith.mulf %83, %82 : vector<8x384xf32>
    %85 = vector.broadcast %71 : vector<8x1xf32> to vector<8x384xf32>
    %86 = arith.subf %73, %85 : vector<8x384xf32>
    %cst_38 = arith.constant 9.99999974E-5 : f32
    %87 = vector.broadcast %cst_38 : f32 to vector<8x384xf32>
    %88 = arith.addf %86, %87 : vector<8x384xf32>
    %89 = math.exp %88 : vector<8x384xf32>
    %cst_39 = arith.constant 0.0613139346 : f32
    %90 = vector.broadcast %cst_39 : f32 to vector<8x384xf32>
    %91 = arith.mulf %90, %89 : vector<8x384xf32>
    %92 = vector.extract_strided_slice %37 {offsets = [0, 0], sizes = [8, 64], strides = [1, 1]} : vector<8x128xf32> to vector<8x64xf32>
    %cst_40 = arith.constant dense<0.000000e+00> : vector<384x1xf32>
    %93 = tpu.matmul %91, %54, %cst_40 {dimension_numbers = #tpu.dot_dimension_numbers<[0], [0], [1], [1], [0, 1, 1, 1], [], []>} : vector<8x384xf32>, vector<8x1xf32>, vector<384x1xf32> -> vector<384x1xf32>
    %cst_41 = arith.constant dense<0.000000e+00> : vector<8x1xf32>
    %94 = tpu.matmul %84, %93, %cst_41 {dimension_numbers = #tpu.dot_dimension_numbers<[1], [0], [0], [1], [0, 0, 1, 1], [], []>} : vector<8x384xf32>, vector<384x1xf32>, vector<8x1xf32> -> vector<8x1xf32>
    %cst_42 = arith.constant 9.99999993E-9 : f32
    %95 = vector.broadcast %cst_42 : f32 to vector<8x1xf32>
    %96 = arith.addf %94, %95 : vector<8x1xf32>
    %cst_43 = arith.constant 1.000000e+00 : f32
    %97 = vector.broadcast %cst_43 : f32 to vector<8x1xf32>
    %98 = arith.divf %97, %96 : vector<8x1xf32>
    %cst_44 = arith.constant dense<0.000000e+00> : vector<384x64xf32>
    %99 = tpu.matmul %91, %92, %cst_44 {dimension_numbers = #tpu.dot_dimension_numbers<[0], [0], [1], [1], [0, 1, 1, 1], [], []>} : vector<8x384xf32>, vector<8x64xf32>, vector<384x64xf32> -> vector<384x64xf32>
    %cst_45 = arith.constant dense<0.000000e+00> : vector<8x64xf32>
    %100 = tpu.matmul %84, %99, %cst_45 {dimension_numbers = #tpu.dot_dimension_numbers<[1], [0], [0], [1], [0, 0, 1, 1], [], []>} : vector<8x384xf32>, vector<384x64xf32>, vector<8x64xf32> -> vector<8x64xf32>
    %101 = vector.broadcast %98 : vector<8x1xf32> to vector<8x64xf32>
    %102 = arith.mulf %100, %101 : vector<8x64xf32>
    %103 = vector.extract_strided_slice %55 {offsets = [0, 0], sizes = [64, 32], strides = [1, 1]} : vector<128x32xf32> to vector<64x32xf32>
    %cst_46 = arith.constant dense<0.000000e+00> : vector<8x32xf32>
    %104 = tpu.matmul %102, %103, %cst_46 {dimension_numbers = #tpu.dot_dimension_numbers<[1], [0], [0], [1], [0, 0, 1, 1], [], []>} : vector<8x64xf32>, vector<64x32xf32>, vector<8x32xf32> -> vector<8x32xf32>
    %105 = arith.addf %61, %104 : vector<8x32xf32>
    %106 = vector.extract_strided_slice %52 {offsets = [0, 64], sizes = [8, 64], strides = [1, 1]} : vector<8x128xf32> to vector<8x64xf32>
    %cst_47 = arith.constant dense<0.000000e+00> : vector<8xf32>
    %107 = vector.multi_reduction <add>, %106, %cst_47 [1] : vector<8x64xf32> to vector<8xf32>
    %108 = vector.shape_cast %107 : vector<8xf32> to vector<8x1xf32>
    %cst_48 = arith.constant 6.250000e-02 : f32
    %109 = vector.broadcast %cst_48 : f32 to vector<8x1xf32>
    %110 = arith.mulf %108, %109 : vector<8x1xf32>
    %111 = vector.extract_strided_slice %53 {offsets = [0, 64], sizes = [8, 64], strides = [1, 1]} : vector<8x128xf32> to vector<8x64xf32>
    %cst_49 = arith.constant dense<0.000000e+00> : vector<8xf32>
    %112 = vector.multi_reduction <add>, %111, %cst_49 [1] : vector<8x64xf32> to vector<8xf32>
    %113 = vector.shape_cast %112 : vector<8xf32> to vector<8x1xf32>
    %cst_50 = arith.constant 6.250000e-02 : f32
    %114 = vector.broadcast %cst_50 : f32 to vector<8x1xf32>
    %115 = arith.mulf %113, %114 : vector<8x1xf32>
    %116 = vector.extract_strided_slice %44 {offsets = [0, 384], sizes = [8, 384], strides = [1, 1]} : vector<8x768xf32> to vector<8x384xf32>
    %117 = vector.extract_strided_slice %51 {offsets = [0, 384], sizes = [8, 384], strides = [1, 1]} : vector<8x768xf32> to vector<8x384xf32>
    %cst_51 = arith.constant dense<0xFF800000> : vector<8xf32>
    %118 = vector.multi_reduction <maximumf>, %116, %cst_51 [1] : vector<8x384xf32> to vector<8xf32>
    %119 = vector.shape_cast %118 : vector<8xf32> to vector<8x1xf32>
    %120 = vector.broadcast %110 : vector<8x1xf32> to vector<8x384xf32>
    %121 = arith.subf %116, %120 : vector<8x384xf32>
    %122 = vector.broadcast %119 : vector<8x1xf32> to vector<8x384xf32>
    %123 = arith.subf %121, %122 : vector<8x384xf32>
    %124 = math.exp %123 : vector<8x384xf32>
    %cst_52 = arith.constant 9.99999974E-5 : f32
    %125 = vector.broadcast %cst_52 : f32 to vector<8x384xf32>
    %126 = arith.addf %124, %125 : vector<8x384xf32>
    %cst_53 = arith.constant 0.0613139346 : f32
    %127 = vector.broadcast %cst_53 : f32 to vector<8x384xf32>
    %128 = arith.mulf %127, %126 : vector<8x384xf32>
    %129 = vector.broadcast %115 : vector<8x1xf32> to vector<8x384xf32>
    %130 = arith.subf %117, %129 : vector<8x384xf32>
    %cst_54 = arith.constant 9.99999974E-5 : f32
    %131 = vector.broadcast %cst_54 : f32 to vector<8x384xf32>
    %132 = arith.addf %130, %131 : vector<8x384xf32>
    %133 = math.exp %132 : vector<8x384xf32>
    %cst_55 = arith.constant 0.0613139346 : f32
    %134 = vector.broadcast %cst_55 : f32 to vector<8x384xf32>
    %135 = arith.mulf %134, %133 : vector<8x384xf32>
    %136 = vector.extract_strided_slice %37 {offsets = [0, 64], sizes = [8, 64], strides = [1, 1]} : vector<8x128xf32> to vector<8x64xf32>
    %cst_56 = arith.constant dense<0.000000e+00> : vector<384x1xf32>
    %137 = tpu.matmul %135, %54, %cst_56 {dimension_numbers = #tpu.dot_dimension_numbers<[0], [0], [1], [1], [0, 1, 1, 1], [], []>} : vector<8x384xf32>, vector<8x1xf32>, vector<384x1xf32> -> vector<384x1xf32>
    %cst_57 = arith.constant dense<0.000000e+00> : vector<8x1xf32>
    %138 = tpu.matmul %128, %137, %cst_57 {dimension_numbers = #tpu.dot_dimension_numbers<[1], [0], [0], [1], [0, 0, 1, 1], [], []>} : vector<8x384xf32>, vector<384x1xf32>, vector<8x1xf32> -> vector<8x1xf32>
    %cst_58 = arith.constant 9.99999993E-9 : f32
    %139 = vector.broadcast %cst_58 : f32 to vector<8x1xf32>
    %140 = arith.addf %138, %139 : vector<8x1xf32>
    %cst_59 = arith.constant 1.000000e+00 : f32
    %141 = vector.broadcast %cst_59 : f32 to vector<8x1xf32>
    %142 = arith.divf %141, %140 : vector<8x1xf32>
    %cst_60 = arith.constant dense<0.000000e+00> : vector<384x64xf32>
    %143 = tpu.matmul %135, %136, %cst_60 {dimension_numbers = #tpu.dot_dimension_numbers<[0], [0], [1], [1], [0, 1, 1, 1], [], []>} : vector<8x384xf32>, vector<8x64xf32>, vector<384x64xf32> -> vector<384x64xf32>
    %cst_61 = arith.constant dense<0.000000e+00> : vector<8x64xf32>
    %144 = tpu.matmul %128, %143, %cst_61 {dimension_numbers = #tpu.dot_dimension_numbers<[1], [0], [0], [1], [0, 0, 1, 1], [], []>} : vector<8x384xf32>, vector<384x64xf32>, vector<8x64xf32> -> vector<8x64xf32>
    %145 = vector.broadcast %142 : vector<8x1xf32> to vector<8x64xf32>
    %146 = arith.mulf %144, %145 : vector<8x64xf32>
    %147 = vector.extract_strided_slice %55 {offsets = [64, 0], sizes = [64, 32], strides = [1, 1]} : vector<128x32xf32> to vector<64x32xf32>
    %cst_62 = arith.constant dense<0.000000e+00> : vector<8x32xf32>
    %148 = tpu.matmul %146, %147, %cst_62 {dimension_numbers = #tpu.dot_dimension_numbers<[1], [0], [0], [1], [0, 0, 1, 1], [], []>} : vector<8x64xf32>, vector<64x32xf32>, vector<8x32xf32> -> vector<8x32xf32>
    %149 = arith.addf %105, %148 : vector<8x32xf32>
    %150 = arith.addf %1, %149 : vector<8x32xf32>
    %cst_63 = arith.constant dense<0.000000e+00> : vector<8xf32>
    %151 = vector.multi_reduction <add>, %150, %cst_63 [1] : vector<8x32xf32> to vector<8xf32>
    %152 = vector.shape_cast %151 : vector<8xf32> to vector<8x1xf32>
    %cst_64 = arith.constant 3.200000e+01 : f32
    %153 = vector.broadcast %cst_64 : f32 to vector<8x1xf32>
    %154 = arith.divf %152, %153 : vector<8x1xf32>
    %155 = vector.broadcast %154 : vector<8x1xf32> to vector<8x32xf32>
    %156 = arith.subf %150, %155 : vector<8x32xf32>
    %157 = arith.mulf %156, %156 : vector<8x32xf32>
    %cst_65 = arith.constant dense<0.000000e+00> : vector<8xf32>
    %158 = vector.multi_reduction <add>, %157, %cst_65 [1] : vector<8x32xf32> to vector<8xf32>
    %159 = vector.shape_cast %158 : vector<8xf32> to vector<8x1xf32>
    %cst_66 = arith.constant 3.200000e+01 : f32
    %160 = vector.broadcast %cst_66 : f32 to vector<8x1xf32>
    %161 = arith.divf %159, %160 : vector<8x1xf32>
    %cst_67 = arith.constant 9.99999974E-6 : f32
    %162 = vector.broadcast %cst_67 : f32 to vector<8x1xf32>
    %163 = arith.addf %161, %162 : vector<8x1xf32>
    %164 = math.rsqrt %163 : vector<8x1xf32>
    %165 = vector.broadcast %164 : vector<8x1xf32> to vector<8x32xf32>
    %166 = arith.mulf %156, %165 : vector<8x32xf32>
    %c0_68 = arith.constant 0 : index
    %c0_69 = arith.constant 0 : index
    %167 = vector.load %arg10[%c0_68, %c0_69] : memref<1x32xf32, #tpu.memory_space<vmem>>, vector<1x32xf32>
    %168 = vector.shape_cast %167 : vector<1x32xf32> to vector<32xf32>
    %169 = vector.shape_cast %168 : vector<32xf32> to vector<1x32xf32>
    %170 = vector.broadcast %169 : vector<1x32xf32> to vector<8x32xf32>
    %171 = arith.mulf %166, %170 : vector<8x32xf32>
    %c0_70 = arith.constant 0 : index
    %c0_71 = arith.constant 0 : index
    %172 = vector.load %arg11[%c0_70, %c0_71] : memref<1x32xf32, #tpu.memory_space<vmem>>, vector<1x32xf32>
    %173 = vector.shape_cast %172 : vector<1x32xf32> to vector<32xf32>
    %174 = vector.shape_cast %173 : vector<32xf32> to vector<1x32xf32>
    %175 = vector.broadcast %174 : vector<1x32xf32> to vector<8x32xf32>
    %176 = arith.addf %171, %175 : vector<8x32xf32>
    %c0_72 = arith.constant 0 : index
    %c0_73 = arith.constant 0 : index
    %177 = vector.load %arg12[%c0_72, %c0_73] : memref<32x128xf32, #tpu.memory_space<vmem>>, vector<32x128xf32>
    %cst_74 = arith.constant dense<0.000000e+00> : vector<8x128xf32>
    %178 = tpu.matmul %176, %177, %cst_74 {dimension_numbers = #tpu.dot_dimension_numbers<[1], [0], [0], [1], [0, 0, 1, 1], [], []>} : vector<8x32xf32>, vector<32x128xf32>, vector<8x128xf32> -> vector<8x128xf32>
    %c0_75 = arith.constant 0 : index
    %c0_76 = arith.constant 0 : index
    %179 = vector.load %arg13[%c0_75, %c0_76] : memref<1x128xf32, #tpu.memory_space<vmem>>, vector<1x128xf32>
    %180 = vector.shape_cast %179 : vector<1x128xf32> to vector<128xf32>
    %181 = vector.shape_cast %180 : vector<128xf32> to vector<1x128xf32>
    %182 = vector.broadcast %181 : vector<1x128xf32> to vector<8x128xf32>
    %183 = arith.addf %178, %182 : vector<8x128xf32>
    %184 = vector.extract_strided_slice %183 {offsets = [0, 0], sizes = [8, 64], strides = [1, 1]} : vector<8x128xf32> to vector<8x64xf32>
    %185 = vector.extract_strided_slice %183 {offsets = [0, 64], sizes = [8, 64], strides = [1, 1]} : vector<8x128xf32> to vector<8x64xf32>
    %186 = arith.negf %185 : vector<8x64xf32>
    %187 = math.exp %186 : vector<8x64xf32>
    %cst_77 = arith.constant 1.000000e+00 : f32
    %188 = vector.broadcast %cst_77 : f32 to vector<8x64xf32>
    %189 = arith.addf %188, %187 : vector<8x64xf32>
    %190 = arith.divf %188, %189 : vector<8x64xf32>
    %191 = arith.mulf %184, %190 : vector<8x64xf32>
    %cst_78 = arith.constant 0.000000e+00 : f32
    %192 = vector.broadcast %cst_78 : f32 to vector<16x64xf32>
    %c0_79 = arith.constant 0 : index
    %c0_80 = arith.constant 0 : index
    %193 = vector.load %arg19[%c0_79, %c0_80] : memref<40x64xf32, #tpu.memory_space<vmem>>, vector<16x64xf32>
    tpu.vector_store %arg19[%c0_79, %c0_80], %192 {strides = array<i32>} : memref<40x64xf32, #tpu.memory_space<vmem>>, vector<16x64xf32>,
    %cst_81 = arith.constant 0.000000e+00 : f32
    %194 = vector.broadcast %cst_81 : f32 to vector<16x64xf32>
    %c24 = arith.constant 24 : index
    %c0_82 = arith.constant 0 : index
    %195 = vector.load %arg19[%c24, %c0_82] : memref<40x64xf32, #tpu.memory_space<vmem>>, vector<16x64xf32>
    tpu.vector_store %arg19[%c24, %c0_82], %194 {strides = array<i32>} : memref<40x64xf32, #tpu.memory_space<vmem>>, vector<16x64xf32>,
    %c16 = arith.constant 16 : index
    %c0_83 = arith.constant 0 : index
    %196 = vector.load %arg19[%c16, %c0_83] : memref<40x64xf32, #tpu.memory_space<vmem>>, vector<8x64xf32>
    tpu.vector_store %arg19[%c16, %c0_83], %191 {strides = array<i32>} : memref<40x64xf32, #tpu.memory_space<vmem>>, vector<8x64xf32>,
    %c0_84 = arith.constant 0 : index
    %c0_85 = arith.constant 0 : index
    %197 = vector.load %arg14[%c0_84, %c0_85] : memref<31x64xf32, #tpu.memory_space<vmem>>, vector<31x64xf32>
    %cst_86 = arith.constant 0.000000e+00 : f32
    %198 = vector.broadcast %cst_86 : f32 to vector<8x64xf32>
    %c0_87 = arith.constant 0 : index
    %c0_88 = arith.constant 0 : index
    %199 = vector.load %arg15[%c0_87, %c0_88] : memref<1x64xf32, #tpu.memory_space<vmem>>, vector<1x64xf32>
    %200 = vector.shape_cast %199 : vector<1x64xf32> to vector<64xf32>
    %201 = vector.shape_cast %200 : vector<64xf32> to vector<1x64xf32>
    %202 = vector.broadcast %201 : vector<1x64xf32> to vector<8x64xf32>
    %203 = arith.addf %198, %202 : vector<8x64xf32>
    %c9 = arith.constant 9 : index
    %c0_89 = arith.constant 0 : index
    %204 = vector.load %arg19[%c9, %c0_89] : memref<40x64xf32, #tpu.memory_space<vmem>>, vector<8x64xf32>
    %205 = vector.extract_strided_slice %197 {offsets = [8, 0], sizes = [1, 64], strides = [1, 1]} : vector<31x64xf32> to vector<1x64xf32>
    %206 = vector.broadcast %205 : vector<1x64xf32> to vector<8x64xf32>
    %207 = arith.mulf %204, %206 : vector<8x64xf32>
    %208 = arith.addf %203, %207 : vector<8x64xf32>
    %c10 = arith.constant 10 : index
    %c0_90 = arith.constant 0 : index
    %209 = vector.load %arg19[%c10, %c0_90] : memref<40x64xf32, #tpu.memory_space<vmem>>, vector<8x64xf32>
    %210 = vector.extract_strided_slice %197 {offsets = [9, 0], sizes = [1, 64], strides = [1, 1]} : vector<31x64xf32> to vector<1x64xf32>
    %211 = vector.broadcast %210 : vector<1x64xf32> to vector<8x64xf32>
    %212 = arith.mulf %209, %211 : vector<8x64xf32>
    %213 = arith.addf %208, %212 : vector<8x64xf32>
    %c11 = arith.constant 11 : index
    %c0_91 = arith.constant 0 : index
    %214 = vector.load %arg19[%c11, %c0_91] : memref<40x64xf32, #tpu.memory_space<vmem>>, vector<8x64xf32>
    %215 = vector.extract_strided_slice %197 {offsets = [10, 0], sizes = [1, 64], strides = [1, 1]} : vector<31x64xf32> to vector<1x64xf32>
    %216 = vector.broadcast %215 : vector<1x64xf32> to vector<8x64xf32>
    %217 = arith.mulf %214, %216 : vector<8x64xf32>
    %218 = arith.addf %213, %217 : vector<8x64xf32>
    %c12 = arith.constant 12 : index
    %c0_92 = arith.constant 0 : index
    %219 = vector.load %arg19[%c12, %c0_92] : memref<40x64xf32, #tpu.memory_space<vmem>>, vector<8x64xf32>
    %220 = vector.extract_strided_slice %197 {offsets = [11, 0], sizes = [1, 64], strides = [1, 1]} : vector<31x64xf32> to vector<1x64xf32>
    %221 = vector.broadcast %220 : vector<1x64xf32> to vector<8x64xf32>
    %222 = arith.mulf %219, %221 : vector<8x64xf32>
    %223 = arith.addf %218, %222 : vector<8x64xf32>
    %c13 = arith.constant 13 : index
    %c0_93 = arith.constant 0 : index
    %224 = vector.load %arg19[%c13, %c0_93] : memref<40x64xf32, #tpu.memory_space<vmem>>, vector<8x64xf32>
    %225 = vector.extract_strided_slice %197 {offsets = [12, 0], sizes = [1, 64], strides = [1, 1]} : vector<31x64xf32> to vector<1x64xf32>
    %226 = vector.broadcast %225 : vector<1x64xf32> to vector<8x64xf32>
    %227 = arith.mulf %224, %226 : vector<8x64xf32>
    %228 = arith.addf %223, %227 : vector<8x64xf32>
    %c14 = arith.constant 14 : index
    %c0_94 = arith.constant 0 : index
    %229 = vector.load %arg19[%c14, %c0_94] : memref<40x64xf32, #tpu.memory_space<vmem>>, vector<8x64xf32>
    %230 = vector.extract_strided_slice %197 {offsets = [13, 0], sizes = [1, 64], strides = [1, 1]} : vector<31x64xf32> to vector<1x64xf32>
    %231 = vector.broadcast %230 : vector<1x64xf32> to vector<8x64xf32>
    %232 = arith.mulf %229, %231 : vector<8x64xf32>
    %233 = arith.addf %228, %232 : vector<8x64xf32>
    %c15 = arith.constant 15 : index
    %c0_95 = arith.constant 0 : index
    %234 = vector.load %arg19[%c15, %c0_95] : memref<40x64xf32, #tpu.memory_space<vmem>>, vector<8x64xf32>
    %235 = vector.extract_strided_slice %197 {offsets = [14, 0], sizes = [1, 64], strides = [1, 1]} : vector<31x64xf32> to vector<1x64xf32>
    %236 = vector.broadcast %235 : vector<1x64xf32> to vector<8x64xf32>
    %237 = arith.mulf %234, %236 : vector<8x64xf32>
    %238 = arith.addf %233, %237 : vector<8x64xf32>
    %c16_96 = arith.constant 16 : index
    %c0_97 = arith.constant 0 : index
    %239 = vector.load %arg19[%c16_96, %c0_97] : memref<40x64xf32, #tpu.memory_space<vmem>>, vector<8x64xf32>
    %240 = vector.extract_strided_slice %197 {offsets = [15, 0], sizes = [1, 64], strides = [1, 1]} : vector<31x64xf32> to vector<1x64xf32>
    %241 = vector.broadcast %240 : vector<1x64xf32> to vector<8x64xf32>
    %242 = arith.mulf %239, %241 : vector<8x64xf32>
    %243 = arith.addf %238, %242 : vector<8x64xf32>
    %c17 = arith.constant 17 : index
    %c0_98 = arith.constant 0 : index
    %244 = vector.load %arg19[%c17, %c0_98] : memref<40x64xf32, #tpu.memory_space<vmem>>, vector<8x64xf32>
    %245 = vector.extract_strided_slice %197 {offsets = [16, 0], sizes = [1, 64], strides = [1, 1]} : vector<31x64xf32> to vector<1x64xf32>
    %246 = vector.broadcast %245 : vector<1x64xf32> to vector<8x64xf32>
    %247 = arith.mulf %244, %246 : vector<8x64xf32>
    %248 = arith.addf %243, %247 : vector<8x64xf32>
    %c18 = arith.constant 18 : index
    %c0_99 = arith.constant 0 : index
    %249 = vector.load %arg19[%c18, %c0_99] : memref<40x64xf32, #tpu.memory_space<vmem>>, vector<8x64xf32>
    %250 = vector.extract_strided_slice %197 {offsets = [17, 0], sizes = [1, 64], strides = [1, 1]} : vector<31x64xf32> to vector<1x64xf32>
    %251 = vector.broadcast %250 : vector<1x64xf32> to vector<8x64xf32>
    %252 = arith.mulf %249, %251 : vector<8x64xf32>
    %253 = arith.addf %248, %252 : vector<8x64xf32>
    %c19 = arith.constant 19 : index
    %c0_100 = arith.constant 0 : index
    %254 = vector.load %arg19[%c19, %c0_100] : memref<40x64xf32, #tpu.memory_space<vmem>>, vector<8x64xf32>
    %255 = vector.extract_strided_slice %197 {offsets = [18, 0], sizes = [1, 64], strides = [1, 1]} : vector<31x64xf32> to vector<1x64xf32>
    %256 = vector.broadcast %255 : vector<1x64xf32> to vector<8x64xf32>
    %257 = arith.mulf %254, %256 : vector<8x64xf32>
    %258 = arith.addf %253, %257 : vector<8x64xf32>
    %c20 = arith.constant 20 : index
    %c0_101 = arith.constant 0 : index
    %259 = vector.load %arg19[%c20, %c0_101] : memref<40x64xf32, #tpu.memory_space<vmem>>, vector<8x64xf32>
    %260 = vector.extract_strided_slice %197 {offsets = [19, 0], sizes = [1, 64], strides = [1, 1]} : vector<31x64xf32> to vector<1x64xf32>
    %261 = vector.broadcast %260 : vector<1x64xf32> to vector<8x64xf32>
    %262 = arith.mulf %259, %261 : vector<8x64xf32>
    %263 = arith.addf %258, %262 : vector<8x64xf32>
    %c21 = arith.constant 21 : index
    %c0_102 = arith.constant 0 : index
    %264 = vector.load %arg19[%c21, %c0_102] : memref<40x64xf32, #tpu.memory_space<vmem>>, vector<8x64xf32>
    %265 = vector.extract_strided_slice %197 {offsets = [20, 0], sizes = [1, 64], strides = [1, 1]} : vector<31x64xf32> to vector<1x64xf32>
    %266 = vector.broadcast %265 : vector<1x64xf32> to vector<8x64xf32>
    %267 = arith.mulf %264, %266 : vector<8x64xf32>
    %268 = arith.addf %263, %267 : vector<8x64xf32>
    %c22 = arith.constant 22 : index
    %c0_103 = arith.constant 0 : index
    %269 = vector.load %arg19[%c22, %c0_103] : memref<40x64xf32, #tpu.memory_space<vmem>>, vector<8x64xf32>
    %270 = vector.extract_strided_slice %197 {offsets = [21, 0], sizes = [1, 64], strides = [1, 1]} : vector<31x64xf32> to vector<1x64xf32>
    %271 = vector.broadcast %270 : vector<1x64xf32> to vector<8x64xf32>
    %272 = arith.mulf %269, %271 : vector<8x64xf32>
    %273 = arith.addf %268, %272 : vector<8x64xf32>
    %c23 = arith.constant 23 : index
    %c0_104 = arith.constant 0 : index
    %274 = vector.load %arg19[%c23, %c0_104] : memref<40x64xf32, #tpu.memory_space<vmem>>, vector<8x64xf32>
    %275 = vector.extract_strided_slice %197 {offsets = [22, 0], sizes = [1, 64], strides = [1, 1]} : vector<31x64xf32> to vector<1x64xf32>
    %276 = vector.broadcast %275 : vector<1x64xf32> to vector<8x64xf32>
    %277 = arith.mulf %274, %276 : vector<8x64xf32>
    %278 = arith.addf %273, %277 : vector<8x64xf32>
    %279 = arith.negf %278 : vector<8x64xf32>
    %280 = math.exp %279 : vector<8x64xf32>
    %cst_105 = arith.constant 1.000000e+00 : f32
    %281 = vector.broadcast %cst_105 : f32 to vector<8x64xf32>
    %282 = arith.addf %281, %280 : vector<8x64xf32>
    %283 = arith.divf %281, %282 : vector<8x64xf32>
    %284 = arith.mulf %278, %283 : vector<8x64xf32>
    %c0_106 = arith.constant 0 : index
    %c0_107 = arith.constant 0 : index
    %285 = vector.load %arg16[%c0_106, %c0_107] : memref<64x32xf32, #tpu.memory_space<vmem>>, vector<64x32xf32>
    %cst_108 = arith.constant dense<0.000000e+00> : vector<8x32xf32>
    %286 = tpu.matmul %284, %285, %cst_108 {dimension_numbers = #tpu.dot_dimension_numbers<[1], [0], [0], [1], [0, 0, 1, 1], [], []>} : vector<8x64xf32>, vector<64x32xf32>, vector<8x32xf32> -> vector<8x32xf32>
    %c0_109 = arith.constant 0 : index
    %c0_110 = arith.constant 0 : index
    %287 = vector.load %arg17[%c0_109, %c0_110] : memref<1x32xf32, #tpu.memory_space<vmem>>, vector<1x32xf32>
    %288 = vector.shape_cast %287 : vector<1x32xf32> to vector<32xf32>
    %289 = vector.shape_cast %288 : vector<32xf32> to vector<1x32xf32>
    %290 = vector.broadcast %289 : vector<1x32xf32> to vector<8x32xf32>
    %291 = arith.addf %286, %290 : vector<8x32xf32>
    %292 = arith.addf %150, %291 : vector<8x32xf32>
    %c0_111 = arith.constant 0 : index
    %c0_112 = arith.constant 0 : index
    %c0_113 = arith.constant 0 : index
    %293 = vector.load %arg18[%c0_111, %c0_112, %c0_113] : memref<1x8x32xf32, #tpu.memory_space<vmem>>, vector<1x8x32xf32>
    %294 = vector.shape_cast %293 : vector<1x8x32xf32> to vector<8x32xf32>
    %295 = vector.shape_cast %292 : vector<8x32xf32> to vector<1x8x32xf32>
    tpu.vector_store %arg18[%c0_111, %c0_112, %c0_113], %295 {strides = array<i32>} : memref<1x8x32xf32, #tpu.memory_space<vmem>>, vector<1x8x32xf32>,
    return
  }
  func.func @transform_0(%arg0: i32) -> (i32, i32, i32) {
    %c0_i32 = arith.constant 0 : i32
    %c0_i32_0 = arith.constant 0 : i32
    %c0_i32_1 = arith.constant 0 : i32
    return %arg0, %c0_i32, %c0_i32_0 : i32, i32, i32
  }
  func.func @transform_1(%arg0: i32) -> (i32, i32) {
    %c0_i32 = arith.constant 0 : i32
    %c0_i32_0 = arith.constant 0 : i32
    %c0_i32_1 = arith.constant 0 : i32
    return %c0_i32, %c0_i32_0 : i32, i32
  }
  func.func @transform_2(%arg0: i32) -> (i32, i32) {
    %c0_i32 = arith.constant 0 : i32
    %c0_i32_0 = arith.constant 0 : i32
    %c0_i32_1 = arith.constant 0 : i32
    return %c0_i32, %c0_i32_0 : i32, i32
  }
  func.func @transform_3(%arg0: i32) -> (i32, i32) {
    %c0_i32 = arith.constant 0 : i32
    %c0_i32_0 = arith.constant 0 : i32
    %c0_i32_1 = arith.constant 0 : i32
    return %c0_i32, %c0_i32_0 : i32, i32
  }
  func.func @transform_4(%arg0: i32) -> (i32, i32) {
    %c0_i32 = arith.constant 0 : i32
    %c0_i32_0 = arith.constant 0 : i32
    %c0_i32_1 = arith.constant 0 : i32
    return %c0_i32, %c0_i32_0 : i32, i32
  }
  func.func @transform_5(%arg0: i32) -> (i32, i32) {
    %c0_i32 = arith.constant 0 : i32
    %c0_i32_0 = arith.constant 0 : i32
    %c0_i32_1 = arith.constant 0 : i32
    return %c0_i32, %c0_i32_0 : i32, i32
  }
  func.func @transform_6(%arg0: i32) -> (i32, i32) {
    %c0_i32 = arith.constant 0 : i32
    %c0_i32_0 = arith.constant 0 : i32
    %c0_i32_1 = arith.constant 0 : i32
    return %c0_i32, %c0_i32_0 : i32, i32
  }
  func.func @transform_7(%arg0: i32) -> (i32, i32) {
    %c0_i32 = arith.constant 0 : i32
    %c0_i32_0 = arith.constant 0 : i32
    %c0_i32_1 = arith.constant 0 : i32
    return %c0_i32, %c0_i32_0 : i32, i32
  }
  func.func @transform_8(%arg0: i32) -> (i32, i32) {
    %c0_i32 = arith.constant 0 : i32
    %c0_i32_0 = arith.constant 0 : i32
    %c0_i32_1 = arith.constant 0 : i32
    return %c0_i32, %c0_i32_0 : i32, i32
  }
  func.func @transform_9(%arg0: i32) -> (i32, i32) {
    %c0_i32 = arith.constant 0 : i32
    %c0_i32_0 = arith.constant 0 : i32
    %c0_i32_1 = arith.constant 0 : i32
    return %c0_i32, %c0_i32_0 : i32, i32
  }
  func.func @transform_10(%arg0: i32) -> (i32, i32) {
    %c0_i32 = arith.constant 0 : i32
    %c0_i32_0 = arith.constant 0 : i32
    %c0_i32_1 = arith.constant 0 : i32
    return %c0_i32, %c0_i32_0 : i32, i32
  }
  func.func @transform_11(%arg0: i32) -> (i32, i32) {
    %c0_i32 = arith.constant 0 : i32
    %c0_i32_0 = arith.constant 0 : i32
    %c0_i32_1 = arith.constant 0 : i32
    return %c0_i32, %c0_i32_0 : i32, i32
  }
  func.func @transform_12(%arg0: i32) -> (i32, i32) {
    %c0_i32 = arith.constant 0 : i32
    %c0_i32_0 = arith.constant 0 : i32
    %c0_i32_1 = arith.constant 0 : i32
    return %c0_i32, %c0_i32_0 : i32, i32
  }
  func.func @transform_13(%arg0: i32) -> (i32, i32) {
    %c0_i32 = arith.constant 0 : i32
    %c0_i32_0 = arith.constant 0 : i32
    %c0_i32_1 = arith.constant 0 : i32
    return %c0_i32, %c0_i32_0 : i32, i32
  }
  func.func @transform_14(%arg0: i32) -> (i32, i32) {
    %c0_i32 = arith.constant 0 : i32
    %c0_i32_0 = arith.constant 0 : i32
    %c0_i32_1 = arith.constant 0 : i32
    return %c0_i32, %c0_i32_0 : i32, i32
  }
  func.func @transform_15(%arg0: i32) -> (i32, i32) {
    %c0_i32 = arith.constant 0 : i32
    %c0_i32_0 = arith.constant 0 : i32
    %c0_i32_1 = arith.constant 0 : i32
    return %c0_i32, %c0_i32_0 : i32, i32
  }
  func.func @transform_16(%arg0: i32) -> (i32, i32) {
    %c0_i32 = arith.constant 0 : i32
    %c0_i32_0 = arith.constant 0 : i32
    %c0_i32_1 = arith.constant 0 : i32
    return %c0_i32, %c0_i32_0 : i32, i32
  }
  func.func @transform_17(%arg0: i32) -> (i32, i32, i32) {
    %c0_i32 = arith.constant 0 : i32
    %c0_i32_0 = arith.constant 0 : i32
    %c0_i32_1 = arith.constant 0 : i32
    return %arg0, %c0_i32, %c0_i32_0 : i32, i32, i32
  }
}

</mosaic_0001>

<bundles_post_ra>
// kernel: tpu_custom_call.1
= control target key start
LH: loop header
LB: loop body
LE: loop exit
PB: predicated region body
PF: predicated region fallthrough
CT: control target
= control target key end

     0   :  { %s7555_s0 = inlined_call_operand.vmem [shape: f32[2,8,32], index: 0, kind: input, shape index: {}]   ;;  %s7556_s1 = inlined_call_operand.vmem [shape: f32[1,32], index: 1, kind: input, shape index: {}]   ;;  %s7557_s2 = inlined_call_operand.vmem [shape: f32[1,32], index: 2, kind: input, shape index: {}]   ;;  %s7558_s3 = inlined_call_operand.vmem [shape: f32[32,384], index: 3, kind: input, shape index: {}]   ;;  %s7559_s4 = inlined_call_operand.vmem [shape: f32[1,384], index: 4, kind: input, shape index: {}]   ;;  %s7560_s5 = inlined_call_operand.hbm [shape: f32[128,768], index: 5, kind: input, shape index: {}]   ;;  %s7561_s6 = inlined_call_operand.vmem [shape: f32[1,768], index: 6, kind: input, shape index: {}]   ;;  %s7562_s7 = inlined_call_operand.vmem [shape: f32[128,32], index: 7, kind: input, shape index: {}]   ;;  %s7563_s8 = inlined_call_operand.vmem [shape: f32[1,32], index: 8, kind: input, shape index: {}]   ;;  %s7564_s9 = inlined_call_operand.vmem [shape: f32[1,32], index: 9, kind: input, shape index: {}]   ;;  %s7565_s10 = inlined_call_operand.vmem [shape: f32[1,32], index: 10, kind: input, shape index: {}]   ;;  %s7566_s11 = inlined_call_operand.vmem [shape: f32[32,128], index: 11, kind: input, shape index: {}]   ;;  %s7567_s12 = inlined_call_operand.vmem [shape: f32[1,128], index: 12, kind: input, shape index: {}]   ;;  %s7568_s13 = inlined_call_operand.vmem [shape: f32[31,64], index: 13, kind: input, shape index: {}]   ;;  %s7569_s14 = inlined_call_operand.vmem [shape: f32[1,64], index: 14, kind: input, shape index: {}]   ;;  %s7570_s15 = inlined_call_operand.vmem [shape: f32[64,32], index: 15, kind: input, shape index: {}]   ;;  %s7571_s16 = inlined_call_operand.vmem [shape: f32[1,32], index: 16, kind: input, shape index: {}]   ;;  %s7572_s17 = inlined_call_operand.hbm [shape: f32[2,8,32], index: 17, kind: output, shape index: {}]  }
   0x1   :  { %7638 = sst [smem:[#allocation44_spill]] %s7555_s0 }
   0x2   :  { %7639 = sst [smem:[#allocation45_spill]] %s7556_s1 }
   0x3   :  { %22 = vsyncpa [#allocation4], 0 }
   0x4   :  { %23 = vsyncpa [#allocation5], 0 }
   0x5   :  { %25 = vsyncpa [#allocation5 + $0x1], 0  ;;  %s6244_s24 = smov 0   ;;  %s6246_s25 = smov 0  }
   0x6   :  { %s6248_s26 = smov 0   ;;  %s6250_s27 = smov 0  }
   0x7 LB: > { %7640 = sst [smem:[#allocation9_spill]] %s6130_s24  ;;  %s6265_s28 = sadd.s32 4294967295, %s6142_s27   ;;  %s6142_s27 = sphi %s6250_s27, %s7752_s27   ;;  %s6138_s26 = sphi %s6248_s26, %s7754_s26   ;;  %s6134_s25 = sphi %s6246_s25, %s7756_s25   ;;  %s6130_s24 = sphi %s6244_s24, %s7755_s24  }
   0x8   : > { %7641 = sst [smem:[#allocation10_spill]] %s6138_s26  ;;  %s4299_s29 = sadd.s32 4294967294, %s6142_s27  }
   0x9   : > { %7642 = sst [smem:[#allocation11_spill]] %s6142_s27  ;;  %s6269_s0 = sadd.s32 1, %s6142_s27  }
   0xa   : > { %7643 = sst [smem:[#allocation12_spill]] %s6269_s0  ;;  %s400_s30 = sadd.s32 1, %s6138_s26 }
   0xb   : > { %s397_s18 = ssub.s32 %s6142_s27, %s6269_s0  ;;  %p410_p0 = scmp.ne.s32.totalorder %s6138_s26, %s6134_s25 }
   0xc   : > { %p398_p1 = scmp.eq.s32.totalorder %s397_s18, 0  ;;  %p411_p2 = scmp.eq.s32.totalorder %s6265_s28, 1 }
   0xd   : > { %p416_p3 = scmp.ne.s32.totalorder %s6134_s25, %s6130_s24  ;;  %p417_p4 = scmp.eq.s32.totalorder %s4299_s29, 1 }
   0xe   : > { %s6280_s19 = scalar_select %p398_p1, %s6138_s26, %s400_s30  }
   0xf   : > { %p6282_p5 = por %p411_p2, %p410_p0  ;;  %p6286_p6 = por %p417_p4, %p416_p3 }
  0x10   : > { %7644 = sst [smem:[#allocation13_spill]] %s6280_s19  ;;  %p4300_p7 = scmp.ge.s32.totalorder %s6142_s27, 1 }
  0x11   : > { %s7645_s1 = scalar_select %p6282_p5, 1, 0 }
  0x12   : > { %s7646_s20 = scalar_select %p6286_p6, 1, 0 }
  0x13   : > { %p424_p8 = scmp.lt.s32.totalorder %s6142_s27, 3  ;;  %p7578_p9 = scmp.eq.s32.totalorder %s6265_s28, 0 }
  0x14   : > { %7647 = sst [smem:[#allocation14_spill]] %s7646_s20  ;;  %s6144_s22 = smov [#allocation3]  }
  0x15   : > { %p6293_p10 = pnand %p4300_p7, %p424_p8  ;;  %s448_s23 = sshll.u32 %s6144_s22, 4  ;;  %s449_s23 = int_to_ptr.vmem [resolvable:$true] %s448_s23 }
  0x16   : > { %s6048_s19 = scalar_lea.hbm %s7560_s5, 12288 }
  0x17   : > { %s7648_s21 = scalar_select %p6293_p10, 1, 0 }
  0x18   : > { %p5953_p11 = pneg %p6293_p10  ;;  %p6049_p13 = scmp.ne.s32.totalorder %s7560_s5, %s6048_s19 }
  0x19   : > { %p6055_p3 = scmp.lt.u32.totalorder %s6048_s19, %s7560_s5 }
  0x1a   : > { %p6301_p12 = pnand %p7578_p9, %p5953_p11 }
  0x1c   : > { %p6050_p0 = pneg %p6301_p12 }
  0x1e   : > { %p6051_p1 = pnand %p6050_p0, %p6049_p13 }
  0x20   : > { %p6052_p2 = pneg %p6051_p1 }
  0x22   : > { %p6057_p4 = pnand %p6055_p3, %p6052_p2 }
  0x24   : > { %6060 = shalt.err (!%p6057_p4)
}
  0x25   : > { %s6061_s24 = scalar_lea.vmem %s449_s23, 12288  ;;  %p6069_p9 = scmp.lt.s32.totalorder %s449_s23, %s449_s23 }
  0x26   : > { %p6062_p7 = scmp.ne.s32.totalorder %s449_s23, %s6061_s24  ;;  %p6070_p6 = scmp.lt.s32.totalorder %s6061_s24, %s6061_s24 }
  0x28   : > { %p6064_p8 = pnand %p6062_p7, %p6050_p0  ;;  %p6071_p5 = por %p6070_p6, %p6069_p9 }
  0x2a   : > { %p6065_p11 = pneg %p6064_p8 }
  0x2c   : > { %p6072_p10 = pnand %p6071_p5, %p6065_p11 }
  0x2e   : > { %6075 = shalt.err (!%p6072_p10)
}
  0x2f   : > { %s6145_s26 = smov 768   ;;  %s6146_s0 = smov 48  }
  0x30   : > { %5956 = dma.hbm_to_vmem [thread:$0]  (!%p6301_p12), %s7560_s5, 12288, %s449_s23, [#allocation4], %s6145_s26, %s6145_s26, %s6146_s0  }
  0x31   : > { %p7650_p13 = scmp.ne.s32.totalorder %s7648_s21, 0 }
  0x33   : > { %504 = sbr.rel (%p7650_p13) target bundleno = 3894 (0xf36), region = 88 }
  0x3a   : > { %p7651_p1 = scmp.eq.s32.totalorder %s6265_s28, 0 }
  0x3c   : > { %6121 = dma.done.wait (%p7651_p1), [#allocation4], 12288   ;;  %p7652_p0 = pmov %p7651_p1 }
  0x3d   : > { %p555_p5 = scmp.lt.s32.totalorder %s6265_s28, 1  ;;  %s7653_s22 = sld [smem:[#allocation44_spill]]  ;;  %vm560_vm0 = vcmask 261120   ;;  %v592_v7 = vld [vmem:[%s7558_s3 + $0x8] sm:$0xff]  ;;  %v595_v8 = vld [vmem:[%s7558_s3 + $0x20] sm:$0xff]  ;;  %v594_v11 = vld [vmem:[%s7558_s3 + $0x18] sm:$0xff] }
  0x3e   : > { %6123 = vsyncadd (%p7652_p0), [#allocation4], 4294955008  ;;  %v591_v9 = vld [vmem:[%s7558_s3] sm:$0xff]  ;;  %v5475_v10 = vpack.c.bf16 %v595_v8, %v592_v7  ;;  %v598_v12 = vld [vmem:[%s7558_s3 + $0x38] sm:$0xff]  ;;  %v7584_v14 = vmov 0.0   ;;  %v7586_v20 = vmov 0.0|0.0  }
  0x3f   : > { %s556_s24 = scalar_select %p555_p5, %s6265_s28, 1  ;;  %v601_v13 = vld [vmem:[%s7558_s3 + $0x50] sm:$0xff]  ;;  %687 = vmatprep.mubr.f32.mxu1 %v7584_v14  ;;  %956 = vmatprep.mubr.f32.mxu0 %v7584_v14  ;;  %v5477_v15 = vpack.c.bf16 %v594_v11, %v591_v9  ;;  %v600_v18 = vld [vmem:[%s7558_s3 + $0x48] sm:$0xff]  ;;  %v771_v22 = vld [vmem:[#allocation3 + $0x38] sm:$0xff]  ;;  %vm6149_vm1 = vmmov 0   ;;  %vm1344_vm2 = vcmask 523264  }
  0x40   : > { %v5479_v16 = vpack.c.bf16 %v601_v13, %v598_v12  ;;  %v597_v17 = vld [vmem:[%s7558_s3 + $0x30] sm:$0xff]  ;;  %5476 = vmatprep.subr.bf16.mxu1 %v5475_v10  ;;  %v764_v24 = vld [vmem:[#allocation3] sm:$0xff]  ;;  %v770_v25 = vld [vmem:[#allocation3 + $0x30] sm:$0xff]  ;;  %3998 = vst.msk [vmem:[#allocation2 + $0x8] sm:$0xff] %vm1344_vm2, %v7584_v14  ;;  %s6151_s21 = smov 64   ;;  %vm1486_vm3 = vcmask 64512  }
  0x41   : > { %s4306_s19 = sshll.u32 %s556_s24, 3  ;;  %5478 = vmatpush1.bf16.msra.mxu1 %v5477_v15  ;;  %v5481_v19 = vpack.c.bf16 %v600_v18, %v597_v17  ;;  %v765_v21 = vld [vmem:[#allocation3 + $0x8] sm:$0xff]  ;;  %v6370_v26 = vpack.c.bf16 %v770_v25, %v764_v24  ;;  %v783_v28 = vld [vmem:[#allocation3 + $0x98] sm:$0xff]  ;;  %v776_v30 = vld [vmem:[#allocation3 + $0x60] sm:$0xff]  ;;  %3999 = vst.msk [vmem:[#allocation2 + $0x18] sm:$0xff] %vm1344_vm2, %v7584_v14  ;;  %p7747_p9 = scmp.ne.s32.totalorder %s7645_s1, 0 }
  0x42   : > { %5480 = vmatprep.subr.bf16.mxu1 %v5479_v16  ;;  %v6368_v23 = vpack.c.bf16 %v771_v22, %v765_v21  ;;  %v777_v27 = vld [vmem:[#allocation3 + $0x68] sm:$0xff]  ;;  %v782_v31 = vld [vmem:[#allocation3 + $0x90] sm:$0xff]  ;;  %v795_v34 = vld [vmem:[#allocation3 + $0xf8] sm:$0xff]  ;;  %s6153_s24 = smov [#allocation6]  }
  0x43   : > { %s6332_s27 = scalar_lea.vmem %s7653_s22, %s4306_s19  ;;  %v6374_v29 = vpack.c.bf16 %v783_v28, %v777_v27  ;;  %v6376_v32 = vpack.c.bf16 %v782_v31, %v776_v30  ;;  %v789_v33 = vld [vmem:[#allocation3 + $0xc8] sm:$0xff]  ;;  %v788_v36 = vld [vmem:[#allocation3 + $0xc0] sm:$0xff]  ;;  %v794_v37 = vld [vmem:[#allocation3 + $0xf0] sm:$0xff]  ;;  %s7654_s19 = sld [smem:[#allocation45_spill]] }
  0x44   : > { %v559_v0 = vld [vmem:[%s6332_s27] sm:$0xff]  ;;  %5490 = vmatprep.subr.bf16.mxu0 %v6368_v23  ;;  %v6379_v35 = vpack.c.bf16 %v795_v34, %v789_v33  ;;  %v6382_v38 = vpack.c.bf16 %v794_v37, %v788_v36  ;;  %v801_v39 = vld [vmem:[#allocation3 + $0x128] sm:$0xff]  ;;  %v800_v42 = vld [vmem:[#allocation3 + $0x120] sm:$0xff] }
  0x45   : > { %v561_v1 = vsel %vm560_vm0, %v559_v0, 0.0  ;;  %5482 = vmatpush1.bf16.msra.mxu1 %v5481_v19  ;;  %5492 = vmatpush1.bf16.msra.mxu0 %v6370_v26  ;;  %v807_v40 = vld [vmem:[#allocation3 + $0x158] sm:$0xff]  ;;  %v806_v43 = vld [vmem:[#allocation3 + $0x150] sm:$0xff]  ;;  %v813_v45 = vld [vmem:[#allocation3 + $0x188] sm:$0xff] }
  0x46   : > { %562 = vadd.xlane.f32.xlu0 %v561_v1  ;;  %5483 = vmatprep.subr.bf16.mxu1 %v7586_v20  ;;  %v6385_v41 = vpack.c.bf16 %v807_v40, %v801_v39  ;;  %v6388_v44 = vpack.c.bf16 %v806_v43, %v800_v42  ;;  %v819_v46 = vld [vmem:[#allocation3 + $0x1b8] sm:$0xff]  ;;  %v812_v48 = vld [vmem:[#allocation3 + $0x180] sm:$0xff]  ;;  %v818_v49 = vld [vmem:[#allocation3 + $0x1b0] sm:$0xff] }
  0x47   : > { %5494 = vmatprep.subr.bf16.mxu0 %v6374_v29  ;;  %v6391_v47 = vpack.c.bf16 %v819_v46, %v813_v45  ;;  %v6394_v50 = vpack.c.bf16 %v818_v49, %v812_v48  ;;  %v825_v51 = vld [vmem:[#allocation3 + $0x1e8] sm:$0xff]  ;;  %v831_v52 = vld [vmem:[#allocation3 + $0x218] sm:$0xff]  ;;  %v824_v54 = vld [vmem:[#allocation3 + $0x1e0] sm:$0xff] }
  0x48   : > { %v6397_v53 = vpack.c.bf16 %v831_v52, %v825_v51  ;;  %v830_v55 = vld [vmem:[#allocation3 + $0x210] sm:$0xff]  ;;  %v837_v57 = vld [vmem:[#allocation3 + $0x248] sm:$0xff]  ;;  %v843_v58 = vld [vmem:[#allocation3 + $0x278] sm:$0xff] }
  0x49   : > { %5496 = vmatpush1.bf16.msra.mxu0 %v6376_v32  ;;  %v6400_v56 = vpack.c.bf16 %v830_v55, %v824_v54  ;;  %v6403_v59 = vpack.c.bf16 %v843_v58, %v837_v57  ;;  %v836_v60 = vld [vmem:[#allocation3 + $0x240] sm:$0xff]  ;;  %v842_v61 = vld [vmem:[#allocation3 + $0x270] sm:$0xff]  ;;  %v849_v63 = vld [vmem:[#allocation3 + $0x2a8] sm:$0xff] }
  0x4a   : > { %5498 = vmatprep.subr.bf16.mxu0 %v6379_v35  ;;  %v6406_v62 = vpack.c.bf16 %v842_v61, %v836_v60  ;;  %v4307_v10 = vld [vmem:[%s7654_s19] ss:$0 sm:$0xff]  ;;  %v593_v12 = vld [vmem:[%s7558_s3 + $0x10] sm:$0xff]  ;;  %v596_v13 = vld [vmem:[%s7558_s3 + $0x28] sm:$0xff]  ;;  %s552_s19 = sand.u32 1, %s6134_s25  }
  0x4b   : > { %v4308_v15 = vld [vmem:[%s7557_s2] ss:$0 sm:$0xff]  ;;  %v5484_v17 = vpack.c.bf16 %v596_v13, %v593_v12  ;;  %v773_v22 = vld [vmem:[#allocation3 + $0x48] sm:$0xff]  ;;  %v766_v27 = vld [vmem:[#allocation3 + $0x10] sm:$0xff]  ;;  %s4305_s20 = sshll.u32 %s552_s19, 3  ;;  %s4215_s18 = scalar_lea.sflag [#allocation5], %s552_s19 }
  0x4c   : > { %v599_v19 = vld [vmem:[%s7558_s3 + $0x40] sm:$0xff]  ;;  %v772_v28 = vld [vmem:[#allocation3 + $0x40] sm:$0xff]  ;;  %v785_v31 = vld [vmem:[#allocation3 + $0xa8] sm:$0xff]  ;;  %s554_s22 = scalar_lea.vmem [#allocation6], %s4305_s20  ;;  %s6080_s20 = sshll.u32 %s6153_s24, 4  ;;  %s6081_s20 = int_to_ptr.vmem [resolvable:$false] %s6080_s20 }
  0x4d   : > { %5500 = vmatpush1.bf16.msra.mxu0 %v6382_v38  ;;  %v767_v21 = vld [vmem:[#allocation3 + $0x18] sm:$0xff]  ;;  %v6441_v33 = vpack.c.bf16 %v772_v28, %v766_v27  ;;  %v778_v36 = vld [vmem:[#allocation3 + $0x70] sm:$0xff]  ;;  %v784_v37 = vld [vmem:[#allocation3 + $0xa0] sm:$0xff]  ;;  %s4228_s23 = sshll.u32 %s554_s22, 4  ;;  %s7514_s23 = int_to_ptr.vmem [resolvable:$true] %s4228_s23 }
  0x4e   : > { %5502 = vmatprep.subr.bf16.mxu0 %v6385_v41  ;;  %v6439_v25 = vpack.c.bf16 %v773_v22, %v767_v21  ;;  %v779_v30 = vld [vmem:[#allocation3 + $0x78] sm:$0xff]  ;;  %v797_v40 = vld [vmem:[#allocation3 + $0x108] sm:$0xff]  ;;  %v6448_v42 = vpack.c.bf16 %v784_v37, %v778_v36  ;;  %v790_v45 = vld [vmem:[#allocation3 + $0xd0] sm:$0xff]  ;;  %p6083_p2 = scmp.lt.s32.totalorder %s7514_s23, %s6081_s20 }
  0x4f   : > { %v6444_v34 = vpack.c.bf16 %v785_v31, %v779_v30  ;;  %v791_v39 = vld [vmem:[#allocation3 + $0xd8] sm:$0xff]  ;;  %v796_v46 = vld [vmem:[#allocation3 + $0x100] sm:$0xff]  ;;  %v809_v49 = vld [vmem:[#allocation3 + $0x168] sm:$0xff]  ;;  %v605_v31 = vlaneseq }
  0x50   : > { %v6452_v43 = vpack.c.bf16 %v797_v40, %v791_v39  ;;  %v803_v48 = vld [vmem:[#allocation3 + $0x138] sm:$0xff]  ;;  %v6455_v51 = vpack.c.bf16 %v796_v46, %v790_v45  ;;  %v802_v54 = vld [vmem:[#allocation3 + $0x130] sm:$0xff]  ;;  %v808_v55 = vld [vmem:[#allocation3 + $0x160] sm:$0xff] }
  0x51   : > { %5504 = vmatpush1.bf16.msra.mxu0 %v6388_v44  ;;  %v6458_v52 = vpack.c.bf16 %v809_v49, %v803_v48  ;;  %v815_v57 = vld [vmem:[#allocation3 + $0x198] sm:$0xff]  ;;  %v821_v58 = vld [vmem:[#allocation3 + $0x1c8] sm:$0xff]  ;;  %v6461_v60 = vpack.c.bf16 %v808_v55, %v802_v54  ;;  %v850_v21 = vld [vmem:[#allocation3 + $0x2b0] sm:$0xff]  ;;  %v6497_v36 = vshrl.u32 %v605_v31, 7 }
  0x52   : > { %5506 = vmatprep.subr.bf16.mxu0 %v6391_v47  ;;  %v6464_v61 = vpack.c.bf16 %v821_v58, %v815_v57  ;;  %v856_v22 = vld [vmem:[#allocation3 + $0x2e0] sm:$0xff]  ;;  %v769_v27 = vld [vmem:[#allocation3 + $0x28] sm:$0xff]  ;;  %v775_v28 = vld [vmem:[#allocation3 + $0x58] sm:$0xff] }
  0x53   : > { %v6490_v30 = vpack.c.bf16 %v775_v28, %v769_v27  ;;  %7655 = vst [vmem:[#allocation15_spill] sm:$0xff] %v6497_v36  ;;  %v6500_v37 = vsub.s32 0, %v6497_v36  ;;  %v6508_v39 = vsub.s32 1, %v6497_v36  ;;  %v768_v45 = vld [vmem:[#allocation3 + $0x20] sm:$0xff]  ;;  %v774_v46 = vld [vmem:[#allocation3 + $0x50] sm:$0xff]  ;;  %v781_v49 = vld [vmem:[#allocation3 + $0x88] sm:$0xff] }
  0x54   : > { %v787_v54 = vld [vmem:[#allocation3 + $0xb8] sm:$0xff]  ;;  %v6514_v57 = vpack.c.bf16 %v774_v46, %v768_v45  ;;  %v810_v45 = vld [vmem:[#allocation3 + $0x170] sm:$0xff]  ;;  %v817_v46 = vld [vmem:[#allocation3 + $0x1a8] sm:$0xff] }
  0x55   : > { %5508 = vmatpush1.bf16.msra.mxu0 %v6394_v50  ;;  %7656 = vst [vmem:[#allocation16_spill] sm:$0xff] %v6500_v37  ;;  %7657 = vst [vmem:[#allocation17_spill] sm:$0xff] %v6508_v39  ;;  %v811_v27 = vld [vmem:[#allocation3 + $0x178] sm:$0xff] }
  0x56   : > { %5510 = vmatprep.subr.bf16.mxu0 %v6397_v53 }
  0x59   : > { %5512 = vmatpush1.bf16.msra.mxu0 %v6400_v56 }
  0x5a   : > { %5514 = vmatprep.subr.bf16.mxu0 %v6403_v59 }
  0x5d   : > { %5516 = vmatpush1.bf16.msra.mxu0 %v6406_v62 }
  0xd3   : > { %v563_v2 = vpop.xlane.xlu0 %562 }
  0xd4   : > { %v565_v3 = vmul.f32 0.03125, %v563_v2  ;;  %v848_v2 = vld [vmem:[#allocation3 + $0x2a0] sm:$0xff] }
  0xd6   : > { %v6336_v4 = vsub.f32 %v559_v0, %v565_v3  ;;  %v855_v0 = vld [vmem:[#allocation3 + $0x2d8] sm:$0xff]  ;;  %v854_v3 = vld [vmem:[#allocation3 + $0x2d0] sm:$0xff] }
  0xd7   : > { %v6409_v1 = vpack.c.bf16 %v855_v0, %v849_v63  ;;  %v814_v63 = vld [vmem:[#allocation3 + $0x190] sm:$0xff]  ;;  %v820_v0 = vld [vmem:[#allocation3 + $0x1c0] sm:$0xff] }
  0xd8   : > { %v567_v5 = vmul.f32 %v6336_v4, %v6336_v4 }
  0xd9   : > { %5518 = vmatprep.subr.bf16.mxu0 %v6409_v1 }
  0xda   : > { %v568_v6 = vsel %vm560_vm0, %v567_v5, 0.0  ;;  %v6412_v5 = vpack.c.bf16 %v854_v3, %v848_v2  ;;  %v827_v2 = vld [vmem:[#allocation3 + $0x1f8] sm:$0xff]  ;;  %v833_v3 = vld [vmem:[#allocation3 + $0x228] sm:$0xff] }
  0xdb   : > { %569 = vadd.xlane.f32.xlu0 %v568_v6 }
  0xdc   : > { %5520 = vmatpush1.bf16.msra.mxu0 %v6412_v5 }
  0xdd   : > { %5554 = vmatprep.subr.bf16.mxu0 %v6490_v30 }
 0x168   : > { %v570_v6 = vpop.xlane.xlu0 %569 }
 0x169   : > { %v571_v7 = vmul.f32 0.03125, %v570_v6  ;;  %v6467_v6 = vpack.c.bf16 %v820_v0, %v814_v63  ;;  %v6518_v0 = vpack.c.bf16 %v787_v54, %v781_v49  ;;  %v816_v54 = vld [vmem:[#allocation3 + $0x1a0] sm:$0xff] }
 0x16b   : > { %v572_v8 = vadd.f32 1e-05, %v571_v7  ;;  %v6470_v7 = vpack.c.bf16 %v833_v3, %v827_v2  ;;  %v780_v2 = vld [vmem:[#allocation3 + $0x80] sm:$0xff]  ;;  %v786_v3 = vld [vmem:[#allocation3 + $0xb0] sm:$0xff] }
 0x16d   : > { %6007 = vrsqrt.f32 %v572_v8  ;;  %v826_v8 = vld [vmem:[#allocation3 + $0x1f0] sm:$0xff] }
 0x177   : > { %v6008_v9 = vpop.eup %6007 }
 0x178   : > { %v574_v11 = vmul.f32 %v6008_v9, %v6336_v4  ;;  %v602_v4 = vld [vmem:[%s7558_s3 + $0x58] sm:$0xff]  ;;  %v832_v9 = vld [vmem:[#allocation3 + $0x220] sm:$0xff] }
 0x179   : > { %v5487_v24 = vpack.c.bf16 %v602_v4, %v599_v19  ;;  %v6473_v12 = vpack.c.bf16 %v832_v9, %v826_v8  ;;  %v793_v9 = vld [vmem:[#allocation3 + $0xe8] sm:$0xff] }
 0x17a   : > { %v582_v16 = vmul.f32 %v4307_v10, %v574_v11  ;;  %v839_v10 = vld [vmem:[#allocation3 + $0x258] sm:$0xff]  ;;  %v845_v11 = vld [vmem:[#allocation3 + $0x288] sm:$0xff] }
 0x17b   : > { %v6476_v13 = vpack.c.bf16 %v845_v11, %v839_v10  ;;  %v799_v10 = vld [vmem:[#allocation3 + $0x118] sm:$0xff] }
 0x17c   : > { %v590_v18 = vadd.f32 %v4308_v15, %v582_v16  ;;  %v838_v15 = vld [vmem:[#allocation3 + $0x250] sm:$0xff]  ;;  %v844_v16 = vld [vmem:[#allocation3 + $0x280] sm:$0xff] }
 0x17d   : > { %v6479_v19 = vpack.c.bf16 %v844_v16, %v838_v15  ;;  %v6530_v15 = vpack.c.bf16 %v786_v3, %v780_v2  ;;  %v6534_v16 = vpack.c.bf16 %v799_v10, %v793_v9  ;;  %v828_v9 = vld [vmem:[#allocation3 + $0x200] sm:$0xff]  ;;  %v841_v10 = vld [vmem:[#allocation3 + $0x268] sm:$0xff] }
 0x17e   : > { %4309 = vmatmul.mubr.msk.f32.vlgmr.msra.gmra.mrb[0].mxu1 %vm560_vm0, %v590_v18 }
 0x17f   : > { %5485 = vmatpush3.bf16.msra.mxu1 %v5484_v17  ;;  %4968 = vmatprep.mubr.msk.f32.mxu1 %vm6149_vm1, %v7584_v14  ;;  %v851_v17 = vld [vmem:[#allocation3 + $0x2b8] sm:$0xff] }
 0x180   : > { %5486 = vmatprep.subr.bf16.mxu1 %v7586_v20 }
 0x183   : > { %5488 = vmatpush3.bf16.msra.mxu1 %v5487_v24  ;;  %v6485_v24 = vpack.c.bf16 %v856_v22, %v850_v21  ;;  %v805_v22 = vld [vmem:[#allocation3 + $0x148] sm:$0xff] }
 0x184   : > { %5522 = vmatprep.subr.bf16.mxu1 %v6439_v25  ;;  %v6548_v31 = vpack.c.bf16 %v811_v27, %v805_v22  ;;  %v846_v22 = vld [vmem:[#allocation3 + $0x290] sm:$0xff]  ;;  %v859_v27 = vld [vmem:[#allocation3 + $0x2f8] sm:$0xff] }
 0x186   : > { %4969 = vmatmul.mubr.msk.f32.vlgmr.msra.gmra.mrb[2].mxu1 %vm560_vm0, %v590_v18  ;;  %v857_v18 = vld [vmem:[#allocation3 + $0x2e8] sm:$0xff] }
 0x187   : > { %5524 = vmatpush1.bf16.msra.mxu1 %v6441_v33  ;;  %1027 = vmatprep.mubr.f32.mxu1 %v7584_v14  ;;  %v6482_v4 = vpack.c.bf16 %v857_v18, %v851_v17  ;;  %v792_v17 = vld [vmem:[#allocation3 + $0xe0] sm:$0xff]  ;;  %v798_v18 = vld [vmem:[#allocation3 + $0x110] sm:$0xff] }
 0x188   : > { %5526 = vmatprep.subr.bf16.mxu1 %v6444_v34 }
 0x18b   : > { %5528 = vmatpush1.bf16.msra.mxu1 %v6448_v42 }
 0x18c   : > { %5530 = vmatprep.subr.bf16.mxu1 %v6452_v43 }
 0x18f   : > { %5532 = vmatpush1.bf16.msra.mxu1 %v6455_v51 }
 0x190   : > { %5534 = vmatprep.subr.bf16.mxu1 %v6458_v52 }
 0x193   : > { %5536 = vmatpush1.bf16.msra.mxu1 %v6461_v60 }
 0x194   : > { %5538 = vmatprep.subr.bf16.mxu1 %v6464_v61 }
 0x197   : > { %5540 = vmatpush1.bf16.msra.mxu1 %v6467_v6 }
 0x198   : > { %5542 = vmatprep.subr.bf16.mxu1 %v6470_v7 }
 0x19b   : > { %5544 = vmatpush1.bf16.msra.mxu1 %v6473_v12 }
 0x19c   : > { %5546 = vmatprep.subr.bf16.mxu1 %v6476_v13 }
 0x19f   : > { %5548 = vmatpush1.bf16.msra.mxu1 %v6479_v19 }
 0x1a0   : > { %5550 = vmatprep.subr.bf16.mxu1 %v6482_v4 }
 0x1a3   : > { %5552 = vmatpush1.bf16.msra.mxu1 %v6485_v24 }
 0x1a4   : > { %5586 = vmatprep.subr.bf16.mxu1 %v6368_v23  ;;  %v6505_v23 = vld [vmem:[%s7559_s4] sm:$0x7] }
 0x1a5   : > { %v608_v40 = vrot.slane %v6505_v23, %v6500_v37  ;;  %v612_v48 = vrot.slane %v6505_v23, %v6508_v39 }
 0x251   : > { %v689_v55 = vpop.f32.mrb[0].mxu1 }
 0x252   : > { %v6516_v58 = vadd.f32 %v689_v55, %v608_v40  ;;  %v691_v63 = vpop.f32.mrb[1].mxu1  ;;  %v804_v40 = vld [vmem:[#allocation3 + $0x140] sm:$0xff]  ;;  %v822_v55 = vld [vmem:[#allocation3 + $0x1d0] sm:$0xff] }
 0x253   : > { %v6520_v8 = vadd.f32 %v691_v63, %v612_v48  ;;  %v823_v48 = vld [vmem:[#allocation3 + $0x1d8] sm:$0xff]  ;;  %v5567_v49 = vpack.c.bf16 %v810_v45, %v804_v40  ;;  %v829_v63 = vld [vmem:[#allocation3 + $0x208] sm:$0xff]  ;;  %v5571_v2 = vpack.c.bf16 %v822_v55, %v816_v54  ;;  %v852_v40 = vld [vmem:[#allocation3 + $0x2c0] sm:$0xff] }
 0x254   : > { %957 = vmatmul.mubr.f32.vlgmr.msra.gmra.mrb[0].mxu0 %v6516_v58  ;;  %1028 = vmatmul.mubr.f32.vlgmr.msra.gmra.mrb[4].mxu1 %v6516_v58  ;;  %v858_v45 = vld [vmem:[#allocation3 + $0x2f0] sm:$0xff] }
 0x255   : > { %5556 = vmatpush1.bf16.msra.mxu0 %v6514_v57  ;;  %5588 = vmatpush1.bf16.msra.mxu1 %v6370_v26  ;;  %v6528_v11 = vmul.f32 %v6520_v8, %v6520_v8 }
 0x256   : > { %5558 = vmatprep.subr.bf16.mxu0 %v6518_v0  ;;  %5590 = vmatprep.subr.bf16.mxu1 %v6374_v29  ;;  %v6544_v29 = vpack.c.bf16 %v798_v18, %v792_v17  ;;  %v847_v17 = vld [vmem:[#allocation3 + $0x298] sm:$0xff] }
 0x257   : > { %v1349_v21 = vsel %vm1344_vm2, %v6528_v11, 0.0  ;;  %1098 = vmatprep.mubr.f32.mxu0 %v7584_v14  ;;  %1169 = vmatprep.mubr.f32.mxu1 %v7584_v14  ;;  %v5577_v18 = vpack.c.bf16 %v847_v17, %v841_v10 }
 0x258   : > { %1350 = vadd.xlane.f32.xlu1 %v1349_v21  ;;  %v840_v21 = vld [vmem:[#allocation3 + $0x260] sm:$0xff] }
 0x259   : > { %v6540_v26 = vpop.f32.mrb[2].mxu1  ;;  %5560 = vmatpush1.bf16.msra.mxu0 %v6530_v15  ;;  %5592 = vmatpush1.bf16.msra.mxu1 %v6376_v32  ;;  %v5569_v32 = vpack.c.bf16 %v823_v48, %v817_v46 }
 0x25a   : > { %v4970_v28 = vpop.f32.mrb[3].mxu1  ;;  %5562 = vmatprep.subr.bf16.mxu0 %v6534_v16  ;;  %5594 = vmatprep.subr.bf16.mxu1 %v6379_v35  ;;  %v835_v35 = vld [vmem:[#allocation3 + $0x238] sm:$0xff] }
 0x25b   : > { %v5573_v3 = vpack.c.bf16 %v835_v35, %v829_v63 }
 0x25d   : > { %5564 = vmatpush1.bf16.msra.mxu0 %v6544_v29  ;;  %5596 = vmatpush1.bf16.msra.mxu1 %v6382_v38  ;;  %v834_v38 = vld [vmem:[#allocation3 + $0x230] sm:$0xff] }
 0x25e   : > { %5566 = vmatprep.subr.bf16.mxu0 %v6548_v31  ;;  %5598 = vmatprep.subr.bf16.mxu1 %v6385_v41  ;;  %v5575_v41 = vpack.c.bf16 %v834_v38, %v828_v9 }
 0x261   : > { %5568 = vmatpush1.bf16.msra.mxu0 %v5567_v49  ;;  %5600 = vmatpush1.bf16.msra.mxu1 %v6388_v44  ;;  %v853_v44 = vld [vmem:[#allocation3 + $0x2c8] sm:$0xff] }
 0x262   : > { %5570 = vmatprep.subr.bf16.mxu0 %v5569_v32  ;;  %5602 = vmatprep.subr.bf16.mxu1 %v6391_v47  ;;  %v5579_v47 = vpack.c.bf16 %v846_v22, %v840_v21  ;;  %v5581_v28 = vpack.c.bf16 %v859_v27, %v853_v44 }
 0x265   : > { %5572 = vmatpush1.bf16.msra.mxu0 %v5571_v2  ;;  %5604 = vmatpush1.bf16.msra.mxu1 %v6394_v50  ;;  %v5583_v50 = vpack.c.bf16 %v858_v45, %v852_v40 }
 0x266   : > { %5574 = vmatprep.subr.bf16.mxu0 %v5573_v3  ;;  %5606 = vmatprep.subr.bf16.mxu1 %v6397_v53  ;;  %v860_v53 = vld [vmem:[%s7561_s6] sm:$0x3f] }
 0x269   : > { %5576 = vmatpush1.bf16.msra.mxu0 %v5575_v41  ;;  %5608 = vmatpush1.bf16.msra.mxu1 %v6400_v56  ;;  %v6596_v56 = vsub.s32 3, %v6497_v36 }
 0x26a   : > { %5578 = vmatprep.subr.bf16.mxu0 %v5577_v18  ;;  %5610 = vmatprep.subr.bf16.mxu1 %v6403_v59  ;;  %v6599_v59 = vsub.s32 2, %v6497_v36 }
 0x26b   : > { %7658 = vst [vmem:[#allocation18_spill] sm:$0xff] %v6596_v56 }
 0x26c   : > { %7659 = vst [vmem:[#allocation19_spill] sm:$0xff] %v6599_v59 }
 0x26d   : > { %5580 = vmatpush1.bf16.msra.mxu0 %v5579_v47  ;;  %5612 = vmatpush1.bf16.msra.mxu1 %v6406_v62  ;;  %v865_v62 = vrot.slane %v860_v53, %v6500_v37 }
 0x26e   : > { %5582 = vmatprep.subr.bf16.mxu0 %v5581_v28  ;;  %5614 = vmatprep.subr.bf16.mxu1 %v6409_v1  ;;  %v873_v1 = vrot.slane %v860_v53, %v6599_v59 }
 0x271   : > { %5584 = vmatpush1.bf16.msra.mxu0 %v5583_v50  ;;  %5616 = vmatpush1.bf16.msra.mxu1 %v6412_v5  ;;  %v869_v5 = vrot.slane %v860_v53, %v6508_v39 }
 0x272   : > { %5618 = vmatprep.subr.bf16.mxu0 %v6439_v25  ;;  %5650 = vmatprep.subr.bf16.mxu1 %v6490_v30  ;;  %v6605_v25 = vrot.slane %v860_v53, %v6596_v56 }
 0x274   : > { %1099 = vmatmul.mubr.f32.vlgmr.msra.gmra.mrb[2].mxu0 %v6516_v58  ;;  %1170 = vmatmul.mubr.f32.vlgmr.msra.gmra.mrb[6].mxu1 %v6520_v8 }
 0x275   : > { %5620 = vmatpush1.bf16.msra.mxu0 %v6441_v33  ;;  %5652 = vmatpush1.bf16.msra.mxu1 %v6514_v57 }
 0x276   : > { %5622 = vmatprep.subr.bf16.mxu0 %v6444_v34  ;;  %5654 = vmatprep.subr.bf16.mxu1 %v6518_v0 }
 0x277   : > { %1240 = vmatprep.mubr.f32.mxu0 %v7584_v14  ;;  %1311 = vmatprep.mubr.f32.mxu1 %v7584_v14 }
 0x279   : > { %5624 = vmatpush1.bf16.msra.mxu0 %v6448_v42  ;;  %5656 = vmatpush1.bf16.msra.mxu1 %v6530_v15 }
 0x27a   : > { %5626 = vmatprep.subr.bf16.mxu0 %v6452_v43  ;;  %5658 = vmatprep.subr.bf16.mxu1 %v6534_v16 }
 0x27d   : > { %5628 = vmatpush1.bf16.msra.mxu0 %v6455_v51  ;;  %5660 = vmatpush1.bf16.msra.mxu1 %v6544_v29 }
 0x27e   : > { %5630 = vmatprep.subr.bf16.mxu0 %v6458_v52  ;;  %5662 = vmatprep.subr.bf16.mxu1 %v6548_v31 }
 0x281   : > { %5632 = vmatpush1.bf16.msra.mxu0 %v6461_v60  ;;  %5664 = vmatpush1.bf16.msra.mxu1 %v5567_v49 }
 0x282   : > { %5634 = vmatprep.subr.bf16.mxu0 %v6464_v61  ;;  %5666 = vmatprep.subr.bf16.mxu1 %v5569_v32 }
 0x285   : > { %5636 = vmatpush1.bf16.msra.mxu0 %v6467_v6  ;;  %5668 = vmatpush1.bf16.msra.mxu1 %v5571_v2  ;;  %v6617_v6 = vsub.s32 4, %v6497_v36 }
 0x286   : > { %5638 = vmatprep.subr.bf16.mxu0 %v6470_v7  ;;  %5670 = vmatprep.subr.bf16.mxu1 %v5573_v3  ;;  %v6620_v7 = vsub.s32 5, %v6497_v36  ;;  %v7582_v3 = vmov 1.0  }
 0x287   : > { %7661 = vst [vmem:[#allocation21_spill] sm:$0xff] %v6617_v6 }
 0x288   : > { %7662 = vst [vmem:[#allocation22_spill] sm:$0xff] %v6620_v7 }
 0x289   : > { %5640 = vmatpush1.bf16.msra.mxu0 %v6473_v12  ;;  %5672 = vmatpush1.bf16.msra.mxu1 %v5575_v41  ;;  %v6623_v12 = vrot.slane %v860_v53, %v6617_v6 }
 0x28a   : > { %5642 = vmatprep.subr.bf16.mxu0 %v6476_v13  ;;  %5674 = vmatprep.subr.bf16.mxu1 %v5577_v18 }
 0x28d   : > { %5644 = vmatpush1.bf16.msra.mxu0 %v6479_v19  ;;  %5676 = vmatpush1.bf16.msra.mxu1 %v5579_v47  ;;  %v6626_v19 = vrot.slane %v860_v53, %v6620_v7  ;;  %v6644_v47 = vmul.f32 %v6516_v58, %v6516_v58 }
 0x28e   : > { %5646 = vmatprep.subr.bf16.mxu0 %v6482_v4  ;;  %5678 = vmatprep.subr.bf16.mxu1 %v5581_v28 }
 0x28f   : > { %7665 = vst [vmem:[#allocation25_spill] sm:$0xff] %v6644_v47  ;;  %v1345_v28 = vsel %vm1344_vm2, %v6644_v47, 0.0 }
 0x291   : > { %5648 = vmatpush1.bf16.msra.mxu0 %v6485_v24  ;;  %5680 = vmatpush1.bf16.msra.mxu1 %v5583_v50 }
 0x292   : > { %4971 = vmatprep.subr.mxu0 %v7582_v3 }
 0x294   : > { %1241 = vmatmul.mubr.f32.vlgmr.msra.gmra.mrb[4].mxu0 %v6520_v8  ;;  %1312 = vmatmul.mubr.f32.vlgmr.msra.gmra.mrb[8].mxu1 %v6520_v8 }
 0x295   : > { %4972 = vmatpush3.msra.mxu0 %v7582_v3 }
 0x2e5   : > { %v1351_v13 = vpop.xlane.xlu1 %1350 }
 0x2e6   : > { %v1352_v30 = vmul.f32 0.0625, %v1351_v13 }
 0x327   : > { %v958_v33 = vpop.f32.mrb[0].mxu0  ;;  %v1029_v34 = vpop.f32.mrb[4].mxu1 }
 0x328   : > { %v6607_v42 = vadd.f32 %v958_v33, %v865_v62  ;;  %v6609_v43 = vadd.f32 %v1029_v34, %v873_v1  ;;  %v960_v51 = vpop.f32.mrb[1].mxu0  ;;  %v1031_v52 = vpop.f32.mrb[5].mxu1 }
 0x329   : > { %v6611_v60 = vadd.f32 %v960_v51, %v869_v5  ;;  %v6614_v61 = vadd.f32 %v1031_v52, %v6605_v25 }
 0x32b   : > { %7660 = vst [vmem:[#allocation20_spill] sm:$0xff] %v6614_v61 }
 0x347   : > { %v1100_v4 = vpop.f32.mrb[2].mxu0  ;;  %v1171_v24 = vpop.f32.mrb[6].mxu1 }
 0x348   : > { %v6629_v57 = vadd.f32 %v1100_v4, %v6623_v12  ;;  %v1172_v0 = vadd.f32 %v1171_v24, %v865_v62  ;;  %v1102_v8 = vpop.f32.mrb[3].mxu0  ;;  %v1173_v15 = vpop.f32.mrb[7].mxu1 }
 0x349   : > { %v6632_v16 = vadd.f32 %v1102_v8, %v6626_v19  ;;  %v1174_v29 = vadd.f32 %v1173_v15, %v869_v5 }
 0x34a   : > { %7663 = vst [vmem:[#allocation23_spill] sm:$0xff] %v6629_v57  ;;  %v1375_v31 = vsub.f32 %v1172_v0, %v1352_v30  ;;  %v1353_v0 = vmax.f32 %v6607_v42, %v6611_v60 }
 0x34b   : > { %7664 = vst [vmem:[#allocation24_spill] sm:$0xff] %v6632_v16  ;;  %v1376_v46 = vsub.f32 %v1174_v29, %v1352_v30 }
 0x34c   : > { %v1378_v48 = vadd.f32 0.0001, %v1375_v31  ;;  %v1354_v31 = vmax.f32 %v1353_v0, %v6609_v43 }
 0x34d   : > { %v1379_v49 = vadd.f32 0.0001, %v1376_v46 }
 0x34e   : > { %v1381_v32 = vmul.f32 1.442695, %v1378_v48 }
 0x34f   : > { %v1383_v54 = vmul.f32 1.442695, %v1379_v49 }
 0x350   : > { %6009 = vpow2.f32 %v1381_v32 }
 0x351   : > { %6011 = vpow2.f32 %v1383_v54 }
 0x35a   : > { %v6010_v55 = vpop.eup %6009 }
 0x35b   : > { %v6012_v63 = vpop.eup %6011  ;;  %v1387_v35 = vmul.f32 0.061313935, %v6010_v55 }
 0x35c   : > { %v1388_v2 = vmul.f32 0.061313935, %v6012_v63 }
 0x35d   : > { %1390 = vxpose.xlu1.b32.start.end [1/1] (short) %v1387_v35, 128 }
 0x35e   : > { %1422 = vxpose.xlu0.b32.start.end [1/1] (short) %v1388_v2, 128 }
 0x367   : > { %v1242_v9 = vpop.f32.mrb[4].mxu0  ;;  %v6636_v38 = vpop.f32.mrb[8].mxu1 }
 0x368   : > { %v6638_v10 = vpop.f32.mrb[5].mxu0  ;;  %v6640_v17 = vpop.f32.mrb[9].mxu1  ;;  %v1243_v41 = vadd.f32 %v1242_v9, %v873_v1 }
 0x36a   : > { %v1377_v18 = vsub.f32 %v1243_v41, %v1352_v30 }
 0x36c   : > { %v1380_v21 = vadd.f32 0.0001, %v1377_v18 }
 0x36e   : > { %v1385_v22 = vmul.f32 1.442695, %v1380_v21 }
 0x370   : > { %6013 = vpow2.f32 %v1385_v22 }
 0x37a   : > { %v6014_v44 = vpop.eup %6013 }
 0x37b   : > { %v1389_v27 = vmul.f32 0.061313935, %v6014_v44 }
 0x39b   : > { %1454 = vxpose.xlu0.b32.start.end [1/1] (short) %v1389_v27, 128 }
 0x3c0   : > { %1346 = vadd.xlane.f32.xlu1 %v1345_v28 }
 0x3d1   : > { %2612 = vrot.lane.b32.xlu1 %v6528_v11, %s6151_s21 }
 0x3dd   : > { %v6650_v40 = vpop.trf.xlu1 }
 0x3de   : > { %v6652_v45 = vpop.trf.xlu0  ;;  %4973 = vmatprep.mubr.msk.f32.mxu0 %vm1486_vm3, %v6650_v40 }
 0x3e1   : > { %v6656_v50 = vpop.trf.xlu1 }
 0x3e2   : > { %v6658_v58 = vpop.trf.xlu0  ;;  %4974 = vmatmul.mubr.msk.f32.vlgmr.msra.gmra.mrb[6].mxu0 %vm1486_vm3, %v6656_v50 }
 0x3e5   : > { %v6662_v53 = vpop.trf.xlu1 }
 0x3e6   : > { %v6664_v62 = vpop.trf.xlu0  ;;  %4976 = vmatprep.mubr.msk.f32.mxu0 %vm1486_vm3, %v6662_v53 }
 0x3e9   : > { %v6668_v11 = vpop.trf.xlu1 }
 0x3ea   : > { %v6670_v1 = vpop.trf.xlu0  ;;  %4977 = vmatmul.mubr.msk.f32.gmra.mrb[8].mxu0 %vm1486_vm3, %v6668_v11 }
 0x3ed   : > { %v6674_v5 = vpop.trf.xlu1 }
 0x3ee   : > { %v6676_v33 = vpop.trf.xlu0  ;;  %4979 = vmatprep.mubr.msk.f32.mxu0 %vm1486_vm3, %v6674_v5 }
 0x3f1   : > { %v6680_v34 = vpop.trf.xlu1 }
 0x3f2   : > { %v6682_v51 = vpop.trf.xlu0  ;;  %4980 = vmatmul.mubr.msk.f32.gmra.mrb[10].mxu0 %vm1486_vm3, %v6680_v34 }
 0x3f5   : > { %v6686_v52 = vpop.trf.xlu1 }
 0x3f6   : > { %v6688_v13 = vpop.trf.xlu0  ;;  %4982 = vmatprep.mubr.msk.f32.mxu0 %vm1486_vm3, %v6686_v52 }
 0x3f9   : > { %v6692_v4 = vpop.trf.xlu1 }
 0x3fa   : > { %v6694_v24 = vpop.trf.xlu0  ;;  %4983 = vmatmul.mubr.msk.f32.gmra.mrb[12].mxu0 %vm1486_vm3, %v6692_v4 }
 0x3fd   : > { %v6698_v30 = vpop.trf.xlu1 }
 0x3fe   : > { %v6702_v8 = vpop.trf.xlu0  ;;  %4985 = vmatprep.mubr.msk.f32.mxu0 %vm1486_vm3, %v6698_v30 }
 0x401   : > { %v6706_v15 = vpop.trf.xlu1 }
 0x402   : > { %v6708_v29 = vpop.trf.xlu0  ;;  %4986 = vmatmul.mubr.msk.f32.gmra.mrb[14].mxu0 %vm1486_vm3, %v6706_v15 }
 0x404   : > { %1355 = vmax.xlane.f32.xlu0 %v1354_v31 }
 0x405   : > { %v6713_v46 = vpop.trf.xlu1 }
 0x406   : > { %v6715_v48 = vpop.trf.xlu0  ;;  %4988 = vmatprep.mubr.msk.f32.mxu0 %vm1486_vm3, %v6713_v46 }
 0x409   : > { %v6719_v49 = vpop.trf.xlu1 }
 0x40a   : > { %v6721_v32 = vpop.trf.xlu0  ;;  %4989 = vmatmul.mubr.msk.f32.gmra.mrb[16].mxu0 %vm1486_vm3, %v6719_v49 }
 0x40d   : > { %v6725_v54 = vpop.trf.xlu1 }
 0x40e   : > { %v6727_v55 = vpop.trf.xlu0  ;;  %4991 = vmatprep.mubr.msk.f32.mxu0 %vm1486_vm3, %v6725_v54 }
 0x411   : > { %v6731_v63 = vpop.trf.xlu1 }
 0x412   : > { %v6733_v35 = vpop.trf.xlu0  ;;  %4992 = vmatmul.mubr.msk.f32.gmra.mrb[18].mxu0 %vm1486_vm3, %v6731_v63 }
 0x415   : > { %v6737_v2 = vpop.trf.xlu1 }
 0x416   : > { %v6739_v9 = vpop.trf.xlu0  ;;  %4994 = vmatprep.mubr.msk.f32.mxu0 %vm1486_vm3, %v6737_v2 }
 0x417   : > { %7666 = vst [vmem:[#allocation26_spill] sm:$0xff] %v6739_v9 }
 0x419   : > { %v6743_v41 = vpop.trf.xlu1 }
 0x41a   : > { %v6745_v18 = vpop.trf.xlu0  ;;  %4995 = vmatmul.mubr.msk.f32.gmra.mrb[20].mxu0 %vm1486_vm3, %v6743_v41 }
 0x41b   : > { %7667 = vst [vmem:[#allocation27_spill] sm:$0xff] %v6745_v18  ;;  %4997 = vmatprep.mubr.msk.f32.mxu0 %vm1486_vm3, %v6652_v45 }
 0x41e   : > { %4998 = vmatmul.mubr.msk.f32.gmra.mrb[22].mxu0 %vm1486_vm3, %v6658_v58  ;;  %v6753_v21 = vpop.trf.xlu0 }
 0x41f   : > { %7668 = vst [vmem:[#allocation28_spill] sm:$0xff] %v6753_v21  ;;  %5000 = vmatprep.mubr.msk.f32.mxu0 %vm1486_vm3, %v6664_v62 }
 0x422   : > { %5001 = vmatmul.mubr.msk.f32.gmra.mrb[24].mxu0 %vm1486_vm3, %v6670_v1  ;;  %v6759_v22 = vpop.trf.xlu0 }
 0x423   : > { %7669 = vst [vmem:[#allocation29_spill] sm:$0xff] %v6759_v22  ;;  %5003 = vmatprep.mubr.msk.f32.mxu0 %vm1486_vm3, %v6676_v33 }
 0x426   : > { %5004 = vmatmul.mubr.msk.f32.gmra.mrb[26].mxu0 %vm1486_vm3, %v6682_v51  ;;  %v6765_v44 = vpop.trf.xlu0 }
 0x427   : > { %7670 = vst [vmem:[#allocation30_spill] sm:$0xff] %v6765_v44  ;;  %5006 = vmatprep.mubr.msk.f32.mxu0 %vm1486_vm3, %v6688_v13 }
 0x42a   : > { %5007 = vmatmul.mubr.msk.f32.gmra.mrb[28].mxu0 %vm1486_vm3, %v6694_v24  ;;  %v6771_v27 = vpop.trf.xlu0 }
 0x42b   : > { %7671 = vst [vmem:[#allocation31_spill] sm:$0xff] %v6771_v27  ;;  %5009 = vmatprep.mubr.msk.f32.mxu0 %vm1486_vm3, %v6702_v8 }
 0x42e   : > { %5010 = vmatmul.mubr.msk.f32.gmra.mrb[30].mxu0 %vm1486_vm3, %v6708_v29  ;;  %v6777_v28 = vpop.trf.xlu0 }
 0x42f   : > { %7672 = vst [vmem:[#allocation32_spill] sm:$0xff] %v6777_v28  ;;  %5012 = vmatprep.mubr.msk.f32.mxu0 %vm1486_vm3, %v6715_v48 }
 0x432   : > { %5013 = vmatmul.mubr.msk.f32.gmra.mrb[32].mxu0 %vm1486_vm3, %v6721_v32  ;;  %v6783_v0 = vpop.trf.xlu0 }
 0x433   : > { %7673 = vst [vmem:[#allocation33_spill] sm:$0xff] %v6783_v0  ;;  %5015 = vmatprep.mubr.msk.f32.mxu0 %vm1486_vm3, %v6727_v55 }
 0x436   : > { %5016 = vmatmul.mubr.msk.f32.gmra.mrb[34].mxu0 %vm1486_vm3, %v6733_v35  ;;  %v6789_v31 = vpop.trf.xlu0 }
 0x437   : > { %7674 = vst [vmem:[#allocation34_spill] sm:$0xff] %v6789_v31  ;;  %5018 = vmatprep.mubr.msk.f32.mxu0 %vm1486_vm3, %v6739_v9 }
 0x43a   : > { %5019 = vmatmul.mubr.msk.f32.gmra.mrb[36].mxu0 %vm1486_vm3, %v6745_v18  ;;  %v6795_v3 = vpop.trf.xlu0 }
 0x43b   : > { %7675 = vst [vmem:[#allocation35_spill] sm:$0xff] %v6795_v3  ;;  %5021 = vmatprep.mubr.msk.f32.mxu0 %vm1486_vm3, %v6753_v21 }
 0x43e   : > { %5022 = vmatmul.mubr.msk.f32.gmra.mrb[38].mxu0 %vm1486_vm3, %v6759_v22  ;;  %v6801_v14 = vpop.trf.xlu0 }
 0x43f   : > { %7676 = vst [vmem:[#allocation36_spill] sm:$0xff] %v6801_v14  ;;  %5024 = vmatprep.mubr.msk.f32.mxu0 %vm1486_vm3, %v6765_v44 }
 0x442   : > { %5025 = vmatmul.mubr.msk.f32.gmra.mrb[40].mxu0 %vm1486_vm3, %v6771_v27  ;;  %v6807_v20 = vpop.trf.xlu0 }
 0x443   : > { %7677 = vst [vmem:[#allocation37_spill] sm:$0xff] %v6807_v20  ;;  %5027 = vmatprep.mubr.msk.f32.mxu0 %vm1486_vm3, %v6777_v28 }
 0x446   : > { %5028 = vmatmul.mubr.msk.f32.gmra.mrb[42].mxu0 %vm1486_vm3, %v6783_v0  ;;  %v6813_v7 = vpop.trf.xlu0 }
 0x447   : > { %7678 = vst [vmem:[#allocation38_spill] sm:$0xff] %v6813_v7  ;;  %5030 = vmatprep.mubr.msk.f32.mxu0 %vm1486_vm3, %v6789_v31 }
 0x44a   : > { %5031 = vmatmul.mubr.msk.f32.gmra.mrb[44].mxu0 %vm1486_vm3, %v6795_v3  ;;  %v6819_v36 = vpop.trf.xlu0 }
 0x44b   : > { %7679 = vst [vmem:[#allocation39_spill] sm:$0xff] %v6819_v36  ;;  %5033 = vmatprep.mubr.msk.f32.mxu0 %vm1486_vm3, %v6801_v14 }
 0x44d   : > { %v1347_v6 = vpop.xlane.xlu1 %1346 }
 0x44e   : > { %5034 = vmatmul.mubr.msk.f32.gmra.mrb[46].mxu0 %vm1486_vm3, %v6807_v20  ;;  %v6825_v56 = vpop.trf.xlu0  ;;  %v6846_v47 = vmul.f32 0.0625, %v1347_v6 }
 0x44f   : > { %7680 = vst [vmem:[#allocation40_spill] sm:$0xff] %v6825_v56  ;;  %5036 = vmatprep.mubr.msk.f32.mxu0 %vm1486_vm3, %v6813_v7 }
 0x451   : > { %v2613_v39 = vpop.permute.xlu1 %2612 }
 0x452   : > { %5037 = vmatmul.mubr.msk.f32.gmra.mrb[48].mxu0 %vm1486_vm3, %v6819_v36  ;;  %v6831_v37 = vpop.trf.xlu0  ;;  %v2615_v16 = vsel %vm1344_vm2, %v2613_v39, 0.0  ;;  %v1358_v39 = vsub.f32 %v6611_v60, %v6846_v47 }
 0x453   : > { %7681 = vst [vmem:[#allocation41_spill] sm:$0xff] %v6831_v37  ;;  %2616 = vadd.xlane.f32.xlu1 %v2615_v16  ;;  %5039 = vmatprep.mubr.msk.f32.mxu0 %vm1486_vm3, %v6825_v56 }
 0x456   : > { %5040 = vmatmul.mubr.msk.f32.gmra.mrb[50].mxu0 %vm1486_vm3, %v6831_v37  ;;  %v6838_v61 = vpop.trf.xlu0 }
 0x457   : > { %7682 = vst [vmem:[#allocation42_spill] sm:$0xff] %v6838_v61  ;;  %5042 = vmatprep.mubr.msk.f32.mxu0 %vm1486_vm3, %v6838_v61 }
 0x45a   : > { %v6842_v57 = vpop.trf.xlu0 }
 0x45b   : > { %7683 = vst [vmem:[#allocation43_spill] sm:$0xff] %v6842_v57  ;;  %5043 = vmatmul.mubr.msk.f32.gmra.mrb[52].mxu0 %vm1486_vm3, %v6842_v57 }
 0x491   : > { %v6850_v16 = vpop.xlane.xlu0 %1355 }
 0x492   : > { %v1361_v56 = vsub.f32 %v1358_v39, %v6850_v16 }
 0x494   : > { %v1365_v37 = vmul.f32 1.442695, %v1361_v56 }
 0x496   : > { %6015 = vpow2.f32 %v1365_v37 }
 0x4a0   : > { %v6016_v36 = vpop.eup %6015 }
 0x4a1   : > { %v1370_v7 = vadd.f32 0.0001, %v6016_v36 }
 0x4a3   : > { %v1373_v20 = vmul.f32 0.061313935, %v1370_v7 }
 0x4a5   : > { %2000 = vmatprep.mubr.f32.mxu1 %v1373_v20  ;;  %2447 = vmatprep.mubr.f32.mxu0 %v1373_v20  ;;  %v6855_v20 = vadd.f32 %v6636_v38, %v6623_v12 }
 0x4b5   : > { %v4975_v61 = vpop.f32.mrb[6].mxu0 }
 0x4b6   : > { %v1697_v14 = vpop.f32.mrb[7].mxu0 }
 0x4b7   : > { %v5683_v3 = vpack.c.bf16 %v4975_v61, %v1697_v14  ;;  %v1245_v14 = vadd.f32 %v6638_v10, %v6605_v25 }
 0x4bd   : > { %v4978_v57 = vpop.f32.mrb[8].mxu0 }
 0x4be   : > { %v1707_v6 = vpop.f32.mrb[9].mxu0 }
 0x4bf   : > { %v5687_v31 = vpack.c.bf16 %v4978_v57, %v1707_v6 }
 0x4c5   : > { %v4981_v0 = vpop.f32.mrb[10].mxu0 }
 0x4c6   : > { %v1717_v28 = vpop.f32.mrb[11].mxu0 }
 0x4c7   : > { %v5691_v60 = vpack.c.bf16 %v4981_v0, %v1717_v28 }
 0x4cd   : > { %v4984_v27 = vpop.f32.mrb[12].mxu0 }
 0x4ce   : > { %v1727_v44 = vpop.f32.mrb[13].mxu0 }
 0x4cf   : > { %v5695_v22 = vpack.c.bf16 %v4984_v27, %v1727_v44 }
 0x4d5   : > { %v4987_v39 = vpop.f32.mrb[14].mxu0 }
 0x4d6   : > { %v1737_v56 = vpop.f32.mrb[15].mxu0 }
 0x4d7   : > { %v5699_v37 = vpack.c.bf16 %v4987_v39, %v1737_v56 }
 0x4dd   : > { %v4990_v21 = vpop.f32.mrb[16].mxu0 }
 0x4de   : > { %v1747_v36 = vpop.f32.mrb[17].mxu0 }
 0x4df   : > { %v5703_v7 = vpack.c.bf16 %v4990_v21, %v1747_v36 }
 0x4e0   : > { %v2617_v18 = vpop.xlane.xlu1 %2616 }
 0x4e1   : > { %v6859_v61 = vmul.f32 0.0625, %v2617_v18 }
 0x4e3   : > { %v2641_v57 = vsub.f32 %v1245_v14, %v6859_v61 }
 0x4e5   : > { %v2644_v27 = vadd.f32 0.0001, %v2641_v57  ;;  %v4993_v28 = vpop.f32.mrb[18].mxu0  ;;  %v1357_v57 = vsub.f32 %v6607_v42, %v6846_v47 }
 0x4e6   : > { %v1757_v6 = vpop.f32.mrb[19].mxu0 }
 0x4e7   : > { %v2647_v0 = vmul.f32 1.442695, %v2644_v27  ;;  %v5707_v21 = vpack.c.bf16 %v4993_v28, %v1757_v6  ;;  %v1360_v28 = vsub.f32 %v1357_v57, %v6850_v16 }
 0x4e9   : > { %6017 = vpow2.f32 %v2647_v0 }
 0x4ed   : > { %v4996_v39 = vpop.f32.mrb[20].mxu0 }
 0x4ee   : > { %v1767_v56 = vpop.f32.mrb[21].mxu0 }
 0x4ef   : > { %v5711_v12 = vpack.c.bf16 %v4996_v39, %v1767_v56  ;;  %v1363_v56 = vmul.f32 1.442695, %v1360_v28 }
 0x4f1   : > { %v4999_v38 = vpop.f32.mrb[22].mxu0  ;;  %6019 = vpow2.f32 %v1363_v56 }
 0x4f2   : > { %v1777_v36 = vpop.f32.mrb[23].mxu0 }
 0x4f3   : > { %v6018_v9 = vpop.eup %6017  ;;  %v5681_v25 = vpack.c.bf16 %v4999_v38, %v1777_v36 }
 0x4f4   : > { %v2653_v10 = vmul.f32 0.061313935, %v6018_v9 }
 0x4f5   : > { %v5002_v18 = vpop.f32.mrb[24].mxu0  ;;  %5682 = vmatprep.subr.bf16.mxu1 %v5681_v25 }
 0x4f6   : > { %v1787_v14 = vpop.f32.mrb[25].mxu0  ;;  %5684 = vmatpush3.bf16.msra.mxu1 %v5683_v3  ;;  %2656 = vxpose.xlu0.b32.start.end [1/1] (short) %v2653_v10, 128 }
 0x4f7   : > { %v5685_v44 = vpack.c.bf16 %v5002_v18, %v1787_v14 }
 0x4f9   : > { %v5005_v27 = vpop.f32.mrb[26].mxu0  ;;  %5686 = vmatprep.subr.bf16.mxu1 %v5685_v44 }
 0x4fa   : > { %v1797_v0 = vpop.f32.mrb[27].mxu0  ;;  %5688 = vmatpush3.bf16.msra.mxu1 %v5687_v31 }
 0x4fb   : > { %v5689_v6 = vpack.c.bf16 %v5005_v27, %v1797_v0  ;;  %v6020_v57 = vpop.eup %6019 }
 0x4fc   : > { %v1369_v28 = vadd.f32 0.0001, %v6020_v57 }
 0x4fd   : > { %v5008_v39 = vpop.f32.mrb[28].mxu0  ;;  %5690 = vmatprep.subr.bf16.mxu1 %v5689_v6 }
 0x4fe   : > { %v1807_v9 = vpop.f32.mrb[29].mxu0  ;;  %5692 = vmatpush3.bf16.msra.mxu1 %v5691_v60  ;;  %v6867_v56 = vmul.f32 0.061313935, %v1369_v28 }
 0x4ff   : > { %v5693_v38 = vpack.c.bf16 %v5008_v39, %v1807_v9 }
 0x501   : > { %v5011_v36 = vpop.f32.mrb[30].mxu0  ;;  %5694 = vmatprep.subr.bf16.mxu1 %v5693_v38 }
 0x502   : > { %v1817_v3 = vpop.f32.mrb[31].mxu0  ;;  %5696 = vmatpush3.bf16.msra.mxu1 %v5695_v22 }
 0x503   : > { %v5697_v25 = vpack.c.bf16 %v5011_v36, %v1817_v3 }
 0x505   : > { %v5014_v42 = vpop.f32.mrb[32].mxu0  ;;  %5698 = vmatprep.subr.bf16.mxu1 %v5697_v25 }
 0x506   : > { %v1827_v44 = vpop.f32.mrb[33].mxu0  ;;  %5700 = vmatpush3.bf16.msra.mxu1 %v5699_v37  ;;  %v7684_v37 = vmov 0.0|0.0  }
 0x507   : > { %v5701_v10 = vpack.c.bf16 %v5014_v42, %v1827_v44 }
 0x509   : > { %v5017_v18 = vpop.f32.mrb[34].mxu0  ;;  %5702 = vmatprep.subr.bf16.mxu1 %v5701_v10 }
 0x50a   : > { %v1837_v31 = vpop.f32.mrb[35].mxu0  ;;  %5704 = vmatpush3.bf16.msra.mxu1 %v5703_v7  ;;  %v1316_v7 = vadd.f32 %v6640_v17, %v6626_v19 }
 0x50b   : > { %v5705_v14 = vpack.c.bf16 %v5017_v18, %v1837_v31 }
 0x50c   : > { %v2643_v3 = vsub.f32 %v1316_v7, %v6859_v61 }
 0x50d   : > { %v5020_v27 = vpop.f32.mrb[36].mxu0  ;;  %5706 = vmatprep.subr.bf16.mxu1 %v5705_v14 }
 0x50e   : > { %v1847_v60 = vpop.f32.mrb[37].mxu0  ;;  %5708 = vmatpush3.bf16.msra.mxu1 %v5707_v21  ;;  %v7685_v21 = vmov 0.0   ;;  %v2646_v19 = vadd.f32 0.0001, %v2643_v3 }
 0x50f   : > { %v5709_v0 = vpack.c.bf16 %v5020_v27, %v1847_v60 }
 0x510   : > { %v2651_v57 = vmul.f32 1.442695, %v2646_v19 }
 0x511   : > { %v5023_v6 = vpop.f32.mrb[38].mxu0  ;;  %5710 = vmatprep.subr.bf16.mxu1 %v5709_v0 }
 0x512   : > { %v1857_v22 = vpop.f32.mrb[39].mxu0  ;;  %5712 = vmatpush3.bf16.msra.mxu1 %v5711_v12  ;;  %v1359_v12 = vsub.f32 %v6609_v43, %v6846_v47 }
 0x513   : > { %v5714_v39 = vpack.c.bf16 %v5023_v6, %v1857_v22  ;;  %5713 = vmatprep.subr.bf16.mxu1 %v7684_v37 }
 0x514   : > { %v1362_v42 = vsub.f32 %v1359_v12, %v6850_v16 }
 0x515   : > { %v5026_v9 = vpop.f32.mrb[40].mxu0  ;;  %2001 = vmatmul.mubr.f32.vlgmr.msra.gmra.mrb[10].mxu1 %v6867_v56 }
 0x516   : > { %v1867_v38 = vpop.f32.mrb[41].mxu0  ;;  %5715 = vmatpush3.bf16.msra.mxu1 %v5714_v39  ;;  %5077 = vmatprep.mubr.msk.f32.mxu1 %vm6149_vm1, %v7685_v21  ;;  %v1367_v18 = vmul.f32 1.442695, %v1362_v42 }
 0x517   : > { %v5717_v36 = vpack.c.bf16 %v5026_v9, %v1867_v38  ;;  %5716 = vmatprep.subr.bf16.mxu1 %v7684_v37  ;;  %v616_v9 = vrot.slane %v6505_v23, %v6599_v59  ;;  %v7686_v23 = vld [vmem:[#allocation26_spill] sm:$0xff] }
 0x518   : > { %6021 = vpow2.f32 %v1367_v18 }
 0x519   : > { %v5029_v25 = vpop.f32.mrb[42].mxu0  ;;  %6023 = vpow2.f32 %v2651_v57 }
 0x51a   : > { %v1877_v44 = vpop.f32.mrb[43].mxu0  ;;  %5718 = vmatpush3.bf16.msra.mxu1 %v5717_v36 }
 0x51b   : > { %v5720_v10 = vpack.c.bf16 %v5029_v25, %v1877_v44  ;;  %5719 = vmatprep.subr.bf16.mxu1 %v7684_v37  ;;  %v6889_v25 = vadd.f32 %v6540_v26, %v616_v9  ;;  %v7687_v26 = vld [vmem:[#allocation27_spill] sm:$0xff] }
 0x51d   : > { %v5032_v17 = vpop.f32.mrb[44].mxu0 }
 0x51e   : > { %v1887_v31 = vpop.f32.mrb[45].mxu0  ;;  %5721 = vmatpush3.bf16.msra.mxu1 %v5720_v10 }
 0x51f   : > { %v5723_v14 = vpack.c.bf16 %v5032_v17, %v1887_v31  ;;  %5722 = vmatprep.subr.bf16.mxu1 %v7684_v37 }
 0x521   : > { %v5035_v43 = vpop.f32.mrb[46].mxu0 }
 0x522   : > { %v1897_v47 = vpop.f32.mrb[47].mxu0  ;;  %5724 = vmatpush3.bf16.msra.mxu1 %v5723_v14  ;;  %v6022_v39 = vpop.eup %6021 }
 0x523   : > { %v5726_v27 = vpack.c.bf16 %v5035_v43, %v1897_v47  ;;  %5725 = vmatprep.subr.bf16.mxu1 %v7684_v37  ;;  %v6024_v7 = vpop.eup %6023  ;;  %v1371_v36 = vadd.f32 0.0001, %v6022_v39  ;;  %v7704_v39 = vsub.f32 %v6855_v20, %v6859_v61 }
 0x524   : > { %v2655_v42 = vmul.f32 0.061313935, %v6024_v7 }
 0x525   : > { %v5038_v16 = vpop.f32.mrb[48].mxu0  ;;  %v6892_v44 = vmul.f32 0.061313935, %v1371_v36  ;;  %v2645_v9 = vadd.f32 0.0001, %v7704_v39  ;;  %v1322_v39 = vld [vmem:[%s7562_s7 + $0x10] sm:$0xff] }
 0x526   : > { %v1907_v60 = vpop.f32.mrb[49].mxu0  ;;  %5727 = vmatpush3.bf16.msra.mxu1 %v5726_v27 }
 0x527   : > { %v5729_v28 = vpack.c.bf16 %v5038_v16, %v1907_v60  ;;  %5728 = vmatprep.subr.bf16.mxu1 %v7684_v37 }
 0x529   : > { %v5041_v0 = vpop.f32.mrb[50].mxu0 }
 0x52a   : > { %v1917_v6 = vpop.f32.mrb[51].mxu0  ;;  %5730 = vmatpush3.bf16.msra.mxu1 %v5729_v28 }
 0x52b   : > { %v5732_v22 = vpack.c.bf16 %v5041_v0, %v1917_v6  ;;  %5731 = vmatprep.subr.bf16.mxu1 %v7684_v37 }
 0x52e   : > { %v5044_v38 = vpop.f32.mrb[52].mxu0  ;;  %5733 = vmatpush3.bf16.msra.mxu1 %v5732_v22 }
 0x52f   : > { %v1927_v12 = vpop.f32.mrb[53].mxu0  ;;  %5734 = vmatprep.subr.bf16.mxu1 %v7684_v37 }
 0x530   : > { %v5735_v3 = vpack.c.bf16 %v5044_v38, %v1927_v12  ;;  %v2649_v12 = vmul.f32 1.442695, %v2645_v9 }
 0x532   : > { %5736 = vmatpush3.bf16.msra.mxu1 %v5735_v3 }
 0x533   : > { %2720 = vxpose.xlu0.b32.start.end [1/1] (short) %v2655_v42, 128  ;;  %5080 = vmatprep.subr.mxu1 %v6889_v25 }
 0x535   : > { %5078 = vmatmul.mubr.f32.vlgmr.msra.gmra.mrb[12].mxu1 %v6892_v44 }
 0x536   : > { %5081 = vmatpush3.msra.mxu1 %v6889_v25  ;;  %5082 = vmatprep.mubr.msk.f32.mxu1 %vm1486_vm3, %v6650_v40  ;;  %v7688_v40 = vld [vmem:[#allocation28_spill] sm:$0xff] }
 0x539   : > { %5083 = vmatmul.mubr.msk.f32.vlgmr.msra.gmra.mrb[14].mxu1 %vm1486_vm3, %v6656_v50  ;;  %v7690_v50 = vld [vmem:[#allocation30_spill] sm:$0xff] }
 0x53a   : > { %5085 = vmatprep.mubr.msk.f32.mxu1 %vm1486_vm3, %v6662_v53  ;;  %v7692_v53 = vld [vmem:[#allocation32_spill] sm:$0xff] }
 0x53d   : > { %5086 = vmatmul.mubr.msk.f32.gmra.mrb[16].mxu1 %vm1486_vm3, %v6668_v11  ;;  %v7694_v11 = vld [vmem:[#allocation34_spill] sm:$0xff] }
 0x53e   : > { %5088 = vmatprep.mubr.msk.f32.mxu1 %vm1486_vm3, %v6674_v5  ;;  %v7696_v5 = vld [vmem:[#allocation36_spill] sm:$0xff] }
 0x541   : > { %5089 = vmatmul.mubr.msk.f32.gmra.mrb[18].mxu1 %vm1486_vm3, %v6680_v34  ;;  %v7698_v34 = vld [vmem:[#allocation38_spill] sm:$0xff] }
 0x542   : > { %5091 = vmatprep.mubr.msk.f32.mxu1 %vm1486_vm3, %v6686_v52  ;;  %v7700_v52 = vld [vmem:[#allocation40_spill] sm:$0xff] }
 0x545   : > { %5092 = vmatmul.mubr.msk.f32.gmra.mrb[20].mxu1 %vm1486_vm3, %v6692_v4  ;;  %v7702_v4 = vld [vmem:[#allocation42_spill] sm:$0xff] }
 0x546   : > { %5094 = vmatprep.mubr.msk.f32.mxu1 %vm1486_vm3, %v6698_v30  ;;  %v6152_v30 = vmov 0  }
 0x547   : > { %6005 = vset.pattern.permute.xlu1 %v6152_v30 }
 0x549   : > { %5095 = vmatmul.mubr.msk.f32.gmra.mrb[22].mxu1 %vm1486_vm3, %v6706_v15 }
 0x54a   : > { %5097 = vmatprep.mubr.msk.f32.mxu1 %vm1486_vm3, %v6713_v46 }
 0x54d   : > { %5098 = vmatmul.mubr.msk.f32.gmra.mrb[24].mxu1 %vm1486_vm3, %v6719_v49 }
 0x54e   : > { %5100 = vmatprep.mubr.msk.f32.mxu1 %vm1486_vm3, %v6725_v54 }
 0x551   : > { %5101 = vmatmul.mubr.msk.f32.gmra.mrb[26].mxu1 %vm1486_vm3, %v6731_v63 }
 0x552   : > { %5103 = vmatprep.mubr.msk.f32.mxu1 %vm1486_vm3, %v6737_v2 }
 0x555   : > { %5104 = vmatmul.mubr.msk.f32.gmra.mrb[28].mxu1 %vm1486_vm3, %v6743_v41 }
 0x556   : > { %5106 = vmatprep.mubr.msk.f32.mxu1 %vm1486_vm3, %v6652_v45  ;;  %v7689_v45 = vld [vmem:[#allocation29_spill] sm:$0xff] }
 0x559   : > { %5107 = vmatmul.mubr.msk.f32.gmra.mrb[30].mxu1 %vm1486_vm3, %v6658_v58  ;;  %v7691_v58 = vld [vmem:[#allocation31_spill] sm:$0xff] }
 0x55a   : > { %5109 = vmatprep.mubr.msk.f32.mxu1 %vm1486_vm3, %v6664_v62  ;;  %v7693_v62 = vld [vmem:[#allocation33_spill] sm:$0xff] }
 0x55c   : > { %6006 = vset.pattern.permute.xlu0 %v6152_v30 }
 0x55d   : > { %5110 = vmatmul.mubr.msk.f32.gmra.mrb[32].mxu1 %vm1486_vm3, %v6670_v1  ;;  %v7695_v1 = vld [vmem:[#allocation35_spill] sm:$0xff] }
 0x55e   : > { %5112 = vmatprep.mubr.msk.f32.mxu1 %vm1486_vm3, %v6676_v33  ;;  %v7697_v33 = vld [vmem:[#allocation37_spill] sm:$0xff] }
 0x561   : > { %5113 = vmatmul.mubr.msk.f32.gmra.mrb[34].mxu1 %vm1486_vm3, %v6682_v51  ;;  %v7699_v51 = vld [vmem:[#allocation39_spill] sm:$0xff] }
 0x562   : > { %5115 = vmatprep.mubr.msk.f32.mxu1 %vm1486_vm3, %v6688_v13  ;;  %v7701_v13 = vld [vmem:[#allocation41_spill] sm:$0xff] }
 0x565   : > { %5116 = vmatmul.mubr.msk.f32.gmra.mrb[36].mxu1 %vm1486_vm3, %v6694_v24  ;;  %v7703_v24 = vld [vmem:[#allocation43_spill] sm:$0xff] }
 0x566   : > { %5118 = vmatprep.mubr.msk.f32.mxu1 %vm1486_vm3, %v6702_v8 }
 0x569   : > { %5119 = vmatmul.mubr.msk.f32.gmra.mrb[38].mxu1 %vm1486_vm3, %v6708_v29 }
 0x56a   : > { %5121 = vmatprep.mubr.msk.f32.mxu1 %vm1486_vm3, %v6715_v48 }
 0x56d   : > { %5122 = vmatmul.mubr.msk.f32.gmra.mrb[40].mxu1 %vm1486_vm3, %v6721_v32 }
 0x56e   : > { %5124 = vmatprep.mubr.msk.f32.mxu1 %vm1486_vm3, %v6727_v55 }
 0x571   : > { %5125 = vmatmul.mubr.msk.f32.gmra.mrb[42].mxu1 %vm1486_vm3, %v6733_v35 }
 0x572   : > { %5127 = vmatprep.mubr.msk.f32.mxu1 %vm1486_vm3, %v7686_v23 }
 0x575   : > { %5128 = vmatmul.mubr.msk.f32.gmra.mrb[44].mxu1 %vm1486_vm3, %v7687_v26 }
 0x576   : > { %5130 = vmatprep.mubr.msk.f32.mxu1 %vm1486_vm3, %v7688_v40 }
 0x579   : > { %5131 = vmatmul.mubr.msk.f32.gmra.mrb[46].mxu1 %vm1486_vm3, %v7689_v45 }
 0x57a   : > { %5133 = vmatprep.mubr.msk.f32.mxu1 %vm1486_vm3, %v7690_v50 }
 0x57d   : > { %5134 = vmatmul.mubr.msk.f32.gmra.mrb[48].mxu1 %vm1486_vm3, %v7691_v58 }
 0x57e   : > { %5136 = vmatprep.mubr.msk.f32.mxu1 %vm1486_vm3, %v7692_v53 }
 0x581   : > { %5137 = vmatmul.mubr.msk.f32.gmra.mrb[50].mxu1 %vm1486_vm3, %v7693_v62 }
 0x582   : > { %5139 = vmatprep.mubr.msk.f32.mxu1 %vm1486_vm3, %v7694_v11 }
 0x585   : > { %5140 = vmatmul.mubr.msk.f32.gmra.mrb[52].mxu1 %vm1486_vm3, %v7695_v1 }
 0x586   : > { %5142 = vmatprep.mubr.msk.f32.mxu1 %vm1486_vm3, %v7696_v5 }
 0x589   : > { %5143 = vmatmul.mubr.msk.f32.gmra.mrb[54].mxu1 %vm1486_vm3, %v7697_v33 }
 0x58a   : > { %5145 = vmatprep.mubr.msk.f32.mxu1 %vm1486_vm3, %v7698_v34 }
 0x58d   : > { %5146 = vmatmul.mubr.msk.f32.gmra.mrb[56].mxu1 %vm1486_vm3, %v7699_v51 }
 0x58e   : > { %5148 = vmatprep.mubr.msk.f32.mxu1 %vm1486_vm3, %v7700_v52 }
 0x591   : > { %5149 = vmatmul.mubr.msk.f32.gmra.mrb[58].mxu1 %vm1486_vm3, %v7701_v13 }
 0x592   : > { %5151 = vmatprep.mubr.msk.f32.mxu1 %vm1486_vm3, %v7702_v4 }
 0x595   : > { %5152 = vmatmul.mubr.msk.f32.gmra.mrb[60].mxu1 %vm1486_vm3, %v7703_v24 }
 0x5e8   : > { %v4605_v8 = vpop.f32.mrb[10].mxu1 }
 0x5e9   : > { %v4606_v15 = vpop.f32.mrb[11].mxu1 }
 0x5ea   : > { %v4607_v29 = vadd.f32 %v4606_v15, %v4605_v8 }
 0x5ec   : > { %v2003_v46 = vadd.f32 1e-08, %v4607_v29 }
 0x608   : > { %v2072_v48 = vpop.f32.mrb[12].mxu1 }
 0x609   : > { %v2073_v49 = vadd.f32 %v2072_v48, %v2003_v46  ;;  %v5079_v32 = vpop.f32.mrb[13].mxu1 }
 0x60b   : > { %6025 = vrcp.f32 %v2073_v49 }
 0x60c   : > { %v5084_v54 = vpop.f32.mrb[14].mxu1  ;;  %6027 = vpow2.f32 %v2649_v12 }
 0x60d   : > { %v2144_v55 = vpop.f32.mrb[15].mxu1 }
 0x60e   : > { %v5739_v63 = vpack.c.bf16 %v5084_v54, %v2144_v55 }
 0x610   : > { %v5087_v35 = vpop.f32.mrb[16].mxu1 }
 0x611   : > { %v2154_v2 = vpop.f32.mrb[17].mxu1 }
 0x612   : > { %v5743_v41 = vpack.c.bf16 %v5087_v35, %v2154_v2 }
 0x614   : > { %v5090_v10 = vpop.f32.mrb[18].mxu1 }
 0x615   : > { %v6026_v19 = vpop.eup %6025  ;;  %v2164_v17 = vpop.f32.mrb[19].mxu1 }
 0x616   : > { %v5747_v18 = vpack.c.bf16 %v5090_v10, %v2164_v17  ;;  %2525 = vperm.xlu1 %6005, %v6026_v19   ;;  %v6028_v62 = vpop.eup %6027 }
 0x617   : > { %v2654_v33 = vmul.f32 0.061313935, %v6028_v62 }
 0x618   : > { %v5093_v31 = vpop.f32.mrb[20].mxu1 }
 0x619   : > { %v2174_v14 = vpop.f32.mrb[21].mxu1 }
 0x61a   : > { %v5751_v57 = vpack.c.bf16 %v5093_v31, %v2174_v14 }
 0x61c   : > { %v5096_v43 = vpop.f32.mrb[22].mxu1 }
 0x61d   : > { %v2184_v47 = vpop.f32.mrb[23].mxu1 }
 0x61e   : > { %v5755_v27 = vpack.c.bf16 %v5096_v43, %v2184_v47 }
 0x620   : > { %v5099_v16 = vpop.f32.mrb[24].mxu1 }
 0x621   : > { %v2194_v60 = vpop.f32.mrb[25].mxu1 }
 0x622   : > { %v5759_v28 = vpack.c.bf16 %v5099_v16, %v2194_v60 }
 0x624   : > { %v5102_v0 = vpop.f32.mrb[26].mxu1 }
 0x625   : > { %v2204_v6 = vpop.f32.mrb[27].mxu1 }
 0x626   : > { %v5763_v22 = vpack.c.bf16 %v5102_v0, %v2204_v6  ;;  %v7705_v0 = vld [vmem:[#allocation25_spill] sm:$0xff]  ;;  %v1320_v6 = vld [vmem:[%s7562_s7] sm:$0xff] }
 0x628   : > { %v5105_v7 = vpop.f32.mrb[28].mxu1 }
 0x629   : > { %v2214_v38 = vpop.f32.mrb[29].mxu1 }
 0x62a   : > { %v5767_v36 = vpack.c.bf16 %v5105_v7, %v2214_v38  ;;  %v1324_v38 = vld [vmem:[%s7562_s7 + $0x20] sm:$0xff] }
 0x62c   : > { %v5108_v3 = vpop.f32.mrb[30].mxu1 }
 0x62d   : > { %v2224_v42 = vpop.f32.mrb[31].mxu1 }
 0x62e   : > { %v5737_v23 = vpack.c.bf16 %v5108_v3, %v2224_v42  ;;  %v7706_v3 = vld [vmem:[#allocation23_spill] sm:$0xff]  ;;  %v7707_v42 = vld [vmem:[#allocation20_spill] sm:$0xff] }
 0x630   : > { %v5111_v26 = vpop.f32.mrb[32].mxu1  ;;  %5738 = vmatprep.subr.bf16.mxu0 %v5737_v23  ;;  %v2619_v23 = vmax.f32 %v7707_v42, %v7706_v3 }
 0x631   : > { %v2234_v40 = vpop.f32.mrb[33].mxu1  ;;  %5740 = vmatpush3.bf16.msra.mxu0 %v5739_v63 }
 0x632   : > { %v5741_v45 = vpack.c.bf16 %v5111_v26, %v2234_v40  ;;  %v7708_v40 = vld [vmem:[#allocation24_spill] sm:$0xff] }
 0x634   : > { %v5114_v50 = vpop.f32.mrb[34].mxu1  ;;  %5742 = vmatprep.subr.bf16.mxu0 %v5741_v45  ;;  %v2620_v45 = vmax.f32 %v2619_v23, %v7708_v40 }
 0x635   : > { %v2244_v58 = vpop.f32.mrb[35].mxu1  ;;  %5744 = vmatpush3.bf16.msra.mxu0 %v5743_v41 }
 0x636   : > { %v5745_v53 = vpack.c.bf16 %v5114_v50, %v2244_v58 }
 0x638   : > { %v5117_v20 = vpop.f32.mrb[36].mxu1  ;;  %5746 = vmatprep.subr.bf16.mxu0 %v5745_v53  ;;  %v1326_v53 = vld [vmem:[%s7562_s7 + $0x30] sm:$0xff] }
 0x639   : > { %v2254_v61 = vpop.f32.mrb[37].mxu1  ;;  %5748 = vmatpush3.bf16.msra.mxu0 %v5747_v18 }
 0x63a   : > { %v5749_v11 = vpack.c.bf16 %v5117_v20, %v2254_v61  ;;  %v1327_v20 = vld [vmem:[%s7562_s7 + $0x38] sm:$0xff] }
 0x63b   : > { %v5803_v61 = vpack.c.bf16 %v1327_v20, %v1326_v53 }
 0x63c   : > { %v5120_v1 = vpop.f32.mrb[38].mxu1  ;;  %5750 = vmatprep.subr.bf16.mxu0 %v5749_v11  ;;  %v7709_v11 = vmov 1.0  }
 0x63d   : > { %v2264_v5 = vpop.f32.mrb[39].mxu1  ;;  %5752 = vmatpush3.bf16.msra.mxu0 %v5751_v57 }
 0x63e   : > { %v5753_v34 = vpack.c.bf16 %v5120_v1, %v2264_v5 }
 0x63f   : > { %2688 = vxpose.xlu1.b32.start.end [1/1] (short) %v2654_v33, 128 }
 0x640   : > { %v5123_v51 = vpop.f32.mrb[40].mxu1  ;;  %5754 = vmatprep.subr.bf16.mxu0 %v5753_v34 }
 0x641   : > { %v2274_v52 = vpop.f32.mrb[41].mxu1  ;;  %5756 = vmatpush3.bf16.msra.mxu0 %v5755_v27 }
 0x642   : > { %v5757_v13 = vpack.c.bf16 %v5123_v51, %v2274_v52  ;;  %v7059_v51 = vpop.trf.xlu0 }
 0x644   : > { %v5126_v4 = vpop.f32.mrb[42].mxu1  ;;  %5758 = vmatprep.subr.bf16.mxu0 %v5757_v13 }
 0x645   : > { %v2284_v24 = vpop.f32.mrb[43].mxu1  ;;  %5760 = vmatpush3.bf16.msra.mxu0 %v5759_v28 }
 0x646   : > { %v5761_v30 = vpack.c.bf16 %v5126_v4, %v2284_v24  ;;  %v7065_v4 = vpop.trf.xlu0 }
 0x648   : > { %v5129_v8 = vpop.f32.mrb[44].mxu1  ;;  %5762 = vmatprep.subr.bf16.mxu0 %v5761_v30 }
 0x649   : > { %v2294_v15 = vpop.f32.mrb[45].mxu1  ;;  %5764 = vmatpush3.bf16.msra.mxu0 %v5763_v22  ;;  %v1321_v22 = vld [vmem:[%s7562_s7 + $0x8] sm:$0xff] }
 0x64a   : > { %v5765_v29 = vpack.c.bf16 %v5129_v8, %v2294_v15  ;;  %v5794_v9 = vpack.c.bf16 %v1321_v22, %v1320_v6  ;;  %v7069_v30 = vpop.trf.xlu0 }
 0x64c   : > { %v5132_v46 = vpop.f32.mrb[46].mxu1  ;;  %5766 = vmatprep.subr.bf16.mxu0 %v5765_v29 }
 0x64d   : > { %v2304_v48 = vpop.f32.mrb[47].mxu1  ;;  %5768 = vmatpush3.bf16.msra.mxu0 %v5767_v36  ;;  %v1325_v36 = vld [vmem:[%s7562_s7 + $0x28] sm:$0xff] }
 0x64e   : > { %v5770_v49 = vpack.c.bf16 %v5132_v46, %v2304_v48  ;;  %5769 = vmatprep.subr.bf16.mxu0 %v7684_v37  ;;  %v5800_v12 = vpack.c.bf16 %v1325_v36, %v1324_v38 }
 0x650   : > { %v5135_v32 = vpop.f32.mrb[48].mxu1  ;;  %2448 = vmatmul.mubr.f32.vlgmr.msra.gmra.mrb[54].mxu0 %v6867_v56 }
 0x651   : > { %v2314_v54 = vpop.f32.mrb[49].mxu1  ;;  %5771 = vmatpush3.bf16.msra.mxu0 %v5770_v49  ;;  %5186 = vmatprep.mubr.msk.f32.mxu0 %vm6149_vm1, %v7685_v21 }
 0x652   : > { %v5773_v55 = vpack.c.bf16 %v5135_v32, %v2314_v54  ;;  %5772 = vmatprep.subr.bf16.mxu0 %v7684_v37 }
 0x654   : > { %v5138_v63 = vpop.f32.mrb[50].mxu1 }
 0x655   : > { %v2324_v35 = vpop.f32.mrb[51].mxu1  ;;  %5774 = vmatpush3.bf16.msra.mxu0 %v5773_v55 }
 0x656   : > { %v5776_v2 = vpack.c.bf16 %v5138_v63, %v2324_v35  ;;  %5775 = vmatprep.subr.bf16.mxu0 %v7684_v37 }
 0x658   : > { %v5141_v41 = vpop.f32.mrb[52].mxu1 }
 0x659   : > { %v2334_v10 = vpop.f32.mrb[53].mxu1  ;;  %5777 = vmatpush3.bf16.msra.mxu0 %v5776_v2 }
 0x65a   : > { %v5779_v19 = vpack.c.bf16 %v5141_v41, %v2334_v10  ;;  %5778 = vmatprep.subr.bf16.mxu0 %v7684_v37 }
 0x65c   : > { %v5144_v56 = vpop.f32.mrb[54].mxu1 }
 0x65d   : > { %v2344_v17 = vpop.f32.mrb[55].mxu1  ;;  %5780 = vmatpush3.bf16.msra.mxu0 %v5779_v19 }
 0x65e   : > { %v5782_v18 = vpack.c.bf16 %v5144_v56, %v2344_v17  ;;  %5781 = vmatprep.subr.bf16.mxu0 %v7684_v37 }
 0x660   : > { %v5147_v31 = vpop.f32.mrb[56].mxu1 }
 0x661   : > { %v2354_v14 = vpop.f32.mrb[57].mxu1  ;;  %5783 = vmatpush3.bf16.msra.mxu0 %v5782_v18 }
 0x662   : > { %v5785_v57 = vpack.c.bf16 %v5147_v31, %v2354_v14  ;;  %5784 = vmatprep.subr.bf16.mxu0 %v7684_v37 }
 0x664   : > { %v5150_v43 = vpop.f32.mrb[58].mxu1 }
 0x665   : > { %v2364_v47 = vpop.f32.mrb[59].mxu1  ;;  %5786 = vmatpush3.bf16.msra.mxu0 %v5785_v57 }
 0x666   : > { %v5788_v27 = vpack.c.bf16 %v5150_v43, %v2364_v47  ;;  %5787 = vmatprep.subr.bf16.mxu0 %v7684_v37 }
 0x668   : > { %v5153_v16 = vpop.f32.mrb[60].mxu1 }
 0x669   : > { %v2374_v60 = vpop.f32.mrb[61].mxu1  ;;  %5789 = vmatpush3.bf16.msra.mxu0 %v5788_v27 }
 0x66a   : > { %v5791_v28 = vpack.c.bf16 %v5153_v16, %v2374_v60  ;;  %5790 = vmatprep.subr.bf16.mxu0 %v7684_v37 }
 0x66d   : > { %5792 = vmatpush3.bf16.msra.mxu0 %v5791_v28 }
 0x66e   : > { %5793 = vmatprep.subr.bf16.mxu0 %v7684_v37 }
 0x670   : > { %5187 = vmatmul.mubr.f32.vlgmr.msra.gmra.mrb[56].mxu0 %v6892_v44  ;;  %v1323_v44 = vld [vmem:[%s7562_s7 + $0x18] sm:$0xff] }
 0x671   : > { %5205 = vmatprep.mubr.msk.f32.mxu0 %vm6149_vm1, %v7685_v21  ;;  %5795 = vmatpush3.bf16.msra.mxu0 %v5794_v9  ;;  %v5797_v7 = vpack.c.bf16 %v1323_v44, %v1322_v39 }
 0x672   : > { %5796 = vmatprep.subr.bf16.mxu0 %v7684_v37 }
 0x675   : > { %5798 = vmatpush3.bf16.msra.mxu0 %v5797_v7 }
 0x676   : > { %5799 = vmatprep.subr.bf16.mxu0 %v7684_v37 }
 0x679   : > { %5801 = vmatpush3.bf16.msra.mxu0 %v5800_v12 }
 0x67a   : > { %5802 = vmatprep.subr.bf16.mxu0 %v7684_v37 }
 0x67d   : > { %5804 = vmatpush3.bf16.msra.mxu0 %v5803_v61 }
 0x67e   : > { %5208 = vmatprep.subr.mxu0 %v7709_v11 }
 0x695   : > { %v2526_v26 = vpop.permute.xlu1 %2525 }
 0x699   : > { %2604 = vrot.lane.b32.xlu1 %v7705_v0, %s6151_s21 }
 0x6bd   : > { %2621 = vmax.xlane.f32.xlu1 %v2620_v45 }
 0x6bf   : > { %v7036_v50 = vpop.trf.xlu1 }
 0x6c3   : > { %v7038_v58 = vpop.trf.xlu1 }
 0x6c7   : > { %v7046_v62 = vpop.trf.xlu1 }
 0x6cb   : > { %v7049_v1 = vpop.trf.xlu1 }
 0x6ce   : > { %3344 = vrot.lane.b32.xlu1 %v6889_v25, %s6151_s21  ;;  %v7073_v25 = vpop.trf.xlu0 }
 0x6cf   : > { %v7053_v5 = vpop.trf.xlu1 }
 0x6d2   : > { %v7077_v29 = vpop.trf.xlu0 }
 0x6d3   : > { %v7055_v33 = vpop.trf.xlu1 }
 0x6d6   : > { %v7081_v48 = vpop.trf.xlu0 }
 0x6d7   : > { %v7057_v34 = vpop.trf.xlu1 }
 0x6da   : > { %v7085_v32 = vpop.trf.xlu0 }
 0x6db   : > { %v7061_v52 = vpop.trf.xlu1 }
 0x6de   : > { %v7089_v55 = vpop.trf.xlu0 }
 0x6df   : > { %v7063_v13 = vpop.trf.xlu1 }
 0x6e2   : > { %v7093_v35 = vpop.trf.xlu0 }
 0x6e3   : > { %v7067_v24 = vpop.trf.xlu1 }
 0x6e6   : > { %v7096_v10 = vpop.trf.xlu0 }
 0x6e7   : > { %v7071_v8 = vpop.trf.xlu1 }
 0x6ea   : > { %v7098_v19 = vpop.trf.xlu0 }
 0x6eb   : > { %v7075_v15 = vpop.trf.xlu1 }
 0x6ee   : > { %v7100_v56 = vpop.trf.xlu0 }
 0x6ef   : > { %v7079_v46 = vpop.trf.xlu1 }
 0x6f2   : > { %v7102_v17 = vpop.trf.xlu0 }
 0x6f3   : > { %v7083_v49 = vpop.trf.xlu1 }
 0x6f6   : > { %v7104_v57 = vpop.trf.xlu0 }
 0x6f7   : > { %v7087_v54 = vpop.trf.xlu1 }
 0x6fa   : > { %v7106_v43 = vpop.trf.xlu0 }
 0x6fb   : > { %v7091_v63 = vpop.trf.xlu1 }
 0x6fe   : > { %v7108_v47 = vpop.trf.xlu0 }
 0x702   : > { %v7110_v27 = vpop.trf.xlu0 }
 0x706   : > { %v7112_v16 = vpop.trf.xlu0 }
 0x70a   : > { %v7114_v22 = vpop.trf.xlu0 }
 0x70b   : > { %v2605_v2 = vpop.permute.xlu1 %2604  ;;  %7710 = vst [vmem:[#allocation26_spill] sm:$0xff] %v7114_v22 }
 0x70c   : > { %v2607_v41 = vsel %vm1344_vm2, %v2605_v2, 0.0 }
 0x70d   : > { %2608 = vadd.xlane.f32.xlu0 %v2607_v41 }
 0x70e   : > { %v7122_v39 = vpop.trf.xlu0 }
 0x70f   : > { %7711 = vst [vmem:[#allocation27_spill] sm:$0xff] %v7122_v39 }
 0x712   : > { %v7130_v9 = vpop.trf.xlu0 }
 0x713   : > { %7712 = vst [vmem:[#allocation28_spill] sm:$0xff] %v7130_v9 }
 0x716   : > { %v7138_v44 = vpop.trf.xlu0 }
 0x717   : > { %7713 = vst [vmem:[#allocation29_spill] sm:$0xff] %v7138_v44 }
 0x71a   : > { %v7146_v7 = vpop.trf.xlu0 }
 0x71b   : > { %7714 = vst [vmem:[#allocation30_spill] sm:$0xff] %v7146_v7 }
 0x71e   : > { %v7154_v38 = vpop.trf.xlu0 }
 0x71f   : > { %7715 = vst [vmem:[#allocation31_spill] sm:$0xff] %v7154_v38 }
 0x722   : > { %v7162_v36 = vpop.trf.xlu0 }
 0x723   : > { %v4706_v18 = vpop.f32.mrb[54].mxu0  ;;  %7716 = vst [vmem:[#allocation32_spill] sm:$0xff] %v7162_v36 }
 0x724   : > { %v4707_v31 = vpop.f32.mrb[55].mxu0 }
 0x725   : > { %v4708_v14 = vadd.f32 %v4707_v31, %v4706_v18 }
 0x726   : > { %v7170_v12 = vpop.trf.xlu0 }
 0x727   : > { %7717 = vst [vmem:[#allocation33_spill] sm:$0xff] %v7170_v12 }
 0x72a   : > { %v7178_v23 = vpop.trf.xlu0 }
 0x72b   : > { %7718 = vst [vmem:[#allocation34_spill] sm:$0xff] %v7178_v23 }
 0x743   : > { %v2519_v60 = vpop.f32.mrb[56].mxu0 }
 0x744   : > { %v2520_v28 = vadd.f32 %v4708_v14, %v2519_v60  ;;  %v5188_v0 = vpop.f32.mrb[57].mxu0 }
 0x746   : > { %v2528_v6 = vmul.f32 %v2526_v26, %v2520_v28  ;;  %v7186_v26 = vpop.trf.xlu0 }
 0x747   : > { %7719 = vst [vmem:[#allocation35_spill] sm:$0xff] %v7186_v26 }
 0x748   : > { %5206 = vmatmul.mubr.msk.f32.vlgmr.msra.gmra.mrb[58].mxu0 %vm1344_vm2, %v2528_v6 }
 0x749   : > { %5210 = vmatprep.mubr.msk.f32.mxu0 %vm1486_vm3, %v7059_v51  ;;  %5209 = vmatpush3.msra.mxu0 %v7709_v11 }
 0x74a   : > { %v7194_v45 = vpop.trf.xlu0  ;;  %v7234_v18 = vpop.xlane.xlu1 %2621 }
 0x74b   : > { %7720 = vst [vmem:[#allocation36_spill] sm:$0xff] %v7194_v45 }
 0x74c   : > { %5211 = vmatmul.mubr.msk.f32.vlgmr.msra.gmra.mrb[60].mxu0 %vm1486_vm3, %v7065_v4 }
 0x74d   : > { %5213 = vmatprep.mubr.msk.f32.mxu0 %vm1486_vm3, %v7069_v30 }
 0x74e   : > { %v7202_v53 = vpop.trf.xlu0 }
 0x74f   : > { %7721 = vst [vmem:[#allocation37_spill] sm:$0xff] %v7202_v53 }
 0x750   : > { %5214 = vmatmul.mubr.msk.f32.gmra.mrb[62].mxu0 %vm1486_vm3, %v7073_v25 }
 0x751   : > { %5216 = vmatprep.mubr.msk.f32.mxu0 %vm1486_vm3, %v7077_v29 }
 0x752   : > { %v7210_v20 = vpop.trf.xlu0 }
 0x753   : > { %7722 = vst [vmem:[#allocation38_spill] sm:$0xff] %v7210_v20 }
 0x754   : > { %5217 = vmatmul.mubr.msk.f32.gmra.mrb[64].mxu0 %vm1486_vm3, %v7081_v48 }
 0x755   : > { %5219 = vmatprep.mubr.msk.f32.mxu0 %vm1486_vm3, %v7085_v32 }
 0x756   : > { %v7218_v61 = vpop.trf.xlu0 }
 0x757   : > { %7723 = vst [vmem:[#allocation39_spill] sm:$0xff] %v7218_v61 }
 0x758   : > { %5220 = vmatmul.mubr.msk.f32.gmra.mrb[66].mxu0 %vm1486_vm3, %v7089_v55 }
 0x759   : > { %5222 = vmatprep.mubr.msk.f32.mxu0 %vm1486_vm3, %v7093_v35 }
 0x75c   : > { %5223 = vmatmul.mubr.msk.f32.gmra.mrb[68].mxu0 %vm1486_vm3, %v7096_v10 }
 0x75d   : > { %5225 = vmatprep.mubr.msk.f32.mxu0 %vm1486_vm3, %v7098_v19 }
 0x760   : > { %5226 = vmatmul.mubr.msk.f32.gmra.mrb[70].mxu0 %vm1486_vm3, %v7100_v56 }
 0x761   : > { %5228 = vmatprep.mubr.msk.f32.mxu0 %vm1486_vm3, %v7102_v17 }
 0x764   : > { %5229 = vmatmul.mubr.msk.f32.gmra.mrb[72].mxu0 %vm1486_vm3, %v7104_v57 }
 0x765   : > { %5231 = vmatprep.mubr.msk.f32.mxu0 %vm1486_vm3, %v7106_v43 }
 0x768   : > { %5232 = vmatmul.mubr.msk.f32.gmra.mrb[74].mxu0 %vm1486_vm3, %v7108_v47 }
 0x769   : > { %5234 = vmatprep.mubr.msk.f32.mxu0 %vm1486_vm3, %v7036_v50 }
 0x76c   : > { %5235 = vmatmul.mubr.msk.f32.gmra.mrb[76].mxu0 %vm1486_vm3, %v7038_v58 }
 0x76d   : > { %5237 = vmatprep.mubr.msk.f32.mxu0 %vm1486_vm3, %v7046_v62 }
 0x770   : > { %5238 = vmatmul.mubr.msk.f32.gmra.mrb[78].mxu0 %vm1486_vm3, %v7049_v1 }
 0x771   : > { %5240 = vmatprep.mubr.msk.f32.mxu0 %vm1486_vm3, %v7053_v5 }
 0x774   : > { %5241 = vmatmul.mubr.msk.f32.gmra.mrb[80].mxu0 %vm1486_vm3, %v7055_v33 }
 0x775   : > { %5243 = vmatprep.mubr.msk.f32.mxu0 %vm1486_vm3, %v7057_v34 }
 0x778   : > { %5244 = vmatmul.mubr.msk.f32.gmra.mrb[82].mxu0 %vm1486_vm3, %v7061_v52 }
 0x779   : > { %5246 = vmatprep.mubr.msk.f32.mxu0 %vm1486_vm3, %v7063_v13 }
 0x77c   : > { %5247 = vmatmul.mubr.msk.f32.gmra.mrb[84].mxu0 %vm1486_vm3, %v7067_v24 }
 0x77d   : > { %5249 = vmatprep.mubr.msk.f32.mxu0 %vm1486_vm3, %v7071_v8 }
 0x780   : > { %5250 = vmatmul.mubr.msk.f32.gmra.mrb[86].mxu0 %vm1486_vm3, %v7075_v15 }
 0x781   : > { %5252 = vmatprep.mubr.msk.f32.mxu0 %vm1486_vm3, %v7079_v46 }
 0x784   : > { %5253 = vmatmul.mubr.msk.f32.gmra.mrb[88].mxu0 %vm1486_vm3, %v7083_v49 }
 0x785   : > { %5255 = vmatprep.mubr.msk.f32.mxu0 %vm1486_vm3, %v7087_v54 }
 0x788   : > { %5256 = vmatmul.mubr.msk.f32.gmra.mrb[90].mxu0 %vm1486_vm3, %v7091_v63 }
 0x789   : > { %5258 = vmatprep.mubr.msk.f32.mxu0 %vm1486_vm3, %v7110_v27 }
 0x78c   : > { %5259 = vmatmul.mubr.msk.f32.gmra.mrb[92].mxu0 %vm1486_vm3, %v7112_v16 }
 0x78d   : > { %5261 = vmatprep.mubr.msk.f32.mxu0 %vm1486_vm3, %v7114_v22 }
 0x790   : > { %5262 = vmatmul.mubr.msk.f32.gmra.mrb[94].mxu0 %vm1486_vm3, %v7122_v39 }
 0x791   : > { %5264 = vmatprep.mubr.msk.f32.mxu0 %vm1486_vm3, %v7130_v9 }
 0x794   : > { %5265 = vmatmul.mubr.msk.f32.gmra.mrb[96].mxu0 %vm1486_vm3, %v7138_v44 }
 0x795   : > { %5267 = vmatprep.mubr.msk.f32.mxu0 %vm1486_vm3, %v7146_v7 }
 0x798   : > { %5268 = vmatmul.mubr.msk.f32.gmra.mrb[98].mxu0 %vm1486_vm3, %v7154_v38 }
 0x799   : > { %5270 = vmatprep.mubr.msk.f32.mxu0 %vm1486_vm3, %v7162_v36 }
 0x79a   : > { %v2609_v11 = vpop.xlane.xlu0 %2608 }
 0x79b   : > { %v7226_v2 = vmul.f32 0.0625, %v2609_v11 }
 0x79c   : > { %5271 = vmatmul.mubr.msk.f32.gmra.mrb[100].mxu0 %vm1486_vm3, %v7170_v12 }
 0x79d   : > { %v2624_v41 = vsub.f32 %v7706_v3, %v7226_v2  ;;  %5273 = vmatprep.mubr.msk.f32.mxu0 %vm1486_vm3, %v7178_v23 }
 0x79f   : > { %v2627_v31 = vsub.f32 %v2624_v41, %v7234_v18 }
 0x7a0   : > { %5274 = vmatmul.mubr.msk.f32.gmra.mrb[102].mxu0 %vm1486_vm3, %v7186_v26 }
 0x7a1   : > { %v2631_v14 = vmul.f32 1.442695, %v2627_v31  ;;  %5276 = vmatprep.mubr.msk.f32.mxu0 %vm1486_vm3, %v7194_v45 }
 0x7a3   : > { %6029 = vpow2.f32 %v2631_v14 }
 0x7a4   : > { %5277 = vmatmul.mubr.msk.f32.gmra.mrb[104].mxu0 %vm1486_vm3, %v7202_v53 }
 0x7a5   : > { %5279 = vmatprep.mubr.msk.f32.mxu0 %vm1486_vm3, %v7210_v20 }
 0x7a8   : > { %5280 = vmatmul.mubr.msk.f32.gmra.mrb[106].mxu0 %vm1486_vm3, %v7218_v61 }
 0x7ad   : > { %v6030_v3 = vpop.eup %6029 }
 0x7ae   : > { %v2636_v60 = vadd.f32 0.0001, %v6030_v3 }
 0x7b0   : > { %v2639_v28 = vmul.f32 0.061313935, %v2636_v60 }
 0x7b2   : > { %3265 = vmatprep.mubr.f32.mxu1 %v2639_v28  ;;  %3716 = vmatprep.mubr.f32.mxu0 %v2639_v28 }
 0x81b   : > { %v7247_v0 = vpop.f32.mrb[58].mxu0 }
 0x81c   : > { %7724 = vst [vmem:[#allocation40_spill] sm:$0xff] %v7247_v0  ;;  %v5207_v6 = vpop.f32.mrb[59].mxu0 }
 0x81f   : > { %v5212_v11 = vpop.f32.mrb[60].mxu0 }
 0x820   : > { %v2962_v41 = vpop.f32.mrb[61].mxu0 }
 0x821   : > { %v5807_v31 = vpack.c.bf16 %v5212_v11, %v2962_v41 }
 0x823   : > { %v5215_v59 = vpop.f32.mrb[62].mxu0 }
 0x824   : > { %v2972_v53 = vpop.f32.mrb[63].mxu0 }
 0x825   : > { %v5811_v45 = vpack.c.bf16 %v5215_v59, %v2972_v53 }
 0x827   : > { %v5218_v26 = vpop.f32.mrb[64].mxu0 }
 0x828   : > { %v2982_v20 = vpop.f32.mrb[65].mxu0 }
 0x829   : > { %v5815_v14 = vpack.c.bf16 %v5218_v26, %v2982_v20 }
 0x82b   : > { %v5221_v23 = vpop.f32.mrb[66].mxu0 }
 0x82c   : > { %v2992_v12 = vpop.f32.mrb[67].mxu0 }
 0x82d   : > { %v5819_v61 = vpack.c.bf16 %v5221_v23, %v2992_v12  ;;  %v2623_v12 = vsub.f32 %v7707_v42, %v7226_v2 }
 0x82f   : > { %v5224_v36 = vpop.f32.mrb[68].mxu0 }
 0x830   : > { %v3002_v3 = vpop.f32.mrb[69].mxu0 }
 0x831   : > { %v5823_v60 = vpack.c.bf16 %v5224_v36, %v3002_v3 }
 0x833   : > { %v5227_v38 = vpop.f32.mrb[70].mxu0 }
 0x834   : > { %v3012_v28 = vpop.f32.mrb[71].mxu0 }
 0x835   : > { %v5827_v7 = vpack.c.bf16 %v5227_v38, %v3012_v28  ;;  %v2626_v38 = vsub.f32 %v2623_v12, %v7234_v18 }
 0x837   : > { %v5230_v0 = vpop.f32.mrb[72].mxu0 }
 0x838   : > { %v3022_v6 = vpop.f32.mrb[73].mxu0 }
 0x839   : > { %v5831_v44 = vpack.c.bf16 %v5230_v0, %v3022_v6 }
 0x83b   : > { %v5233_v9 = vpop.f32.mrb[74].mxu0 }
 0x83c   : > { %v3032_v11 = vpop.f32.mrb[75].mxu0 }
 0x83d   : > { %v5835_v41 = vpack.c.bf16 %v5233_v9, %v3032_v11  ;;  %v2629_v9 = vmul.f32 1.442695, %v2626_v38 }
 0x83f   : > { %v5236_v39 = vpop.f32.mrb[76].mxu0  ;;  %6031 = vpow2.f32 %v2629_v9 }
 0x840   : > { %v3042_v59 = vpop.f32.mrb[77].mxu0 }
 0x841   : > { %v5805_v53 = vpack.c.bf16 %v5236_v39, %v3042_v59 }
 0x843   : > { %v5239_v22 = vpop.f32.mrb[78].mxu0  ;;  %5806 = vmatprep.subr.bf16.mxu1 %v5805_v53 }
 0x844   : > { %v3052_v23 = vpop.f32.mrb[79].mxu0  ;;  %5808 = vmatpush3.bf16.msra.mxu1 %v5807_v31 }
 0x845   : > { %v5809_v36 = vpack.c.bf16 %v5239_v22, %v3052_v23 }
 0x847   : > { %v5242_v26 = vpop.f32.mrb[80].mxu0  ;;  %5810 = vmatprep.subr.bf16.mxu1 %v5809_v36 }
 0x848   : > { %v3062_v20 = vpop.f32.mrb[81].mxu0  ;;  %5812 = vmatpush3.bf16.msra.mxu1 %v5811_v45 }
 0x849   : > { %v5813_v0 = vpack.c.bf16 %v5242_v26, %v3062_v20  ;;  %v6032_v23 = vpop.eup %6031 }
 0x84a   : > { %v2635_v26 = vadd.f32 0.0001, %v6032_v23 }
 0x84b   : > { %v5245_v3 = vpop.f32.mrb[82].mxu0  ;;  %5814 = vmatprep.subr.bf16.mxu1 %v5813_v0 }
 0x84c   : > { %v3072_v28 = vpop.f32.mrb[83].mxu0  ;;  %5816 = vmatpush3.bf16.msra.mxu1 %v5815_v14  ;;  %v7252_v0 = vmul.f32 0.061313935, %v2635_v26 }
 0x84d   : > { %v5817_v39 = vpack.c.bf16 %v5245_v3, %v3072_v28 }
 0x84f   : > { %v5248_v6 = vpop.f32.mrb[84].mxu0  ;;  %5818 = vmatprep.subr.bf16.mxu1 %v5817_v39 }
 0x850   : > { %v3082_v42 = vpop.f32.mrb[85].mxu0  ;;  %5820 = vmatpush3.bf16.msra.mxu1 %v5819_v61 }
 0x851   : > { %v5821_v31 = vpack.c.bf16 %v5248_v6, %v3082_v42 }
 0x853   : > { %v5251_v22 = vpop.f32.mrb[86].mxu0  ;;  %5822 = vmatprep.subr.bf16.mxu1 %v5821_v31 }
 0x854   : > { %v3092_v11 = vpop.f32.mrb[87].mxu0  ;;  %5824 = vmatpush3.bf16.msra.mxu1 %v5823_v60 }
 0x855   : > { %v5825_v59 = vpack.c.bf16 %v5251_v22, %v3092_v11 }
 0x857   : > { %v5254_v53 = vpop.f32.mrb[88].mxu0  ;;  %5826 = vmatprep.subr.bf16.mxu1 %v5825_v59 }
 0x858   : > { %v3102_v45 = vpop.f32.mrb[89].mxu0  ;;  %5828 = vmatpush3.bf16.msra.mxu1 %v5827_v7  ;;  %v2625_v7 = vsub.f32 %v7708_v40, %v7226_v2 }
 0x859   : > { %v5829_v12 = vpack.c.bf16 %v5254_v53, %v3102_v45 }
 0x85a   : > { %v2628_v28 = vsub.f32 %v2625_v7, %v7234_v18 }
 0x85b   : > { %v5257_v36 = vpop.f32.mrb[90].mxu0  ;;  %5830 = vmatprep.subr.bf16.mxu1 %v5829_v12 }
 0x85c   : > { %v3112_v14 = vpop.f32.mrb[91].mxu0  ;;  %5832 = vmatpush3.bf16.msra.mxu1 %v5831_v44  ;;  %v2633_v31 = vmul.f32 1.442695, %v2628_v28 }
 0x85d   : > { %v5833_v38 = vpack.c.bf16 %v5257_v36, %v3112_v14 }
 0x85e   : > { %6033 = vpow2.f32 %v2633_v31 }
 0x85f   : > { %v5260_v20 = vpop.f32.mrb[92].mxu0  ;;  %5834 = vmatprep.subr.bf16.mxu1 %v5833_v38 }
 0x860   : > { %v3122_v61 = vpop.f32.mrb[93].mxu0  ;;  %5836 = vmatpush3.bf16.msra.mxu1 %v5835_v41 }
 0x861   : > { %v5838_v60 = vpack.c.bf16 %v5260_v20, %v3122_v61  ;;  %5837 = vmatprep.subr.bf16.mxu1 %v7684_v37 }
 0x863   : > { %v5263_v3 = vpop.f32.mrb[94].mxu0  ;;  %3266 = vmatmul.mubr.f32.vlgmr.msra.gmra.mrb[62].mxu1 %v7252_v0 }
 0x864   : > { %v3132_v9 = vpop.f32.mrb[95].mxu0  ;;  %5839 = vmatpush3.bf16.msra.mxu1 %v5838_v60  ;;  %5314 = vmatprep.mubr.msk.f32.mxu1 %vm6149_vm1, %v7685_v21  ;;  %v3345_v60 = vpop.permute.xlu1 %3344 }
 0x865   : > { %v5841_v44 = vpack.c.bf16 %v5263_v3, %v3132_v9  ;;  %5840 = vmatprep.subr.bf16.mxu1 %v7684_v37 }
 0x867   : > { %v5266_v41 = vpop.f32.mrb[96].mxu0 }
 0x868   : > { %v3142_v39 = vpop.f32.mrb[97].mxu0  ;;  %5842 = vmatpush3.bf16.msra.mxu1 %v5841_v44  ;;  %v6034_v14 = vpop.eup %6033 }
 0x869   : > { %v5844_v6 = vpack.c.bf16 %v5266_v41, %v3142_v39  ;;  %5843 = vmatprep.subr.bf16.mxu1 %v7684_v37  ;;  %v2637_v61 = vadd.f32 0.0001, %v6034_v14 }
 0x86b   : > { %v5269_v42 = vpop.f32.mrb[98].mxu0  ;;  %v7268_v3 = vmul.f32 0.061313935, %v2637_v61 }
 0x86c   : > { %v3152_v22 = vpop.f32.mrb[99].mxu0  ;;  %5845 = vmatpush3.bf16.msra.mxu1 %v5844_v6 }
 0x86d   : > { %v5847_v40 = vpack.c.bf16 %v5269_v42, %v3152_v22  ;;  %5846 = vmatprep.subr.bf16.mxu1 %v7684_v37 }
 0x86f   : > { %v5272_v2 = vpop.f32.mrb[100].mxu0 }
 0x870   : > { %v3162_v11 = vpop.f32.mrb[101].mxu0  ;;  %5848 = vmatpush3.bf16.msra.mxu1 %v5847_v40 }
 0x871   : > { %v5850_v59 = vpack.c.bf16 %v5272_v2, %v3162_v11  ;;  %5849 = vmatprep.subr.bf16.mxu1 %v7684_v37 }
 0x873   : > { %v5275_v18 = vpop.f32.mrb[102].mxu0 }
 0x874   : > { %v3172_v53 = vpop.f32.mrb[103].mxu0  ;;  %5851 = vmatpush3.bf16.msra.mxu1 %v5850_v59 }
 0x875   : > { %v5853_v45 = vpack.c.bf16 %v5275_v18, %v3172_v53  ;;  %5852 = vmatprep.subr.bf16.mxu1 %v7684_v37 }
 0x877   : > { %v5278_v12 = vpop.f32.mrb[104].mxu0 }
 0x878   : > { %v3182_v23 = vpop.f32.mrb[105].mxu0  ;;  %5854 = vmatpush3.bf16.msra.mxu1 %v5853_v45 }
 0x879   : > { %v5856_v36 = vpack.c.bf16 %v5278_v12, %v3182_v23  ;;  %5855 = vmatprep.subr.bf16.mxu1 %v7684_v37 }
 0x87b   : > { %v5281_v26 = vpop.f32.mrb[106].mxu0 }
 0x87c   : > { %v3192_v38 = vpop.f32.mrb[107].mxu0  ;;  %5857 = vmatpush3.bf16.msra.mxu1 %v5856_v36 }
 0x87d   : > { %v5859_v20 = vpack.c.bf16 %v5281_v26, %v3192_v38  ;;  %5858 = vmatprep.subr.bf16.mxu1 %v7684_v37 }
 0x880   : > { %5860 = vmatpush3.bf16.msra.mxu1 %v5859_v20 }
 0x881   : > { %5317 = vmatprep.subr.mxu1 %v3345_v60 }
 0x883   : > { %5315 = vmatmul.mubr.f32.vlgmr.msra.gmra.mrb[64].mxu1 %v7268_v3 }
 0x884   : > { %5318 = vmatpush3.msra.mxu1 %v3345_v60  ;;  %5319 = vmatprep.mubr.msk.f32.mxu1 %vm1486_vm3, %v7059_v51  ;;  %v7732_v51 = vld [vmem:[#allocation33_spill] sm:$0xff] }
 0x885   : > { %5929 = vmatprep.subr.bf16.mxu1 %v7684_v37 }
 0x887   : > { %5320 = vmatmul.mubr.msk.f32.vlgmr.msra.gmra.mrb[66].mxu1 %vm1486_vm3, %v7065_v4  ;;  %v7735_v4 = vld [vmem:[#allocation36_spill] sm:$0xff] }
 0x888   : > { %5322 = vmatprep.mubr.msk.f32.mxu1 %vm1486_vm3, %v7069_v30  ;;  %v7737_v30 = vld [vmem:[#allocation38_spill] sm:$0xff] }
 0x88b   : > { %5323 = vmatmul.mubr.msk.f32.gmra.mrb[68].mxu1 %vm1486_vm3, %v7073_v25 }
 0x88c   : > { %5325 = vmatprep.mubr.msk.f32.mxu1 %vm1486_vm3, %v7077_v29 }
 0x88f   : > { %5326 = vmatmul.mubr.msk.f32.gmra.mrb[70].mxu1 %vm1486_vm3, %v7081_v48 }
 0x890   : > { %5328 = vmatprep.mubr.msk.f32.mxu1 %vm1486_vm3, %v7085_v32 }
 0x893   : > { %5329 = vmatmul.mubr.msk.f32.gmra.mrb[72].mxu1 %vm1486_vm3, %v7089_v55 }
 0x894   : > { %5331 = vmatprep.mubr.msk.f32.mxu1 %vm1486_vm3, %v7093_v35 }
 0x897   : > { %5332 = vmatmul.mubr.msk.f32.gmra.mrb[74].mxu1 %vm1486_vm3, %v7096_v10 }
 0x898   : > { %5334 = vmatprep.mubr.msk.f32.mxu1 %vm1486_vm3, %v7098_v19 }
 0x89b   : > { %5335 = vmatmul.mubr.msk.f32.gmra.mrb[76].mxu1 %vm1486_vm3, %v7100_v56 }
 0x89c   : > { %5337 = vmatprep.mubr.msk.f32.mxu1 %vm1486_vm3, %v7102_v17 }
 0x89f   : > { %5338 = vmatmul.mubr.msk.f32.gmra.mrb[78].mxu1 %vm1486_vm3, %v7104_v57 }
 0x8a0   : > { %5340 = vmatprep.mubr.msk.f32.mxu1 %vm1486_vm3, %v7106_v43 }
 0x8a3   : > { %5341 = vmatmul.mubr.msk.f32.gmra.mrb[80].mxu1 %vm1486_vm3, %v7108_v47 }
 0x8a4   : > { %5343 = vmatprep.mubr.msk.f32.mxu1 %vm1486_vm3, %v7036_v50  ;;  %v7725_v50 = vld [vmem:[#allocation26_spill] sm:$0xff] }
 0x8a7   : > { %5344 = vmatmul.mubr.msk.f32.gmra.mrb[82].mxu1 %vm1486_vm3, %v7038_v58  ;;  %v7726_v58 = vld [vmem:[#allocation27_spill] sm:$0xff] }
 0x8a8   : > { %5346 = vmatprep.mubr.msk.f32.mxu1 %vm1486_vm3, %v7046_v62  ;;  %v7727_v62 = vld [vmem:[#allocation28_spill] sm:$0xff] }
 0x8ab   : > { %5347 = vmatmul.mubr.msk.f32.gmra.mrb[84].mxu1 %vm1486_vm3, %v7049_v1  ;;  %v7728_v1 = vld [vmem:[#allocation29_spill] sm:$0xff] }
 0x8ac   : > { %5349 = vmatprep.mubr.msk.f32.mxu1 %vm1486_vm3, %v7053_v5  ;;  %v7729_v5 = vld [vmem:[#allocation30_spill] sm:$0xff] }
 0x8af   : > { %5350 = vmatmul.mubr.msk.f32.gmra.mrb[86].mxu1 %vm1486_vm3, %v7055_v33  ;;  %v7730_v33 = vld [vmem:[#allocation31_spill] sm:$0xff] }
 0x8b0   : > { %5352 = vmatprep.mubr.msk.f32.mxu1 %vm1486_vm3, %v7057_v34  ;;  %v7731_v34 = vld [vmem:[#allocation32_spill] sm:$0xff] }
 0x8b3   : > { %5353 = vmatmul.mubr.msk.f32.gmra.mrb[88].mxu1 %vm1486_vm3, %v7061_v52  ;;  %v7733_v52 = vld [vmem:[#allocation34_spill] sm:$0xff] }
 0x8b4   : > { %5355 = vmatprep.mubr.msk.f32.mxu1 %vm1486_vm3, %v7063_v13  ;;  %v7734_v13 = vld [vmem:[#allocation35_spill] sm:$0xff] }
 0x8b7   : > { %5356 = vmatmul.mubr.msk.f32.gmra.mrb[90].mxu1 %vm1486_vm3, %v7067_v24  ;;  %v7736_v24 = vld [vmem:[#allocation37_spill] sm:$0xff] }
 0x8b8   : > { %5358 = vmatprep.mubr.msk.f32.mxu1 %vm1486_vm3, %v7071_v8  ;;  %v7738_v8 = vld [vmem:[#allocation39_spill] sm:$0xff] }
 0x8bb   : > { %5359 = vmatmul.mubr.msk.f32.gmra.mrb[92].mxu1 %vm1486_vm3, %v7075_v15 }
 0x8bc   : > { %5361 = vmatprep.mubr.msk.f32.mxu1 %vm1486_vm3, %v7079_v46 }
 0x8bf   : > { %5362 = vmatmul.mubr.msk.f32.gmra.mrb[94].mxu1 %vm1486_vm3, %v7083_v49 }
 0x8c0   : > { %5364 = vmatprep.mubr.msk.f32.mxu1 %vm1486_vm3, %v7087_v54 }
 0x8c3   : > { %5365 = vmatmul.mubr.msk.f32.gmra.mrb[96].mxu1 %vm1486_vm3, %v7091_v63 }
 0x8c4   : > { %5367 = vmatprep.mubr.msk.f32.mxu1 %vm1486_vm3, %v7110_v27 }
 0x8c7   : > { %5368 = vmatmul.mubr.msk.f32.gmra.mrb[98].mxu1 %vm1486_vm3, %v7112_v16 }
 0x8c8   : > { %5370 = vmatprep.mubr.msk.f32.mxu1 %vm1486_vm3, %v7725_v50 }
 0x8cb   : > { %5371 = vmatmul.mubr.msk.f32.gmra.mrb[100].mxu1 %vm1486_vm3, %v7726_v58 }
 0x8cc   : > { %5373 = vmatprep.mubr.msk.f32.mxu1 %vm1486_vm3, %v7727_v62 }
 0x8cf   : > { %5374 = vmatmul.mubr.msk.f32.gmra.mrb[102].mxu1 %vm1486_vm3, %v7728_v1 }
 0x8d0   : > { %5376 = vmatprep.mubr.msk.f32.mxu1 %vm1486_vm3, %v7729_v5 }
 0x8d3   : > { %5377 = vmatmul.mubr.msk.f32.gmra.mrb[104].mxu1 %vm1486_vm3, %v7730_v33 }
 0x8d4   : > { %5379 = vmatprep.mubr.msk.f32.mxu1 %vm1486_vm3, %v7731_v34 }
 0x8d7   : > { %5380 = vmatmul.mubr.msk.f32.gmra.mrb[106].mxu1 %vm1486_vm3, %v7732_v51 }
 0x8d8   : > { %5382 = vmatprep.mubr.msk.f32.mxu1 %vm1486_vm3, %v7733_v52 }
 0x8db   : > { %5383 = vmatmul.mubr.msk.f32.gmra.mrb[108].mxu1 %vm1486_vm3, %v7734_v13 }
 0x8dc   : > { %5385 = vmatprep.mubr.msk.f32.mxu1 %vm1486_vm3, %v7735_v4 }
 0x8df   : > { %5386 = vmatmul.mubr.msk.f32.gmra.mrb[110].mxu1 %vm1486_vm3, %v7736_v24 }
 0x8e0   : > { %5388 = vmatprep.mubr.msk.f32.mxu1 %vm1486_vm3, %v7737_v30 }
 0x8e3   : > { %5389 = vmatmul.mubr.msk.f32.gmra.mrb[112].mxu1 %vm1486_vm3, %v7738_v8 }
 0x8e4   : > { %5453 = vmatprep.mubr.msk.f32.mxu1 %vm6149_vm1, %v7685_v21 }
 0x936   : > { %v4816_v25 = vpop.f32.mrb[62].mxu1 }
 0x937   : > { %v4817_v15 = vpop.f32.mrb[63].mxu1 }
 0x938   : > { %v4818_v29 = vadd.f32 %v4817_v15, %v4816_v25 }
 0x93a   : > { %v3268_v46 = vadd.f32 1e-08, %v4818_v29 }
 0x956   : > { %v3337_v48 = vpop.f32.mrb[64].mxu1 }
 0x957   : > { %v3338_v49 = vadd.f32 %v3337_v48, %v3268_v46  ;;  %v5316_v32 = vpop.f32.mrb[65].mxu1 }
 0x959   : > { %6035 = vrcp.f32 %v3338_v49 }
 0x95a   : > { %v5321_v54 = vpop.f32.mrb[66].mxu1 }
 0x95b   : > { %v3413_v55 = vpop.f32.mrb[67].mxu1 }
 0x95c   : > { %v5863_v63 = vpack.c.bf16 %v5321_v54, %v3413_v55 }
 0x95e   : > { %v5324_v35 = vpop.f32.mrb[68].mxu1 }
 0x95f   : > { %v3423_v10 = vpop.f32.mrb[69].mxu1 }
 0x960   : > { %v5867_v19 = vpack.c.bf16 %v5324_v35, %v3423_v10 }
 0x962   : > { %v5327_v56 = vpop.f32.mrb[70].mxu1 }
 0x963   : > { %v6036_v17 = vpop.eup %6035  ;;  %v3433_v57 = vpop.f32.mrb[71].mxu1 }
 0x964   : > { %v5871_v43 = vpack.c.bf16 %v5327_v56, %v3433_v57  ;;  %3794 = vperm.xlu1 %6005, %v6036_v17  }
 0x966   : > { %v5330_v47 = vpop.f32.mrb[72].mxu1 }
 0x967   : > { %v3443_v27 = vpop.f32.mrb[73].mxu1 }
 0x968   : > { %v5875_v16 = vpack.c.bf16 %v5330_v47, %v3443_v27 }
 0x96a   : > { %v5333_v7 = vpop.f32.mrb[74].mxu1 }
 0x96b   : > { %v3453_v9 = vpop.f32.mrb[75].mxu1 }
 0x96c   : > { %v5879_v44 = vpack.c.bf16 %v5333_v7, %v3453_v9  ;;  %v1329_v7 = vld [vmem:[%s7562_s7 + $0x48] sm:$0xff]  ;;  %v1330_v9 = vld [vmem:[%s7562_s7 + $0x50] sm:$0xff] }
 0x96e   : > { %v5336_v41 = vpop.f32.mrb[76].mxu1 }
 0x96f   : > { %v3463_v28 = vpop.f32.mrb[77].mxu1 }
 0x970   : > { %v5883_v39 = vpack.c.bf16 %v5336_v41, %v3463_v28  ;;  %v1332_v28 = vld [vmem:[%s7562_s7 + $0x60] sm:$0xff] }
 0x972   : > { %v5339_v6 = vpop.f32.mrb[78].mxu1 }
 0x973   : > { %v3473_v42 = vpop.f32.mrb[79].mxu1 }
 0x974   : > { %v5887_v31 = vpack.c.bf16 %v5339_v6, %v3473_v42  ;;  %v1334_v42 = vld [vmem:[%s7562_s7 + $0x70] sm:$0xff] }
 0x976   : > { %v5342_v22 = vpop.f32.mrb[80].mxu1 }
 0x977   : > { %v3483_v40 = vpop.f32.mrb[81].mxu1 }
 0x978   : > { %v5891_v2 = vpack.c.bf16 %v5342_v22, %v3483_v40 }
 0x97a   : > { %v5345_v11 = vpop.f32.mrb[82].mxu1 }
 0x97b   : > { %v3493_v59 = vpop.f32.mrb[83].mxu1 }
 0x97c   : > { %v5861_v18 = vpack.c.bf16 %v5345_v11, %v3493_v59 }
 0x97e   : > { %v5348_v53 = vpop.f32.mrb[84].mxu1  ;;  %5862 = vmatprep.subr.bf16.mxu0 %v5861_v18 }
 0x97f   : > { %v3503_v45 = vpop.f32.mrb[85].mxu1  ;;  %5864 = vmatpush3.bf16.msra.mxu0 %v5863_v63 }
 0x980   : > { %v5865_v12 = vpack.c.bf16 %v5348_v53, %v3503_v45 }
 0x982   : > { %v5351_v23 = vpop.f32.mrb[86].mxu1  ;;  %5866 = vmatprep.subr.bf16.mxu0 %v5865_v12 }
 0x983   : > { %v3513_v36 = vpop.f32.mrb[87].mxu1  ;;  %5868 = vmatpush3.bf16.msra.mxu0 %v5867_v19 }
 0x984   : > { %v5869_v14 = vpack.c.bf16 %v5351_v23, %v3513_v36  ;;  %v4311_v23 = vld [vmem:[%s7563_s8] ss:$0 sm:$0xff] }
 0x985   : > { %v7739_v36 = vld [vmem:[#allocation40_spill] sm:$0xff] }
 0x986   : > { %v5354_v26 = vpop.f32.mrb[88].mxu1  ;;  %5870 = vmatprep.subr.bf16.mxu0 %v5869_v14  ;;  %v2602_v14 = vadd.f32 %v4311_v23, %v7739_v36 }
 0x987   : > { %v3523_v38 = vpop.f32.mrb[89].mxu1  ;;  %5872 = vmatpush3.bf16.msra.mxu0 %v5871_v43 }
 0x988   : > { %v5873_v20 = vpack.c.bf16 %v5354_v26, %v3523_v38 }
 0x98a   : > { %v5357_v61 = vpop.f32.mrb[90].mxu1  ;;  %5874 = vmatprep.subr.bf16.mxu0 %v5873_v20 }
 0x98b   : > { %v3533_v60 = vpop.f32.mrb[91].mxu1  ;;  %5876 = vmatpush3.bf16.msra.mxu0 %v5875_v16  ;;  %v1328_v16 = vld [vmem:[%s7562_s7 + $0x40] sm:$0xff] }
 0x98c   : > { %v5877_v50 = vpack.c.bf16 %v5357_v61, %v3533_v60  ;;  %v6047_v61 = vld [vmem:[%s6332_s27] sm:$0xff]  ;;  %s6082_s27 = scalar_lea.vmem %s6081_s20, 256 }
 0x98e   : > { %v5360_v58 = vpop.f32.mrb[92].mxu1  ;;  %5878 = vmatprep.subr.bf16.mxu0 %v5877_v50 }
 0x98f   : > { %v3543_v62 = vpop.f32.mrb[93].mxu1  ;;  %5880 = vmatpush3.bf16.msra.mxu0 %v5879_v44  ;;  %v5918_v44 = vpack.c.bf16 %v1329_v7, %v1328_v16  ;;  %v4128_v16 = vld [vmem:[%s7570_s15 + $0x20] sm:$0xff]  ;;  %v4129_v7 = vld [vmem:[%s7570_s15 + $0x28] sm:$0xff] }
 0x990   : > { %v5881_v1 = vpack.c.bf16 %v5360_v58, %v3543_v62  ;;  %v3903_v58 = vld [vmem:[%s7566_s11 + $0x8] sm:$0xff] }
 0x992   : > { %v5363_v5 = vpop.f32.mrb[94].mxu1  ;;  %5882 = vmatprep.subr.bf16.mxu0 %v5881_v1 }
 0x993   : > { %v3553_v33 = vpop.f32.mrb[95].mxu1  ;;  %5884 = vmatpush3.bf16.msra.mxu0 %v5883_v39  ;;  %v1333_v39 = vld [vmem:[%s7562_s7 + $0x68] sm:$0xff] }
 0x994   : > { %v5885_v34 = vpack.c.bf16 %v5363_v5, %v3553_v33  ;;  %v5924_v6 = vpack.c.bf16 %v1333_v39, %v1332_v28 }
 0x996   : > { %v5366_v51 = vpop.f32.mrb[96].mxu1  ;;  %5886 = vmatprep.subr.bf16.mxu0 %v5885_v34 }
 0x997   : > { %v3563_v52 = vpop.f32.mrb[97].mxu1  ;;  %5888 = vmatpush3.bf16.msra.mxu0 %v5887_v31  ;;  %v1335_v31 = vld [vmem:[%s7562_s7 + $0x78] sm:$0xff] }
 0x998   : > { %v5889_v13 = vpack.c.bf16 %v5366_v51, %v3563_v52  ;;  %v5927_v22 = vpack.c.bf16 %v1335_v31, %v1334_v42  ;;  %v3904_v52 = vld [vmem:[%s7566_s11 + $0x10] sm:$0xff]  ;;  %v7740_v42 = vld [vmem:[#allocation16_spill] sm:$0xff] }
 0x99a   : > { %v5369_v4 = vpop.f32.mrb[98].mxu1  ;;  %5890 = vmatprep.subr.bf16.mxu0 %v5889_v13  ;;  %v3905_v13 = vld [vmem:[%s7566_s11 + $0x18] sm:$0xff] }
 0x99b   : > { %v3573_v24 = vpop.f32.mrb[99].mxu1  ;;  %5892 = vmatpush3.bf16.msra.mxu0 %v5891_v2 }
 0x99c   : > { %v5894_v30 = vpack.c.bf16 %v5369_v4, %v3573_v24  ;;  %5893 = vmatprep.subr.bf16.mxu0 %v7684_v37  ;;  %v5933_v4 = vpack.c.bf16 %v3905_v13, %v3904_v52 }
 0x99e   : > { %v5372_v8 = vpop.f32.mrb[100].mxu1  ;;  %3717 = vmatmul.mubr.f32.vlgmr.msra.gmra.mrb[108].mxu0 %v7252_v0 }
 0x99f   : > { %v3583_v25 = vpop.f32.mrb[101].mxu1  ;;  %5895 = vmatpush3.bf16.msra.mxu0 %v5894_v30  ;;  %5423 = vmatprep.mubr.msk.f32.mxu0 %vm6149_vm1, %v7685_v21 }
 0x9a0   : > { %v5897_v15 = vpack.c.bf16 %v5372_v8, %v3583_v25  ;;  %5896 = vmatprep.subr.bf16.mxu0 %v7684_v37 }
 0x9a2   : > { %v5375_v29 = vpop.f32.mrb[102].mxu1 }
 0x9a3   : > { %v3593_v46 = vpop.f32.mrb[103].mxu1  ;;  %5898 = vmatpush3.bf16.msra.mxu0 %v5897_v15  ;;  %v4506_v15 = vld [vmem:[%s7564_s9] ss:$0 sm:$0xff] }
 0x9a4   : > { %v5900_v48 = vpack.c.bf16 %v5375_v29, %v3593_v46  ;;  %5899 = vmatprep.subr.bf16.mxu0 %v7684_v37  ;;  %v4507_v46 = vld [vmem:[%s7565_s10] ss:$0 sm:$0xff] }
 0x9a6   : > { %v5378_v49 = vpop.f32.mrb[104].mxu1 }
 0x9a7   : > { %v3603_v32 = vpop.f32.mrb[105].mxu1  ;;  %5901 = vmatpush3.bf16.msra.mxu0 %v5900_v48 }
 0x9a8   : > { %v5903_v54 = vpack.c.bf16 %v5378_v49, %v3603_v32  ;;  %5902 = vmatprep.subr.bf16.mxu0 %v7684_v37  ;;  %v4508_v32 = vld [vmem:[%s7567_s12] ss:$0 sm:$0xff] }
 0x9aa   : > { %v5381_v0 = vpop.f32.mrb[106].mxu1 }
 0x9ab   : > { %v3613_v55 = vpop.f32.mrb[107].mxu1  ;;  %5904 = vmatpush3.bf16.msra.mxu0 %v5903_v54 }
 0x9ac   : > { %v5906_v63 = vpack.c.bf16 %v5381_v0, %v3613_v55  ;;  %5905 = vmatprep.subr.bf16.mxu0 %v7684_v37 }
 0x9ae   : > { %v5384_v35 = vpop.f32.mrb[108].mxu1 }
 0x9af   : > { %v3623_v10 = vpop.f32.mrb[109].mxu1  ;;  %5907 = vmatpush3.bf16.msra.mxu0 %v5906_v63 }
 0x9b0   : > { %v5909_v19 = vpack.c.bf16 %v5384_v35, %v3623_v10  ;;  %5908 = vmatprep.subr.bf16.mxu0 %v7684_v37 }
 0x9b2   : > { %v5387_v56 = vpop.f32.mrb[110].mxu1 }
 0x9b3   : > { %v3633_v17 = vpop.f32.mrb[111].mxu1  ;;  %5910 = vmatpush3.bf16.msra.mxu0 %v5909_v19  ;;  %v4124_v19 = vld [vmem:[%s7570_s15] sm:$0xff] }
 0x9b4   : > { %v5912_v57 = vpack.c.bf16 %v5387_v56, %v3633_v17  ;;  %5911 = vmatprep.subr.bf16.mxu0 %v7684_v37  ;;  %v4125_v56 = vld [vmem:[%s7570_s15 + $0x8] sm:$0xff]  ;;  %v4126_v17 = vld [vmem:[%s7570_s15 + $0x10] sm:$0xff] }
 0x9b6   : > { %v5390_v43 = vpop.f32.mrb[112].mxu1 }
 0x9b7   : > { %v3643_v47 = vpop.f32.mrb[113].mxu1  ;;  %5913 = vmatpush3.bf16.msra.mxu0 %v5912_v57  ;;  %v5936_v57 = vpack.c.bf16 %v4125_v56, %v4124_v19 }
 0x9b8   : > { %v5915_v27 = vpack.c.bf16 %v5390_v43, %v3643_v47  ;;  %5914 = vmatprep.subr.bf16.mxu0 %v7684_v37  ;;  %v4127_v43 = vld [vmem:[%s7570_s15 + $0x18] sm:$0xff] }
 0x9bb   : > { %5916 = vmatpush3.bf16.msra.mxu0 %v5915_v27  ;;  %v5939_v27 = vpack.c.bf16 %v4127_v43, %v4126_v17 }
 0x9bc   : > { %5917 = vmatprep.subr.bf16.mxu0 %v7684_v37 }
 0x9be   : > { %5424 = vmatmul.mubr.f32.vlgmr.msra.gmra.mrb[110].mxu0 %v7268_v3  ;;  %v1331_v3 = vld [vmem:[%s7562_s7 + $0x58] sm:$0xff] }
 0x9bf   : > { %5442 = vmatprep.mubr.msk.f32.mxu0 %vm6149_vm1, %v7685_v21  ;;  %5919 = vmatpush3.bf16.msra.mxu0 %v5918_v44  ;;  %v5921_v41 = vpack.c.bf16 %v1331_v3, %v1330_v9  ;;  %v5942_v9 = vpack.c.bf16 %v4129_v7, %v4128_v16  ;;  %v4130_v44 = vld [vmem:[%s7570_s15 + $0x30] sm:$0xff]  ;;  %v4131_v3 = vld [vmem:[%s7570_s15 + $0x38] sm:$0xff] }
 0x9c0   : > { %5920 = vmatprep.subr.bf16.mxu0 %v7684_v37 }
 0x9c3   : > { %5922 = vmatpush3.bf16.msra.mxu0 %v5921_v41  ;;  %v5945_v41 = vpack.c.bf16 %v4131_v3, %v4130_v44 }
 0x9c4   : > { %5923 = vmatprep.subr.bf16.mxu0 %v7684_v37 }
 0x9c7   : > { %5925 = vmatpush3.bf16.msra.mxu0 %v5924_v6  ;;  %v4002_v6 = vld [vmem:[%s7568_s13 + $0x8] sm:$0xff] }
 0x9c8   : > { %5926 = vmatprep.subr.bf16.mxu0 %v7684_v37  ;;  %v4016_v31 = vrot.slane %v4002_v6, %v7740_v42 }
 0x9cb   : > { %5928 = vmatpush3.bf16.msra.mxu0 %v5927_v22  ;;  %v7741_v22 = vld [vmem:[#allocation17_spill] sm:$0xff] }
 0x9cc   : > { %5935 = vmatprep.subr.bf16.mxu0 %v7684_v37 }
 0x9e3   : > { %v3795_v45 = vpop.permute.xlu1 %3794 }
 0xa71   : > { %v4917_v40 = vpop.f32.mrb[108].mxu0 }
 0xa72   : > { %v4918_v2 = vpop.f32.mrb[109].mxu0 }
 0xa73   : > { %v4919_v11 = vadd.f32 %v4918_v2, %v4917_v40  ;;  %v4023_v40 = vrot.slane %v4002_v6, %v7741_v22 }
 0xa91   : > { %v3788_v59 = vpop.f32.mrb[110].mxu0 }
 0xa92   : > { %v3789_v18 = vadd.f32 %v4919_v11, %v3788_v59  ;;  %v5425_v53 = vpop.f32.mrb[111].mxu0  ;;  %v4511_v59 = vld [vmem:[%s7569_s14] ss:$0 sm:$0xff] }
 0xa94   : > { %v3797_v12 = vmul.f32 %v3795_v45, %v3789_v18 }
 0xa96   : > { %5443 = vmatmul.mubr.msk.f32.vlgmr.msra.gmra.mrb[112].mxu0 %vm1344_vm2, %v3797_v12  ;;  %v7743_v12 = vld [vmem:[#allocation18_spill] sm:$0xff] }
 0xa97   : > { %5472 = vmatprep.mubr.msk.f32.mxu0 %vm6149_vm1, %v7685_v21  ;;  %v3902_v21 = vld [vmem:[%s7566_s11] sm:$0xff]  ;;  %5937 = vmatpush3.bf16.msra.mxu0 %v5936_v57  ;;  %v4037_v23 = vrot.slane %v4002_v6, %v7743_v12 }
 0xa98   : > { %v5930_v62 = vpack.c.bf16 %v3903_v58, %v3902_v21  ;;  %5938 = vmatprep.subr.bf16.mxu0 %v7684_v37  ;;  %v7745_v21 = vld [vmem:[#allocation15_spill] sm:$0xff] }
 0xa99   : > { %v4057_v58 = vsub.s32 6, %v7745_v21 }
 0xa9a   : > { %5931 = vmatpush3.bf16.msra.mxu1 %v5930_v62 }
 0xa9b   : > { %5932 = vmatprep.subr.bf16.mxu1 %v7684_v37  ;;  %5940 = vmatpush3.bf16.msra.mxu0 %v5939_v27 }
 0xa9c   : > { %5941 = vmatprep.subr.bf16.mxu0 %v7684_v37 }
 0xa9e   : > { %5934 = vmatpush3.bf16.msra.mxu1 %v5933_v4 }
 0xa9f   : > { %5943 = vmatpush3.bf16.msra.mxu0 %v5942_v9 }
 0xaa0   : > { %5944 = vmatprep.subr.bf16.mxu0 %v7684_v37  ;;  %v7742_v37 = vld [vmem:[#allocation19_spill] sm:$0xff] }
 0xaa1   : > { %v4030_v18 = vrot.slane %v4002_v6, %v7742_v37 }
 0xaa3   : > { %5946 = vmatpush3.bf16.msra.mxu0 %v5945_v41 }
 0xb69   : > { %v3867_v26 = vpop.f32.mrb[112].mxu0 }
 0xb6a   : > { %v3871_v38 = vadd.f32 %v3867_v26, %v2602_v14  ;;  %v5444_v20 = vpop.f32.mrb[113].mxu0 }
 0xb6c   : > { %v7421_v60 = vadd.f32 %v6047_v61, %v3871_v38  ;;  %v7744_v38 = vld [vmem:[#allocation21_spill] sm:$0xff] }
 0xb6d   : > { %v4044_v20 = vrot.slane %v4002_v6, %v7744_v38 }
 0xb6e   : > { %v3873_v50 = vsel %vm560_vm0, %v7421_v60, 0.0 }
 0xb6f   : > { %3874 = vadd.xlane.f32.xlu1 %v3873_v50 }
 0xbfc   : > { %v3875_v1 = vpop.xlane.xlu1 %3874 }
 0xbfd   : > { %v3876_v5 = vmul.f32 0.03125, %v3875_v1  ;;  %v7746_v1 = vld [vmem:[#allocation22_spill] sm:$0xff] }
 0xbff   : > { %v3877_v33 = vsub.f32 %v7421_v60, %v3876_v5  ;;  %v4051_v5 = vrot.slane %v4002_v6, %v7746_v1 }
 0xc01   : > { %v3878_v34 = vmul.f32 %v3877_v33, %v3877_v33 }
 0xc03   : > { %v3879_v51 = vsel %vm560_vm0, %v3878_v34, 0.0 }
 0xc04   : > { %3880 = vadd.xlane.f32.xlu0 %v3879_v51  ;;  %v4064_v51 = vsub.s32 7, %v7745_v21 }
 0xc91   : > { %v3881_v24 = vpop.xlane.xlu0 %3880 }
 0xc92   : > { %v3882_v30 = vmul.f32 0.03125, %v3881_v24  ;;  %v4058_v24 = vrot.slane %v4002_v6, %v4057_v58 }
 0xc94   : > { %v3883_v8 = vadd.f32 1e-05, %v3882_v30  ;;  %v4003_v30 = vld [vmem:[%s7568_s13 + $0x10] sm:$0xff] }
 0xc95   : > { %v4093_v57 = vrot.slane %v4003_v30, %v7743_v12  ;;  %v4100_v16 = vrot.slane %v4003_v30, %v7744_v38  ;;  %v4107_v3 = vrot.slane %v4003_v30, %v7746_v1 }
 0xc96   : > { %6037 = vrsqrt.f32 %v3883_v8 }
 0xca0   : > { %v6038_v25 = vpop.eup %6037 }
 0xca1   : > { %v3885_v29 = vmul.f32 %v6038_v25, %v3877_v33 }
 0xca3   : > { %v3893_v48 = vmul.f32 %v4506_v15, %v3885_v29  ;;  %v4065_v29 = vrot.slane %v4002_v6, %v4064_v51 }
 0xca5   : > { %v3901_v49 = vadd.f32 %v4507_v46, %v3893_v48  ;;  %v4072_v48 = vrot.slane %v4003_v30, %v7740_v42 }
 0xca7   : > { %5454 = vmatmul.mubr.msk.f32.vlgmr.msra.gmra.mrb[114].mxu1 %vm560_vm0, %v3901_v49 }
 0xd7a   : > { %v3982_v54 = vpop.f32.mrb[114].mxu1 }
 0xd7b   : > { %v3983_v0 = vadd.f32 %v4508_v32, %v3982_v54  ;;  %v5455_v55 = vpop.f32.mrb[115].mxu1 }
 0xd7d   : > { %v4510_v63 = vmul.f32 -1.442695, %v3983_v0 }
 0xd7f   : > { %6039 = vpow2.f32 %v4510_v63 }
 0xd89   : > { %v6040_v35 = vpop.eup %6039 }
 0xd8a   : > { %v3989_v10 = vadd.f32 1.0, %v6040_v35 }
 0xd8c   : > { %6041 = vrcp.f32 %v3989_v10  ;;  %v4086_v10 = vrot.slane %v4003_v30, %v7742_v37 }
 0xd96   : > { %v6042_v47 = vpop.eup %6041 }
 0xd97   : > { %3993 = vrot.lane.b32.xlu0 %v6042_v47, %s6151_s21  ;;  %s4516_s21 = sshll.u32 %s6265_s28, 7  ;;  %s6076_s28 = scalar_lea.vmem %s7514_s23, 128 }
 0xd98   : > { %s7512_s30 = scalar_lea.hbm %s7572_s17, %s4516_s21  ;;  %p6077_p6 = scmp.ne.s32.totalorder %s7514_s23, %s6076_s28 }
 0xd99   : > { %p6084_p3 = scmp.lt.s32.totalorder %s6082_s27, %s6076_s28 }
 0xd9a   : > { %p6078_p10 = pnand %p6077_p6, %p7747_p9 }
 0xd9b   : > { %p6085_p4 = por %p6084_p3, %p6083_p2 }
 0xd9c   : > { %p6079_p12 = pneg %p6078_p10 }
 0xd9e   : > { %p6086_p7 = pnand %p6085_p4, %p6079_p12 }
 0xe09   : > { %v3994_v28 = vpop.permute.xlu0 %3993 }
 0xe0a   : > { %v3996_v39 = vmul.f32 %v3994_v28, %v3983_v0  ;;  %v4079_v0 = vrot.slane %v4003_v30, %v7741_v22 }
 0xe0c   : > { %4001 = vst.msk [vmem:[#allocation2 + $0x10] sm:$0xff] %vm1344_vm2, %v3996_v39 }
 0xe13   : > { %v4012_v2 = vld [vmem:[#allocation2 + $0x9] sm:$0xff]  ;;  %v4068_v54 = vld [vmem:[#allocation2 + $0x11] sm:$0xff] }
 0xe14   : > { %v4019_v11 = vld [vmem:[#allocation2 + $0xa] sm:$0xff]  ;;  %v4017_v53 = vmul.f32 %v4016_v31, %v4012_v2  ;;  %v4075_v35 = vld [vmem:[#allocation2 + $0x12] sm:$0xff]  ;;  %v4073_v56 = vmul.f32 %v4072_v48, %v4068_v54  ;;  %v4114_v31 = vrot.slane %v4003_v30, %v4057_v58 }
 0xe15   : > { %v4026_v45 = vld [vmem:[#allocation2 + $0xb] sm:$0xff]  ;;  %v4024_v14 = vmul.f32 %v4023_v40, %v4019_v11  ;;  %v4082_v17 = vld [vmem:[#allocation2 + $0x13] sm:$0xff]  ;;  %v4080_v47 = vmul.f32 %v4079_v0, %v4075_v35 }
 0xe16   : > { %v4018_v36 = vadd.f32 %v4511_v59, %v4017_v53  ;;  %v4033_v26 = vld [vmem:[#allocation2 + $0xc] sm:$0xff]  ;;  %v4031_v50 = vmul.f32 %v4030_v18, %v4026_v45  ;;  %v4089_v27 = vld [vmem:[#allocation2 + $0x14] sm:$0xff]  ;;  %v4087_v9 = vmul.f32 %v4086_v10, %v4082_v17 }
 0xe17   : > { %v4040_v62 = vld [vmem:[#allocation2 + $0xd] sm:$0xff]  ;;  %v4038_v34 = vmul.f32 %v4037_v23, %v4033_v26  ;;  %v4096_v44 = vld [vmem:[#allocation2 + $0x15] sm:$0xff]  ;;  %v4094_v28 = vmul.f32 %v4093_v57, %v4089_v27 }
 0xe18   : > { %v4025_v61 = vadd.f32 %v4024_v14, %v4018_v36  ;;  %v4047_v52 = vld [vmem:[#allocation2 + $0xe] sm:$0xff]  ;;  %v4045_v4 = vmul.f32 %v4044_v20, %v4040_v62  ;;  %v4103_v39 = vld [vmem:[#allocation2 + $0x16] sm:$0xff]  ;;  %v4101_v42 = vmul.f32 %v4100_v16, %v4096_v44  ;;  %v4513_v36 = vld [vmem:[%s7571_s16] ss:$0 sm:$0xff] }
 0xe19   : > { %v4054_v8 = vld [vmem:[#allocation2 + $0xf] sm:$0xff]  ;;  %v4052_v15 = vmul.f32 %v4051_v5, %v4047_v52  ;;  %v4110_v22 = vld [vmem:[#allocation2 + $0x17] sm:$0xff]  ;;  %v4108_v2 = vmul.f32 %v4107_v3, %v4103_v39 }
 0xe1a   : > { %v4032_v33 = vadd.f32 %v4031_v50, %v4025_v61  ;;  %v4061_v46 = vld [vmem:[#allocation2 + $0x10] sm:$0xff]  ;;  %v4059_v32 = vmul.f32 %v4058_v24, %v4054_v8  ;;  %v4115_v59 = vmul.f32 %v4114_v31, %v4110_v22 }
 0xe1b   : > { %v4066_v63 = vmul.f32 %v4065_v29, %v4061_v46 }
 0xe1c   : > { %v4039_v13 = vadd.f32 %v4038_v34, %v4032_v33 }
 0xe1e   : > { %v4046_v25 = vadd.f32 %v4045_v4, %v4039_v13 }
 0xe20   : > { %v4053_v49 = vadd.f32 %v4052_v15, %v4046_v25 }
 0xe22   : > { %v4060_v55 = vadd.f32 %v4059_v32, %v4053_v49 }
 0xe24   : > { %v4067_v19 = vadd.f32 %v4066_v63, %v4060_v55 }
 0xe26   : > { %v4074_v43 = vadd.f32 %v4073_v56, %v4067_v19 }
 0xe28   : > { %v4081_v7 = vadd.f32 %v4080_v47, %v4074_v43 }
 0xe2a   : > { %v4088_v41 = vadd.f32 %v4087_v9, %v4081_v7 }
 0xe2c   : > { %v4095_v6 = vadd.f32 %v4094_v28, %v4088_v41 }
 0xe2e   : > { %v4102_v40 = vadd.f32 %v4101_v42, %v4095_v6 }
 0xe30   : > { %v4109_v11 = vadd.f32 %v4108_v2, %v4102_v40 }
 0xe32   : > { %v4116_v37 = vadd.f32 %v4115_v59, %v4109_v11 }
 0xe34   : > { %v4512_v18 = vmul.f32 -1.442695, %v4116_v37 }
 0xe36   : > { %6043 = vpow2.f32 %v4512_v18 }
 0xe40   : > { %v6044_v53 = vpop.eup %6043 }
 0xe41   : > { %v4120_v45 = vadd.f32 1.0, %v6044_v53 }
 0xe43   : > { %6045 = vrcp.f32 %v4120_v45 }
 0xe4d   : > { %v6046_v12 = vpop.eup %6045 }
 0xe4e   : > { %v4123_v23 = vmul.f32 %v6046_v12, %v4116_v37 }
 0xe50   : > { %5473 = vmatmul.mubr.msk.f32.vlgmr.msra.gmra.mrb[114].mxu0 %vm1344_vm2, %v4123_v23 }
 0xf23   : > { %v4208_v14 = vpop.f32.mrb[114].mxu0 }
 0xf24   : > { %v4209_v26 = vadd.f32 %v4513_v36, %v4208_v14  ;;  %v5474_v38 = vpop.f32.mrb[115].mxu0 }
 0xf26   : > { %v4212_v20 = vadd.f32 %v4209_v26, %v7421_v60 }
 0xf28   : > { %4213 = vst.msk [vmem:[%s554_s22] sm:$0xff] %vm560_vm0, %v4212_v20 }
 0xf29   : > { %6089 = shalt.err (!%p6086_p7)
}
 0xf2a   : > { %s6090_s19 = scalar_lea.hbm %s7512_s30, 128  ;;  %s6094_s22 = scalar_lea.hbm %s7572_s17, 256 }
 0xf2b   : > { %p6091_p8 = scmp.ne.s32.totalorder %s7512_s30, %s6090_s19  ;;  %p6095_p1 = scmp.lt.u32.totalorder %s7512_s30, %s7572_s17 }
 0xf2c   : > { %p6096_p0 = scmp.lt.u32.totalorder %s6094_s22, %s6090_s19  ;;  %p6098_p6 = scmp.lt.u32.totalorder %s6090_s19, %s7512_s30 }
 0xf2d   : > { %p6092_p11 = pnand %p6091_p8, %p7747_p9 }
 0xf2e   : > { %p6097_p5 = por %p6096_p0, %p6095_p1 }
 0xf2f   : > { %p6093_p13 = pneg %p6092_p11 }
 0xf30   : > { %p6099_p10 = por %p6098_p6, %p6097_p5 }
 0xf32   : > { %p6100_p12 = pnand %p6099_p10, %p6093_p13 }
 0xf34   : > { %6103 = shalt.err (!%p6100_p12)
}
 0xf35   : > { %5951 = dma.vmem_to_hbm [thread:$0]  (%p7747_p9), %s7514_s23, 128, %s7512_s30, %s4215_s18  }
 0xf36 PF: > { %s7748_s28 = sld [smem:[#allocation11_spill]]  ;;  %s7749_s24 = sld [smem:[#allocation9_spill]] }
 0xf37   : > { %s7750_s20 = sld [smem:[#allocation14_spill]] }
 0xf3c   : > { %p5963_p2 = scmp.ge.s32.totalorder %s7748_s28, 2  ;;  %s4240_s27 = sand.u32 1, %s7749_s24  }
 0xf3d   : > { %p7751_p3 = scmp.ne.s32.totalorder %s7750_s20, 0  ;;  %s4241_s29 = scalar_lea.sflag [#allocation5], %s4240_s27 }
 0xf3f   : > { %p5958_p4 = pnand %p5963_p2, %p7751_p3 }
 0xf41   : > { %6125 = dma.done.wait (!%p5958_p4), %s4241_s29, 128  }
 0xf42   : > { %6127 = vsyncadd (!%p5958_p4), %s4241_s29, 4294967168  ;;  %s7752_s27 = sld [smem:[#allocation12_spill]]  ;;  %s7753_s19 = sld [smem:[#allocation10_spill]] }
 0xf43   : > { %s7754_s26 = sld [smem:[#allocation13_spill]]  ;;  %s7755_s24 = smov %s6134_s25 }
 0xf48   : > { %p28_p7 = scmp.ge.s32.totalorder %s7752_s27, 4   ;;  %s7756_s25 = smov %s7753_s19 }
 0xf4a   :  { %30 = sbr.rel (!%p28_p7) target bundleno = 7 (0x7), region = 128 }
 0xf51   :  { %4246 = vsyncpa [#allocation4], 1 }
 0xf52   :  { %4248 = vsyncpa [#allocation4 + $0x1], 1 }
 0xf53   :  { %4249 = vsyncpa [#allocation5], 1 }
 0xf54   :  { %4251 = vsyncpa [#allocation5 + $0x1], 1 }

</bundles_post_ra>
